<compile_context>
chip_gen: v7x
topology: tpu7x:2x2x1
jax: 0.10.0
libtpu: 0.0.40
codegen_flags: <defaults>
</compile_context>

<pallas_src>
import functools

import jax
import jax.numpy as jnp
from jax.experimental import pallas as pl
from jax.experimental.pallas import tpu as pltpu


def _make_mlp_kernel(n_layers: int, dim_a: int):
    """Fused MLP kernel: one_hot+concat folded into layer 0, tanh on hidden layers."""

    def kernel(s0_ref, a_ref, *refs):
        # refs layout: w0_s, w0_a, b0, w1, b1, ..., w_{L-1}, b_{L-1}, out_ref
        out_ref = refs[-1]
        prm = refs[:-1]

        w0_s = prm[0][...]                        # [dim_s, h0]  f32
        w0_a = prm[1][...]                        # [dim_a, h0]  f32
        b0 = prm[2][...]                          # [1, h0]      f32

        s0 = s0_ref[...]                          # [tb, dim_s]  f32
        a_col = a_ref[...]                        # [tb, 1]      i32

        # --- layer 0: s0 @ W0_s + one_hot(a) @ W0_a + b0 ------------------------
        # one_hot(a) @ W0_a as an unrolled select-accumulate over the dim_a rows of
        # W0_a: K=dim_a is far too small for the MXU, and the VPU has idle slots.
        x = jnp.dot(s0, w0_s, preferred_element_type=jnp.float32)
        gathered = jnp.zeros_like(x)
        for k in range(dim_a):
            row = w0_a[k:k + 1, :]                                  # [1, h0] static slice
            gathered = gathered + jnp.where(a_col == k, row, 0.0)   # [tb, h0]
        x = x + gathered + b0
        if n_layers > 1:
            x = jnp.tanh(x)                       # EUP

        # --- remaining layers ----------------------------------------------------
        for layer in range(1, n_layers):
            w = prm[2 * layer + 1][...]
            b = prm[2 * layer + 2][...]
            x = jnp.dot(x, w, preferred_element_type=jnp.float32) + b
            if layer < n_layers - 1:              # tanh on hidden layers only
                x = jnp.tanh(x)

        out_ref[...] = x.astype(out_ref.dtype)

    return kernel


def prepare_params(params, *, dim_s):
    """One-time (hoisted) parameter prep.

    params: list of (W, b); W stored as (in, out), b as (1, out)
            (y = x @ W + b, equivalent to PyTorch's x @ W_t.T + b)

    Returns a flat tuple (w0_state, w0_action, b0, w1, b1, ..., wL, bL) in f32.
    Call once and reuse; nothing here should run per forward call.
    """
    w0, b0 = params[0]
    flat = [jnp.asarray(w0[:dim_s], jnp.float32),
            jnp.asarray(w0[dim_s:], jnp.float32),
            jnp.asarray(b0, jnp.float32)]
    for (w, b) in params[1:]:
        flat.append(jnp.asarray(w, jnp.float32))
        flat.append(jnp.asarray(b, jnp.float32))
    return tuple(flat)


def mlp_transition_forward(s0, a_int, flat_params, *, dim_s, dim_a, batch_tile=None):
    """Forward pass of MLPTransitionNet (integer actions).

    s0:          [B, dim_s] float
    a_int:       [B] integer actions (one-hot + concat are fused into the kernel)
    flat_params: output of prepare_params()
    """
    assert not jnp.issubdtype(a_int.dtype, jnp.floating), (
        "float (pre-one-hot) actions not supported by the fused kernel")
    B, s_dim = s0.shape
    assert s_dim == dim_s
    out_dtype = s0.dtype  # NOTE: could be bf16 if downstream accepts it (halves writeback)

    n_layers = (len(flat_params) - 1) // 2
    dout = flat_params[-1].shape[1]

    # Default: single grid step (tb = B). Per-step overhead dominates this kernel, so
    # only split the batch when it is very large.
    tb = B if batch_tile is None else min(batch_tile, B)
    assert B % tb == 0 and tb % 8 == 0, "batch must split into 8-row-aligned tiles"
    n_steps = B // tb

    a_col = a_int.reshape(B, 1).astype(jnp.int32)

    kernel = _make_mlp_kernel(n_layers, dim_a)

    in_specs = [
        pl.BlockSpec((tb, dim_s), lambda i: (i, 0)),   # s0 batch tile
        pl.BlockSpec((tb, 1), lambda i: (i, 0)),       # action-index tile
    ]
    # Weights/biases: full-array blocks with constant index maps -> DMA'd once per call.
    for arr in flat_params:
        in_specs.append(pl.BlockSpec(arr.shape, lambda i: (0, 0)))

    out_spec = pl.BlockSpec((tb, dout), lambda i: (i, 0))

    return pl.pallas_call(
        kernel,
        out_shape=jax.ShapeDtypeStruct((B, dout), out_dtype),
        grid_spec=pltpu.PrefetchScalarGridSpec(
            num_scalar_prefetch=0,
            grid=(n_steps,),
            in_specs=in_specs,
            out_specs=out_spec,
        ),
        compiler_params=pltpu.CompilerParams(
            # Dual-TC split only pays off when each tile has real work (huge B).
            dimension_semantics=(("parallel",) if n_steps > 1 else ("arbitrary",)),
        ),
    )(s0, a_col, *flat_params)


def _init_params(key, dims):
    """Deterministic PyTorch-Linear-like init. Weights stored as (in, out)."""
    params = []
    for i in range(len(dims) - 1):
        fan_in, fan_out = dims[i], dims[i + 1]
        key, kw, kb = jax.random.split(key, 3)
        bound = 1.0 / jnp.sqrt(fan_in)
        w = jax.random.uniform(kw, (fan_in, fan_out), jnp.float32, -bound, bound)
        b = jax.random.uniform(kb, (1, fan_out), jnp.float32, -bound, bound)
        params.append((w, b))
    return params


def _reference_forward(s0, a_int, params, dim_a):
    a_onehot = jax.nn.one_hot(a_int, dim_a, dtype=s0.dtype)
    x = jnp.concatenate([s0, a_onehot], axis=-1)
    n = len(params)
    for i, (w, b) in enumerate(params):
        x = x @ w + b
        if i < n - 1:
            x = jnp.tanh(x)
    return x


if __name__ == "__main__":
    # Config: dim_s=32, dim_a=8, dim_h=(64, 64), act='tanh', use_bn=False
    dim_s, dim_a = 32, 8
    dim_h = (64, 64)
    dims = (dim_s + dim_a,) + dim_h + (dim_s,)

    B = 256
    key = jax.random.PRNGKey(0)
    key, ks, ka, kp = jax.random.split(key, 4)

    s0 = jax.random.normal(ks, (B, dim_s), dtype=jnp.float32)
    a = jax.random.randint(ka, (B,), 0, dim_a)            # integer actions
    params = _init_params(kp, dims)

    # Hoisted, one-time parameter prep (no per-call pad/cast/slice XLA ops).
    flat_params = prepare_params(params, dim_s=dim_s)

    fwd = jax.jit(functools.partial(
        mlp_transition_forward, dim_s=dim_s, dim_a=dim_a))
    s1 = jax.block_until_ready(fwd(s0, a, flat_params))

    ref = _reference_forward(s0, a, params, dim_a)
    assert s1.shape == (B, dim_s)
    err = float(jnp.max(jnp.abs(s1 - ref)))
    assert err < 1e-4, f"mismatch vs JAX reference: max abs err {err}"

    print("KERNEL_OK")
</pallas_src>

<mosaic_0001>
module attributes {stable_mosaic.version = 11 : i64} {
  func.func @kernel(%arg0: i32, %arg1: memref<256x32xf32, #tpu.memory_space<vmem>>, %arg2: memref<256x1xi32, #tpu.memory_space<vmem>>, %arg3: memref<32x64xf32, #tpu.memory_space<vmem>>, %arg4: memref<8x64xf32, #tpu.memory_space<vmem>>, %arg5: memref<1x64xf32, #tpu.memory_space<vmem>>, %arg6: memref<64x64xf32, #tpu.memory_space<vmem>>, %arg7: memref<1x64xf32, #tpu.memory_space<vmem>>, %arg8: memref<64x32xf32, #tpu.memory_space<vmem>>, %arg9: memref<1x32xf32, #tpu.memory_space<vmem>>, %arg10: memref<256x32xf32, #tpu.memory_space<vmem>>) attributes {dimension_semantics = [#tpu.dimension_semantics<arbitrary>], iteration_bounds = array<i64: 1>, scalar_prefetch = 0 : i64, scratch_operands = 0 : i64, tpu.core_type = #tpu.core_type<tc>, window_params = [{transform_indices = @transform_0, window_bounds = array<i64: 256, 32>}, {transform_indices = @transform_1, window_bounds = array<i64: 256, 1>}, {pipeline_mode = #tpu.pipeline_mode<synchronous>, transform_indices = @transform_2, window_bounds = array<i64: 32, 64>}, {pipeline_mode = #tpu.pipeline_mode<synchronous>, transform_indices = @transform_3, window_bounds = array<i64: 8, 64>}, {pipeline_mode = #tpu.pipeline_mode<synchronous>, transform_indices = @transform_4, window_bounds = array<i64: 1, 64>}, {pipeline_mode = #tpu.pipeline_mode<synchronous>, transform_indices = @transform_5, window_bounds = array<i64: 64, 64>}, {pipeline_mode = #tpu.pipeline_mode<synchronous>, transform_indices = @transform_6, window_bounds = array<i64: 1, 64>}, {pipeline_mode = #tpu.pipeline_mode<synchronous>, transform_indices = @transform_7, window_bounds = array<i64: 64, 32>}, {pipeline_mode = #tpu.pipeline_mode<synchronous>, transform_indices = @transform_8, window_bounds = array<i64: 1, 32>}, {transform_indices = @transform_9, window_bounds = array<i64: 256, 32>}]} {
    %c0 = arith.constant 0 : index
    %c0_0 = arith.constant 0 : index
    %0 = vector.load %arg3[%c0, %c0_0] : memref<32x64xf32, #tpu.memory_space<vmem>>, vector<32x64xf32>
    %c0_1 = arith.constant 0 : index
    %c0_2 = arith.constant 0 : index
    %1 = vector.load %arg4[%c0_1, %c0_2] : memref<8x64xf32, #tpu.memory_space<vmem>>, vector<8x64xf32>
    %c0_3 = arith.constant 0 : index
    %c0_4 = arith.constant 0 : index
    %2 = vector.load %arg5[%c0_3, %c0_4] : memref<1x64xf32, #tpu.memory_space<vmem>>, vector<1x64xf32>
    %c0_5 = arith.constant 0 : index
    %c0_6 = arith.constant 0 : index
    %3 = vector.load %arg1[%c0_5, %c0_6] : memref<256x32xf32, #tpu.memory_space<vmem>>, vector<256x32xf32>
    %c0_7 = arith.constant 0 : index
    %c0_8 = arith.constant 0 : index
    %4 = vector.load %arg2[%c0_7, %c0_8] : memref<256x1xi32, #tpu.memory_space<vmem>>, vector<256x1xi32>
    %cst = arith.constant dense<0.000000e+00> : vector<256x64xf32>
    %5 = tpu.matmul %3, %0, %cst {dimension_numbers = #tpu.dot_dimension_numbers<[1], [0], [0], [1], [0, 0, 1, 1], [], []>} : vector<256x32xf32>, vector<32x64xf32>, vector<256x64xf32> -> vector<256x64xf32>
    %cst_9 = arith.constant 0.000000e+00 : f32
    %6 = vector.broadcast %cst_9 : f32 to vector<256x64xf32>
    %7 = vector.extract_strided_slice %1 {offsets = [0, 0], sizes = [1, 64], strides = [1, 1]} : vector<8x64xf32> to vector<1x64xf32>
    %c0_i32 = arith.constant 0 : i32
    %8 = vector.broadcast %c0_i32 : i32 to vector<256x1xi32>
    %9 = arith.cmpi eq, %4, %8 : vector<256x1xi32>
    %cst_10 = arith.constant 0.000000e+00 : f32
    %10 = vector.shape_cast %9 : vector<256x1xi1> to vector<256x1xi1>
    %11 = vector.broadcast %10 : vector<256x1xi1> to vector<256x64xi1>
    %12 = vector.shape_cast %7 : vector<1x64xf32> to vector<1x64xf32>
    %13 = vector.broadcast %12 : vector<1x64xf32> to vector<256x64xf32>
    %14 = vector.broadcast %cst_10 : f32 to vector<256x64xf32>
    %15 = arith.select %11, %13, %14 : vector<256x64xi1>, vector<256x64xf32>
    %16 = arith.addf %6, %15 : vector<256x64xf32>
    %17 = vector.extract_strided_slice %1 {offsets = [1, 0], sizes = [1, 64], strides = [1, 1]} : vector<8x64xf32> to vector<1x64xf32>
    %c1_i32 = arith.constant 1 : i32
    %18 = vector.broadcast %c1_i32 : i32 to vector<256x1xi32>
    %19 = arith.cmpi eq, %4, %18 : vector<256x1xi32>
    %cst_11 = arith.constant 0.000000e+00 : f32
    %20 = vector.shape_cast %19 : vector<256x1xi1> to vector<256x1xi1>
    %21 = vector.broadcast %20 : vector<256x1xi1> to vector<256x64xi1>
    %22 = vector.shape_cast %17 : vector<1x64xf32> to vector<1x64xf32>
    %23 = vector.broadcast %22 : vector<1x64xf32> to vector<256x64xf32>
    %24 = vector.broadcast %cst_11 : f32 to vector<256x64xf32>
    %25 = arith.select %21, %23, %24 : vector<256x64xi1>, vector<256x64xf32>
    %26 = arith.addf %16, %25 : vector<256x64xf32>
    %27 = vector.extract_strided_slice %1 {offsets = [2, 0], sizes = [1, 64], strides = [1, 1]} : vector<8x64xf32> to vector<1x64xf32>
    %c2_i32 = arith.constant 2 : i32
    %28 = vector.broadcast %c2_i32 : i32 to vector<256x1xi32>
    %29 = arith.cmpi eq, %4, %28 : vector<256x1xi32>
    %cst_12 = arith.constant 0.000000e+00 : f32
    %30 = vector.shape_cast %29 : vector<256x1xi1> to vector<256x1xi1>
    %31 = vector.broadcast %30 : vector<256x1xi1> to vector<256x64xi1>
    %32 = vector.shape_cast %27 : vector<1x64xf32> to vector<1x64xf32>
    %33 = vector.broadcast %32 : vector<1x64xf32> to vector<256x64xf32>
    %34 = vector.broadcast %cst_12 : f32 to vector<256x64xf32>
    %35 = arith.select %31, %33, %34 : vector<256x64xi1>, vector<256x64xf32>
    %36 = arith.addf %26, %35 : vector<256x64xf32>
    %37 = vector.extract_strided_slice %1 {offsets = [3, 0], sizes = [1, 64], strides = [1, 1]} : vector<8x64xf32> to vector<1x64xf32>
    %c3_i32 = arith.constant 3 : i32
    %38 = vector.broadcast %c3_i32 : i32 to vector<256x1xi32>
    %39 = arith.cmpi eq, %4, %38 : vector<256x1xi32>
    %cst_13 = arith.constant 0.000000e+00 : f32
    %40 = vector.shape_cast %39 : vector<256x1xi1> to vector<256x1xi1>
    %41 = vector.broadcast %40 : vector<256x1xi1> to vector<256x64xi1>
    %42 = vector.shape_cast %37 : vector<1x64xf32> to vector<1x64xf32>
    %43 = vector.broadcast %42 : vector<1x64xf32> to vector<256x64xf32>
    %44 = vector.broadcast %cst_13 : f32 to vector<256x64xf32>
    %45 = arith.select %41, %43, %44 : vector<256x64xi1>, vector<256x64xf32>
    %46 = arith.addf %36, %45 : vector<256x64xf32>
    %47 = vector.extract_strided_slice %1 {offsets = [4, 0], sizes = [1, 64], strides = [1, 1]} : vector<8x64xf32> to vector<1x64xf32>
    %c4_i32 = arith.constant 4 : i32
    %48 = vector.broadcast %c4_i32 : i32 to vector<256x1xi32>
    %49 = arith.cmpi eq, %4, %48 : vector<256x1xi32>
    %cst_14 = arith.constant 0.000000e+00 : f32
    %50 = vector.shape_cast %49 : vector<256x1xi1> to vector<256x1xi1>
    %51 = vector.broadcast %50 : vector<256x1xi1> to vector<256x64xi1>
    %52 = vector.shape_cast %47 : vector<1x64xf32> to vector<1x64xf32>
    %53 = vector.broadcast %52 : vector<1x64xf32> to vector<256x64xf32>
    %54 = vector.broadcast %cst_14 : f32 to vector<256x64xf32>
    %55 = arith.select %51, %53, %54 : vector<256x64xi1>, vector<256x64xf32>
    %56 = arith.addf %46, %55 : vector<256x64xf32>
    %57 = vector.extract_strided_slice %1 {offsets = [5, 0], sizes = [1, 64], strides = [1, 1]} : vector<8x64xf32> to vector<1x64xf32>
    %c5_i32 = arith.constant 5 : i32
    %58 = vector.broadcast %c5_i32 : i32 to vector<256x1xi32>
    %59 = arith.cmpi eq, %4, %58 : vector<256x1xi32>
    %cst_15 = arith.constant 0.000000e+00 : f32
    %60 = vector.shape_cast %59 : vector<256x1xi1> to vector<256x1xi1>
    %61 = vector.broadcast %60 : vector<256x1xi1> to vector<256x64xi1>
    %62 = vector.shape_cast %57 : vector<1x64xf32> to vector<1x64xf32>
    %63 = vector.broadcast %62 : vector<1x64xf32> to vector<256x64xf32>
    %64 = vector.broadcast %cst_15 : f32 to vector<256x64xf32>
    %65 = arith.select %61, %63, %64 : vector<256x64xi1>, vector<256x64xf32>
    %66 = arith.addf %56, %65 : vector<256x64xf32>
    %67 = vector.extract_strided_slice %1 {offsets = [6, 0], sizes = [1, 64], strides = [1, 1]} : vector<8x64xf32> to vector<1x64xf32>
    %c6_i32 = arith.constant 6 : i32
    %68 = vector.broadcast %c6_i32 : i32 to vector<256x1xi32>
    %69 = arith.cmpi eq, %4, %68 : vector<256x1xi32>
    %cst_16 = arith.constant 0.000000e+00 : f32
    %70 = vector.shape_cast %69 : vector<256x1xi1> to vector<256x1xi1>
    %71 = vector.broadcast %70 : vector<256x1xi1> to vector<256x64xi1>
    %72 = vector.shape_cast %67 : vector<1x64xf32> to vector<1x64xf32>
    %73 = vector.broadcast %72 : vector<1x64xf32> to vector<256x64xf32>
    %74 = vector.broadcast %cst_16 : f32 to vector<256x64xf32>
    %75 = arith.select %71, %73, %74 : vector<256x64xi1>, vector<256x64xf32>
    %76 = arith.addf %66, %75 : vector<256x64xf32>
    %77 = vector.extract_strided_slice %1 {offsets = [7, 0], sizes = [1, 64], strides = [1, 1]} : vector<8x64xf32> to vector<1x64xf32>
    %c7_i32 = arith.constant 7 : i32
    %78 = vector.broadcast %c7_i32 : i32 to vector<256x1xi32>
    %79 = arith.cmpi eq, %4, %78 : vector<256x1xi32>
    %cst_17 = arith.constant 0.000000e+00 : f32
    %80 = vector.shape_cast %79 : vector<256x1xi1> to vector<256x1xi1>
    %81 = vector.broadcast %80 : vector<256x1xi1> to vector<256x64xi1>
    %82 = vector.shape_cast %77 : vector<1x64xf32> to vector<1x64xf32>
    %83 = vector.broadcast %82 : vector<1x64xf32> to vector<256x64xf32>
    %84 = vector.broadcast %cst_17 : f32 to vector<256x64xf32>
    %85 = arith.select %81, %83, %84 : vector<256x64xi1>, vector<256x64xf32>
    %86 = arith.addf %76, %85 : vector<256x64xf32>
    %87 = arith.addf %5, %86 : vector<256x64xf32>
    %88 = vector.broadcast %2 : vector<1x64xf32> to vector<256x64xf32>
    %89 = arith.addf %87, %88 : vector<256x64xf32>
    %90 = math.tanh %89 : vector<256x64xf32>
    %c0_18 = arith.constant 0 : index
    %c0_19 = arith.constant 0 : index
    %91 = vector.load %arg6[%c0_18, %c0_19] : memref<64x64xf32, #tpu.memory_space<vmem>>, vector<64x64xf32>
    %c0_20 = arith.constant 0 : index
    %c0_21 = arith.constant 0 : index
    %92 = vector.load %arg7[%c0_20, %c0_21] : memref<1x64xf32, #tpu.memory_space<vmem>>, vector<1x64xf32>
    %cst_22 = arith.constant dense<0.000000e+00> : vector<256x64xf32>
    %93 = tpu.matmul %90, %91, %cst_22 {dimension_numbers = #tpu.dot_dimension_numbers<[1], [0], [0], [1], [0, 0, 1, 1], [], []>} : vector<256x64xf32>, vector<64x64xf32>, vector<256x64xf32> -> vector<256x64xf32>
    %94 = vector.broadcast %92 : vector<1x64xf32> to vector<256x64xf32>
    %95 = arith.addf %93, %94 : vector<256x64xf32>
    %96 = math.tanh %95 : vector<256x64xf32>
    %c0_23 = arith.constant 0 : index
    %c0_24 = arith.constant 0 : index
    %97 = vector.load %arg8[%c0_23, %c0_24] : memref<64x32xf32, #tpu.memory_space<vmem>>, vector<64x32xf32>
    %c0_25 = arith.constant 0 : index
    %c0_26 = arith.constant 0 : index
    %98 = vector.load %arg9[%c0_25, %c0_26] : memref<1x32xf32, #tpu.memory_space<vmem>>, vector<1x32xf32>
    %cst_27 = arith.constant dense<0.000000e+00> : vector<256x32xf32>
    %99 = tpu.matmul %96, %97, %cst_27 {dimension_numbers = #tpu.dot_dimension_numbers<[1], [0], [0], [1], [0, 0, 1, 1], [], []>} : vector<256x64xf32>, vector<64x32xf32>, vector<256x32xf32> -> vector<256x32xf32>
    %100 = vector.broadcast %98 : vector<1x32xf32> to vector<256x32xf32>
    %101 = arith.addf %99, %100 : vector<256x32xf32>
    %c0_28 = arith.constant 0 : index
    %c0_29 = arith.constant 0 : index
    %102 = vector.load %arg10[%c0_28, %c0_29] : memref<256x32xf32, #tpu.memory_space<vmem>>, vector<256x32xf32>
    tpu.vector_store %arg10[%c0_28, %c0_29], %101 {strides = array<i32>} : memref<256x32xf32, #tpu.memory_space<vmem>>, vector<256x32xf32>,
    return
  }
  func.func @transform_0(%arg0: i32) -> (i32, i32) {
    %c0_i32 = arith.constant 0 : i32
    %c0_i32_0 = arith.constant 0 : i32
    return %arg0, %c0_i32 : i32, i32
  }
  func.func @transform_1(%arg0: i32) -> (i32, i32) {
    %c0_i32 = arith.constant 0 : i32
    %c0_i32_0 = arith.constant 0 : i32
    return %arg0, %c0_i32 : i32, i32
  }
  func.func @transform_2(%arg0: i32) -> (i32, i32) {
    %c0_i32 = arith.constant 0 : i32
    %c0_i32_0 = arith.constant 0 : i32
    %c0_i32_1 = arith.constant 0 : i32
    return %c0_i32, %c0_i32_0 : i32, i32
  }
  func.func @transform_3(%arg0: i32) -> (i32, i32) {
    %c0_i32 = arith.constant 0 : i32
    %c0_i32_0 = arith.constant 0 : i32
    %c0_i32_1 = arith.constant 0 : i32
    return %c0_i32, %c0_i32_0 : i32, i32
  }
  func.func @transform_4(%arg0: i32) -> (i32, i32) {
    %c0_i32 = arith.constant 0 : i32
    %c0_i32_0 = arith.constant 0 : i32
    %c0_i32_1 = arith.constant 0 : i32
    return %c0_i32, %c0_i32_0 : i32, i32
  }
  func.func @transform_5(%arg0: i32) -> (i32, i32) {
    %c0_i32 = arith.constant 0 : i32
    %c0_i32_0 = arith.constant 0 : i32
    %c0_i32_1 = arith.constant 0 : i32
    return %c0_i32, %c0_i32_0 : i32, i32
  }
  func.func @transform_6(%arg0: i32) -> (i32, i32) {
    %c0_i32 = arith.constant 0 : i32
    %c0_i32_0 = arith.constant 0 : i32
    %c0_i32_1 = arith.constant 0 : i32
    return %c0_i32, %c0_i32_0 : i32, i32
  }
  func.func @transform_7(%arg0: i32) -> (i32, i32) {
    %c0_i32 = arith.constant 0 : i32
    %c0_i32_0 = arith.constant 0 : i32
    %c0_i32_1 = arith.constant 0 : i32
    return %c0_i32, %c0_i32_0 : i32, i32
  }
  func.func @transform_8(%arg0: i32) -> (i32, i32) {
    %c0_i32 = arith.constant 0 : i32
    %c0_i32_0 = arith.constant 0 : i32
    %c0_i32_1 = arith.constant 0 : i32
    return %c0_i32, %c0_i32_0 : i32, i32
  }
  func.func @transform_9(%arg0: i32) -> (i32, i32) {
    %c0_i32 = arith.constant 0 : i32
    %c0_i32_0 = arith.constant 0 : i32
    return %arg0, %c0_i32 : i32, i32
  }
}

</mosaic_0001>

<bundles_post_ra>
// kernel: mlp_transition_forward.1
= control target key start
LH: loop header
LB: loop body
LE: loop exit
PB: predicated region body
PF: predicated region fallthrough
CT: control target
= control target key end

     0   :  { %v6429_v0 = vmov 0   ;;  %s6416_s1 = inlined_call_operand.vmem [shape: s32[256,1], index: 1, kind: input, shape index: {}]   ;;  %s6417_s2 = inlined_call_operand.vmem [shape: f32[32,64], index: 2, kind: input, shape index: {}]   ;;  %s6418_s0 = inlined_call_operand.vmem [shape: f32[256,32], index: 0, kind: input, shape index: {}]   ;;  %s6419_s3 = inlined_call_operand.vmem [shape: f32[8,64], index: 3, kind: input, shape index: {}]   ;;  %s6420_s5 = inlined_call_operand.vmem [shape: f32[64,64], index: 5, kind: input, shape index: {}]   ;;  %s6421_s4 = inlined_call_operand.vmem [shape: f32[1,64], index: 4, kind: input, shape index: {}]   ;;  %s6422_s7 = inlined_call_operand.vmem [shape: f32[64,32], index: 7, kind: input, shape index: {}]   ;;  %s6423_s6 = inlined_call_operand.vmem [shape: f32[1,64], index: 6, kind: input, shape index: {}]   ;;  %s6424_s8 = inlined_call_operand.vmem [shape: f32[1,32], index: 8, kind: input, shape index: {}]   ;;  %s6425_s9 = inlined_call_operand.vmem [shape: f32[256,32], index: 9, kind: output, shape index: {}]  }
   0x1   :  { %3760 = vset.pattern.permute.xlu1 %v6429_v0  ;;  %3759 = vset.pattern.permute.xlu0 %v6429_v0  ;;  %v3980_v1 = vld [vmem:[%s6416_s1 + $0x10] sm:$0xff]  ;;  %v3985_v2 = vld [vmem:[%s6416_s1] sm:$0xff]  ;;  %v3990_v3 = vld [vmem:[%s6416_s1 + $0x18] sm:$0xff] }
   0x2   :  { %vm104_vm0 = vcmp.eq.s32.totalorder %v3980_v1, 0  ;;  %vm102_vm1 = vcmp.eq.s32.totalorder %v3985_v2, 0  ;;  %vm105_vm2 = vcmp.eq.s32.totalorder %v3990_v3, 0  ;;  %v3998_v4 = vld [vmem:[%s6416_s1 + $0x8] sm:$0xff]  ;;  %v4011_v8 = vld [vmem:[%s6416_s1 + $0x20] sm:$0xff]  ;;  %v4020_v11 = vld [vmem:[%s6416_s1 + $0x38] sm:$0xff] }
   0x3   :  { %v136_v5 = vsel %vm104_vm0, 1, %v6429_v0  ;;  %v134_v6 = vsel %vm102_vm1, 1, %v6429_v0  ;;  %vm103_vm3 = vcmp.eq.s32.totalorder %v3998_v4, 0  ;;  %v4006_v7 = vld [vmem:[%s6416_s1 + $0x28] sm:$0xff]  ;;  %v137_v9 = vsel %vm105_vm2, 1, %v6429_v0  ;;  %v4025_v12 = vld [vmem:[%s6416_s1 + $0x30] sm:$0xff] }
   0x4   :  { %173 = vperm.xlu1 %3760, %v136_v5   ;;  %167 = vperm.xlu0 %3759, %v134_v6   ;;  %v135_v10 = vsel %vm103_vm3, 1, %v6429_v0  ;;  %vm107_vm4 = vcmp.eq.s32.totalorder %v4006_v7, 0  ;;  %vm106_vm5 = vcmp.eq.s32.totalorder %v4011_v8, 0  ;;  %vm109_vm6 = vcmp.eq.s32.totalorder %v4020_v11, 0  ;;  %v4034_v15 = vld [vmem:[%s6416_s1 + $0x48] sm:$0xff]  ;;  %v4039_v16 = vld [vmem:[%s6416_s1 + $0x40] sm:$0xff] }
   0x5   :  { %v139_v13 = vsel %vm107_vm4, 1, %v6429_v0  ;;  %v138_v14 = vsel %vm106_vm5, 1, %v6429_v0  ;;  %vm108_vm7 = vcmp.eq.s32.totalorder %v4025_v12, 0  ;;  %v141_v17 = vsel %vm109_vm6, 1, %v6429_v0  ;;  %v4048_v19 = vld [vmem:[%s6416_s1 + $0x58] sm:$0xff]  ;;  %v4053_v20 = vld [vmem:[%s6416_s1 + $0x50] sm:$0xff] }
   0x6   :  { %v140_v18 = vsel %vm108_vm7, 1, %v6429_v0  ;;  %vm111_vm8 = vcmp.eq.s32.totalorder %v4034_v15, 0  ;;  %vm110_vm9 = vcmp.eq.s32.totalorder %v4039_v16, 0  ;;  %vm113_vm10 = vcmp.eq.s32.totalorder %v4048_v19, 0  ;;  %v4062_v23 = vld [vmem:[%s6416_s1 + $0x68] sm:$0xff]  ;;  %v4067_v24 = vld [vmem:[%s6416_s1 + $0x60] sm:$0xff] }
   0x7   :  { %v143_v21 = vsel %vm111_vm8, 1, %v6429_v0  ;;  %v142_v22 = vsel %vm110_vm9, 1, %v6429_v0  ;;  %vm112_vm11 = vcmp.eq.s32.totalorder %v4053_v20, 0  ;;  %v145_v25 = vsel %vm113_vm10, 1, %v6429_v0  ;;  %v4076_v27 = vld [vmem:[%s6416_s1 + $0x78] sm:$0xff]  ;;  %v4081_v28 = vld [vmem:[%s6416_s1 + $0x70] sm:$0xff] }
   0x8   :  { %176 = vperm.xlu1 %3760, %v137_v9   ;;  %170 = vperm.xlu0 %3759, %v135_v10   ;;  %v144_v26 = vsel %vm112_vm11, 1, %v6429_v0  ;;  %vm115_vm12 = vcmp.eq.s32.totalorder %v4062_v23, 0  ;;  %vm114_vm13 = vcmp.eq.s32.totalorder %v4067_v24, 0  ;;  %vm117_vm14 = vcmp.eq.s32.totalorder %v4076_v27, 0  ;;  %v4090_v31 = vld [vmem:[%s6416_s1 + $0x88] sm:$0xff]  ;;  %v4095_v32 = vld [vmem:[%s6416_s1 + $0x80] sm:$0xff] }
   0x9   :  { %v147_v29 = vsel %vm115_vm12, 1, %v6429_v0  ;;  %v146_v30 = vsel %vm114_vm13, 1, %v6429_v0  ;;  %vm116_vm15 = vcmp.eq.s32.totalorder %v4081_v28, 0  ;;  %v149_v33 = vsel %vm117_vm14, 1, %v6429_v0  ;;  %v4104_v35 = vld [vmem:[%s6416_s1 + $0x98] sm:$0xff]  ;;  %v4109_v36 = vld [vmem:[%s6416_s1 + $0x90] sm:$0xff] }
   0xa   :  { %v148_v34 = vsel %vm116_vm15, 1, %v6429_v0  ;;  %vm119_vm0 = vcmp.eq.s32.totalorder %v4090_v31, 0  ;;  %vm118_vm1 = vcmp.eq.s32.totalorder %v4095_v32, 0  ;;  %vm121_vm2 = vcmp.eq.s32.totalorder %v4104_v35, 0  ;;  %v4118_v39 = vld [vmem:[%s6416_s1 + $0xa8] sm:$0xff]  ;;  %v4123_v40 = vld [vmem:[%s6416_s1 + $0xa0] sm:$0xff] }
   0xb   :  { %v151_v37 = vsel %vm119_vm0, 1, %v6429_v0  ;;  %v150_v38 = vsel %vm118_vm1, 1, %v6429_v0  ;;  %vm120_vm3 = vcmp.eq.s32.totalorder %v4109_v36, 0  ;;  %v32_v41 = vld [vmem:[%s6417_s2] sm:$0xff]  ;;  %v33_v42 = vld [vmem:[%s6417_s2 + $0x8] sm:$0xff]  ;;  %v34_v43 = vld [vmem:[%s6417_s2 + $0x10] sm:$0xff] }
   0xc   :  { %182 = vperm.xlu1 %3760, %v139_v13   ;;  %179 = vperm.xlu0 %3759, %v138_v14   ;;  %v35_v44 = vld [vmem:[%s6417_s2 + $0x18] sm:$0xff]  ;;  %v153_v45 = vsel %vm121_vm2, 1, %v6429_v0  ;;  %v152_v46 = vsel %vm120_vm3, 1, %v6429_v0  ;;  %vm123_vm4 = vcmp.eq.s32.totalorder %v4118_v39, 0  ;;  %vm122_vm5 = vcmp.eq.s32.totalorder %v4123_v40, 0  ;;  %v4149_v48 = vld [vmem:[%s6416_s1 + $0xb0] sm:$0xff] }
   0xd   :  { %v4144_v47 = vld [vmem:[%s6416_s1 + $0xb8] sm:$0xff]  ;;  %v3714_v49 = vpack.c.bf16 %v33_v42, %v32_v41  ;;  %v3718_v50 = vpack.c.bf16 %v35_v44, %v34_v43  ;;  %v38_v51 = vld [vmem:[%s6418_s0] sm:$0xff]  ;;  %v155_v52 = vsel %vm123_vm4, 1, %v6429_v0  ;;  %v154_v53 = vsel %vm122_vm5, 1, %v6429_v0  ;;  %v4162_v54 = vld [vmem:[%s6416_s1 + $0xc8] sm:$0xff] }
   0xe   :  { %vm2182_vm6 = vcmask 261120   ;;  %vm125_vm7 = vcmp.eq.s32.totalorder %v4144_v47, 0  ;;  %vm124_vm8 = vcmp.eq.s32.totalorder %v4149_v48, 0  ;;  %v4167_v55 = vld [vmem:[%s6416_s1 + $0xc0] sm:$0xff]  ;;  %vm127_vm9 = vcmp.eq.s32.totalorder %v4162_v54, 0  ;;  %v39_v58 = vld [vmem:[%s6418_s0 + $0x8] sm:$0xff] }
   0xf   :  { %3715 = vmatprep.subr.bf16.mxu0 %v3714_v49  ;;  %3754 = vmatprep.subr.bf16.mxu1 %v3714_v49  ;;  %v157_v56 = vsel %vm125_vm7, 1, %v6429_v0  ;;  %v156_v57 = vsel %vm124_vm8, 1, %v6429_v0  ;;  %vm126_vm10 = vcmp.eq.s32.totalorder %v4167_v55, 0  ;;  %v4179_v59 = vld [vmem:[%s6416_s1 + $0xd8] sm:$0xff]  ;;  %v4184_v60 = vld [vmem:[%s6416_s1 + $0xd0] sm:$0xff]  ;;  %v159_v62 = vsel %vm127_vm9, 1, %v6429_v0 }
  0x10   :  { %188 = vperm.xlu1 %3760, %v141_v17   ;;  %185 = vperm.xlu0 %3759, %v140_v18   ;;  %v40_v61 = vld [vmem:[%s6418_s0 + $0x10] sm:$0xff]  ;;  %v158_v63 = vsel %vm126_vm10, 1, %v6429_v0  ;;  %vm129_vm11 = vcmp.eq.s32.totalorder %v4179_v59, 0  ;;  %vm128_vm12 = vcmp.eq.s32.totalorder %v4184_v60, 0  ;;  %v41_v5 = vld [vmem:[%s6418_s0 + $0x18] sm:$0xff]  ;;  %v4201_v6 = vld [vmem:[%s6416_s1 + $0xe8] sm:$0xff] }
  0x11   :  { %3717 = vmatpush3.bf16.msra.mxu0 %v3714_v49  ;;  %3538 = vmatprep.mubr.msk.f32.mxu0 %vm2182_vm6, %v38_v51  ;;  %v4206_v9 = vld [vmem:[%s6416_s1 + $0xe0] sm:$0xff]  ;;  %v161_v10 = vsel %vm129_vm11, 1, %v6429_v0  ;;  %v160_v13 = vsel %vm128_vm12, 1, %v6429_v0  ;;  %vm131_vm13 = vcmp.eq.s32.totalorder %v4201_v6, 0  ;;  %v4216_v14 = vld [vmem:[%s6416_s1 + $0xf8] sm:$0xff]  ;;  %v4221_v17 = vld [vmem:[%s6416_s1 + $0xf0] sm:$0xff] }
  0x12   :  { %3719 = vmatprep.subr.bf16.mxu0 %v3718_v50  ;;  %3756 = vmatpush3.bf16.msra.mxu1 %v3714_v49  ;;  %vm130_vm14 = vcmp.eq.s32.totalorder %v4206_v9, 0  ;;  %v163_v18 = vsel %vm131_vm13, 1, %v6429_v0  ;;  %vm133_vm15 = vcmp.eq.s32.totalorder %v4216_v14, 0  ;;  %vm132_vm0 = vcmp.eq.s32.totalorder %v4221_v17, 0  ;;  %v44_v42 = vld [vmem:[%s6418_s0 + $0x30] sm:$0xff]  ;;  %v45_v43 = vld [vmem:[%s6418_s0 + $0x38] sm:$0xff] }
  0x13   :  { %3755 = vmatprep.subr.bf16.mxu1 %v3718_v50  ;;  %vm363_vm1 = vcmp.eq.s32.totalorder %v3998_v4, 1  ;;  %vm362_vm2 = vcmp.eq.s32.totalorder %v3985_v2, 1  ;;  %vm365_vm3 = vcmp.eq.s32.totalorder %v3990_v3, 1  ;;  %vm364_vm4 = vcmp.eq.s32.totalorder %v3980_v1, 1 }
  0x14   :  { %194 = vperm.xlu1 %3760, %v143_v21   ;;  %191 = vperm.xlu0 %3759, %v142_v22   ;;  %v162_v21 = vsel %vm130_vm14, 1, %v6429_v0  ;;  %v42_v22 = vld [vmem:[%s6418_s0 + $0x20] sm:$0xff]  ;;  %vm367_vm5 = vcmp.eq.s32.totalorder %v4006_v7, 1  ;;  %vm366_vm7 = vcmp.eq.s32.totalorder %v4011_v8, 1  ;;  %vm369_vm8 = vcmp.eq.s32.totalorder %v4020_v11, 1 }
  0x15   :  { %3721 = vmatpush3.bf16.msra.mxu0 %v3718_v50  ;;  %v398_v41 = vsel %vm366_vm7, 1, %v6429_v0  ;;  %vm368_vm9 = vcmp.eq.s32.totalorder %v4025_v12, 1  ;;  %v401_v44 = vsel %vm369_vm8, 1, %v6429_v0  ;;  %vm371_vm10 = vcmp.eq.s32.totalorder %v4034_v15, 1 }
  0x16   :  { %3757 = vmatpush3.bf16.msra.mxu1 %v3718_v50  ;;  %vm370_vm11 = vcmp.eq.s32.totalorder %v4039_v16, 1  ;;  %vm373_vm12 = vcmp.eq.s32.totalorder %v4048_v19, 1  ;;  %vm372_vm13 = vcmp.eq.s32.totalorder %v4053_v20, 1  ;;  %vm375_vm14 = vcmp.eq.s32.totalorder %v4062_v23, 1 }
  0x17   :  { %v402_v49 = vsel %vm370_vm11, 1, %v6429_v0  ;;  %v405_v50 = vsel %vm373_vm12, 1, %v6429_v0  ;;  %v404_v51 = vsel %vm372_vm13, 1, %v6429_v0  ;;  %vm383_vm7 = vcmp.eq.s32.totalorder %v4118_v39, 1 }
  0x18   :  { %200 = vperm.xlu1 %3760, %v145_v25   ;;  %197 = vperm.xlu0 %3759, %v144_v26   ;;  %v43_v25 = vld [vmem:[%s6418_s0 + $0x28] sm:$0xff]  ;;  %v165_v26 = vsel %vm133_vm15, 1, %v6429_v0  ;;  %vm374_vm15 = vcmp.eq.s32.totalorder %v4067_v24, 1  ;;  %vm382_vm8 = vcmp.eq.s32.totalorder %v4123_v40, 1  ;;  %vm387_vm11 = vcmp.eq.s32.totalorder %v4162_v54, 1 }
  0x19   :  { %3539 = vmatmul.mubr.msk.f32.vlgmr.msra.gmra.mrb[0].mxu0 %vm2182_vm6, %v39_v58  ;;  %v46_v58 = vld [vmem:[%s6418_s0 + $0x40] sm:$0xff]  ;;  %vm386_vm12 = vcmp.eq.s32.totalorder %v4167_v55, 1  ;;  %vm389_vm13 = vcmp.eq.s32.totalorder %v4179_v59, 1 }
  0x1a   :  { %3541 = vmatprep.mubr.msk.f32.mxu0 %vm2182_vm6, %v40_v61  ;;  %v47_v61 = vld [vmem:[%s6418_s0 + $0x48] sm:$0xff] }
  0x1c   :  { %206 = vperm.xlu1 %3760, %v147_v29   ;;  %203 = vperm.xlu0 %3759, %v146_v30   ;;  %v164_v29 = vsel %vm132_vm0, 1, %v6429_v0  ;;  %v395_v30 = vsel %vm363_vm1, 1, %v6429_v0  ;;  %vm377_vm0 = vcmp.eq.s32.totalorder %v4076_v27, 1  ;;  %vm376_vm1 = vcmp.eq.s32.totalorder %v4081_v28, 1 }
  0x1d   :  { %3542 = vmatmul.mubr.msk.f32.gmra.mrb[2].mxu0 %vm2182_vm6, %v41_v5 }
  0x1e   :  { %3544 = vmatprep.mubr.msk.f32.mxu0 %vm2182_vm6, %v42_v22 }
  0x20   :  { %212 = vperm.xlu1 %3760, %v149_v33   ;;  %209 = vperm.xlu0 %3759, %v148_v34   ;;  %v394_v33 = vsel %vm362_vm2, 1, %v6429_v0  ;;  %v397_v34 = vsel %vm365_vm3, 1, %v6429_v0  ;;  %vm379_vm2 = vcmp.eq.s32.totalorder %v4090_v31, 1  ;;  %vm378_vm3 = vcmp.eq.s32.totalorder %v4095_v32, 1 }
  0x21   :  { %3545 = vmatmul.mubr.msk.f32.gmra.mrb[4].mxu0 %vm2182_vm6, %v43_v25  ;;  %v419_v25 = vsel %vm387_vm11, 1, %v6429_v0  ;;  %vm628_vm11 = vcmp.eq.s32.totalorder %v4025_v12, 2 }
  0x22   :  { %3547 = vmatprep.mubr.msk.f32.mxu0 %vm2182_vm6, %v44_v42 }
  0x24   :  { %218 = vperm.xlu1 %3760, %v151_v37   ;;  %215 = vperm.xlu0 %3759, %v150_v38   ;;  %v396_v37 = vsel %vm364_vm4, 1, %v6429_v0  ;;  %v399_v38 = vsel %vm367_vm5, 1, %v6429_v0  ;;  %vm381_vm4 = vcmp.eq.s32.totalorder %v4104_v35, 1  ;;  %vm380_vm5 = vcmp.eq.s32.totalorder %v4109_v36, 1 }
  0x25   :  { %3548 = vmatmul.mubr.msk.f32.gmra.mrb[6].mxu0 %vm2182_vm6, %v45_v43  ;;  %v413_v5 = vsel %vm381_vm4, 1, %v6429_v0  ;;  %vm622_vm4 = vcmp.eq.s32.totalorder %v3985_v2, 2 }
  0x26   :  { %3550 = vmatprep.mubr.msk.f32.mxu0 %vm2182_vm6, %v46_v58 }
  0x28   :  { %224 = vperm.xlu1 %3760, %v153_v45   ;;  %221 = vperm.xlu0 %3759, %v152_v46   ;;  %v400_v45 = vsel %vm368_vm9, 1, %v6429_v0  ;;  %v403_v46 = vsel %vm371_vm10, 1, %v6429_v0  ;;  %vm385_vm9 = vcmp.eq.s32.totalorder %v4144_v47, 1  ;;  %vm384_vm10 = vcmp.eq.s32.totalorder %v4149_v48, 1 }
  0x29   :  { %3551 = vmatmul.mubr.msk.f32.gmra.mrb[8].mxu0 %vm2182_vm6, %v47_v61  ;;  %v416_v22 = vsel %vm384_vm10, 1, %v6429_v0  ;;  %vm629_vm10 = vcmp.eq.s32.totalorder %v4020_v11, 2 }
  0x2c   :  { %230 = vperm.xlu1 %3760, %v155_v52   ;;  %227 = vperm.xlu0 %3759, %v154_v53   ;;  %v407_v52 = vsel %vm375_vm14, 1, %v6429_v0  ;;  %v406_v53 = vsel %vm374_vm15, 1, %v6429_v0  ;;  %vm388_vm14 = vcmp.eq.s32.totalorder %v4184_v60, 1  ;;  %vm391_vm15 = vcmp.eq.s32.totalorder %v4201_v6, 1 }
  0x30   :  { %236 = vperm.xlu1 %3760, %v157_v56   ;;  %233 = vperm.xlu0 %3759, %v156_v57   ;;  %v409_v56 = vsel %vm377_vm0, 1, %v6429_v0  ;;  %v408_v57 = vsel %vm376_vm1, 1, %v6429_v0  ;;  %vm390_vm0 = vcmp.eq.s32.totalorder %v4206_v9, 1  ;;  %vm393_vm1 = vcmp.eq.s32.totalorder %v4216_v14, 1 }
  0x34   :  { %242 = vperm.xlu1 %3760, %v159_v62   ;;  %239 = vperm.xlu0 %3759, %v158_v63   ;;  %v411_v62 = vsel %vm379_vm2, 1, %v6429_v0  ;;  %v410_v63 = vsel %vm378_vm3, 1, %v6429_v0  ;;  %vm392_vm2 = vcmp.eq.s32.totalorder %v4221_v17, 1  ;;  %vm623_vm3 = vcmp.eq.s32.totalorder %v3998_v4, 2 }
  0x35   :  { %v424_v42 = vsel %vm392_vm2, 1, %v6429_v0  ;;  %v655_v43 = vsel %vm623_vm3, 1, %v6429_v0  ;;  %vm637_vm2 = vcmp.eq.s32.totalorder %v4076_v27, 2  ;;  %vm636_vm3 = vcmp.eq.s32.totalorder %v4081_v28, 2 }
  0x36   :  { %v668_v27 = vsel %vm636_vm3, 1, %v6429_v0  ;;  %vm653_vm3 = vcmp.eq.s32.totalorder %v4216_v14, 2 }
  0x38   :  { %248 = vperm.xlu1 %3760, %v161_v10   ;;  %245 = vperm.xlu0 %3759, %v160_v13   ;;  %v412_v10 = vsel %vm380_vm5, 1, %v6429_v0  ;;  %v415_v13 = vsel %vm383_vm7, 1, %v6429_v0  ;;  %vm625_vm5 = vcmp.eq.s32.totalorder %v3990_v3, 2  ;;  %vm624_vm7 = vcmp.eq.s32.totalorder %v3980_v1, 2 }
  0x3c   :  { %254 = vperm.xlu1 %3760, %v163_v18   ;;  %251 = vperm.xlu0 %3759, %v162_v21   ;;  %v414_v18 = vsel %vm382_vm8, 1, %v6429_v0  ;;  %v417_v21 = vsel %vm385_vm9, 1, %v6429_v0  ;;  %vm627_vm8 = vcmp.eq.s32.totalorder %v4006_v7, 2  ;;  %vm626_vm9 = vcmp.eq.s32.totalorder %v4011_v8, 2 }
  0x3d   :  { %v658_v58 = vsel %vm626_vm9, 1, %v6429_v0  ;;  %vm643_vm9 = vcmp.eq.s32.totalorder %v4118_v39, 2 }
  0x40   :  { %260 = vperm.xlu1 %3760, %v165_v26   ;;  %257 = vperm.xlu0 %3759, %v164_v29   ;;  %v418_v26 = vsel %vm386_vm12, 1, %v6429_v0  ;;  %v48_v29 = vld [vmem:[%s6418_s0 + $0x50] sm:$0xff]  ;;  %vm631_vm12 = vcmp.eq.s32.totalorder %v4034_v15, 2 }
  0x41   :  { %3553 = vmatprep.mubr.msk.f32.mxu0 %vm2182_vm6, %v48_v29 }
  0x44   :  { %430 = vperm.xlu1 %3760, %v395_v30   ;;  %427 = vperm.xlu0 %3759, %v394_v33   ;;  %v49_v30 = vld [vmem:[%s6418_s0 + $0x58] sm:$0xff]  ;;  %v421_v33 = vsel %vm389_vm13, 1, %v6429_v0  ;;  %vm630_vm13 = vcmp.eq.s32.totalorder %v4039_v16, 2 }
  0x45   :  { %3554 = vmatmul.mubr.msk.f32.gmra.mrb[10].mxu0 %vm2182_vm6, %v49_v30 }
  0x48   :  { %436 = vperm.xlu1 %3760, %v397_v34   ;;  %433 = vperm.xlu0 %3759, %v396_v37   ;;  %v420_v34 = vsel %vm388_vm14, 1, %v6429_v0  ;;  %v423_v37 = vsel %vm391_vm15, 1, %v6429_v0  ;;  %vm633_vm14 = vcmp.eq.s32.totalorder %v4048_v19, 2  ;;  %vm632_vm15 = vcmp.eq.s32.totalorder %v4053_v20, 2 }
  0x49   :  { %v664_v29 = vsel %vm632_vm15, 1, %v6429_v0  ;;  %vm649_vm15 = vcmp.eq.s32.totalorder %v4179_v59, 2 }
  0x4c   :  { %442 = vperm.xlu1 %3760, %v399_v38   ;;  %439 = vperm.xlu0 %3759, %v398_v41   ;;  %v422_v38 = vsel %vm390_vm0, 1, %v6429_v0  ;;  %v425_v41 = vsel %vm393_vm1, 1, %v6429_v0  ;;  %vm635_vm0 = vcmp.eq.s32.totalorder %v4062_v23, 2  ;;  %vm634_vm1 = vcmp.eq.s32.totalorder %v4067_v24, 2  ;;  %v53_v23 = vld [vmem:[%s6418_s0 + $0x78] sm:$0xff] }
  0x50   :  { %448 = vperm.xlu1 %3760, %v401_v44   ;;  %445 = vperm.xlu0 %3759, %v400_v45   ;;  %v654_v44 = vsel %vm622_vm4, 1, %v6429_v0  ;;  %vm639_vm4 = vcmp.eq.s32.totalorder %v4090_v31, 2 }
  0x54   :  { %454 = vperm.xlu1 %3760, %v403_v46   ;;  %451 = vperm.xlu0 %3759, %v402_v49   ;;  %v657_v49 = vsel %vm625_vm5, 1, %v6429_v0  ;;  %vm638_vm5 = vcmp.eq.s32.totalorder %v4095_v32, 2 }
  0x58   :  { %460 = vperm.xlu1 %3760, %v405_v50   ;;  %457 = vperm.xlu0 %3759, %v404_v51   ;;  %v656_v50 = vsel %vm624_vm7, 1, %v6429_v0  ;;  %v50_v51 = vld [vmem:[%s6418_s0 + $0x60] sm:$0xff]  ;;  %vm641_vm7 = vcmp.eq.s32.totalorder %v4104_v35, 2  ;;  %v675_v35 = vsel %vm643_vm9, 1, %v6429_v0  ;;  %vm884_vm9 = vcmp.eq.s32.totalorder %v3980_v1, 3 }
  0x59   :  { %3556 = vmatprep.mubr.msk.f32.mxu0 %vm2182_vm6, %v50_v51  ;;  %v673_v31 = vsel %vm641_vm7, 1, %v6429_v0  ;;  %vm882_vm7 = vcmp.eq.s32.totalorder %v3985_v2, 3 }
  0x5c   :  { %466 = vperm.xlu1 %3760, %v407_v52   ;;  %463 = vperm.xlu0 %3759, %v406_v53   ;;  %v51_v52 = vld [vmem:[%s6418_s0 + $0x68] sm:$0xff] }
  0x5d   :  { %3557 = vmatmul.mubr.msk.f32.gmra.mrb[12].mxu0 %vm2182_vm6, %v51_v52 }
  0x60   :  { %472 = vperm.xlu1 %3760, %v409_v56   ;;  %469 = vperm.xlu0 %3759, %v408_v57   ;;  %v659_v57 = vsel %vm627_vm8, 1, %v6429_v0  ;;  %vm640_vm8 = vcmp.eq.s32.totalorder %v4109_v36, 2 }
  0x61   :  { %v672_v32 = vsel %vm640_vm8, 1, %v6429_v0  ;;  %vm885_vm8 = vcmp.eq.s32.totalorder %v3990_v3, 3  ;;  %v916_v3 = vsel %vm884_vm9, 1, %v6429_v0 }
  0x64   :  { %478 = vperm.xlu1 %3760, %v411_v62   ;;  %475 = vperm.xlu0 %3759, %v410_v63   ;;  %v661_v63 = vsel %vm629_vm10, 1, %v6429_v0  ;;  %vm642_vm10 = vcmp.eq.s32.totalorder %v4123_v40, 2 }
  0x65   :  { %v674_v36 = vsel %vm642_vm10, 1, %v6429_v0  ;;  %vm887_vm10 = vcmp.eq.s32.totalorder %v4006_v7, 3 }
  0x68   :  { %484 = vperm.xlu1 %3760, %v413_v5   ;;  %481 = vperm.xlu0 %3759, %v412_v10   ;;  %v660_v5 = vsel %vm628_vm11, 1, %v6429_v0  ;;  %vm645_vm11 = vcmp.eq.s32.totalorder %v4144_v47, 2  ;;  %v55_v47 = vld [vmem:[%s6418_s0 + $0x88] sm:$0xff] }
  0x69   :  { %v677_v39 = vsel %vm645_vm11, 1, %v6429_v0  ;;  %vm886_vm11 = vcmp.eq.s32.totalorder %v4011_v8, 3 }
  0x6c   :  { %490 = vperm.xlu1 %3760, %v415_v13   ;;  %487 = vperm.xlu0 %3759, %v414_v18   ;;  %v663_v18 = vsel %vm631_vm12, 1, %v6429_v0  ;;  %vm644_vm12 = vcmp.eq.s32.totalorder %v4149_v48, 2 }
  0x6d   :  { %v676_v40 = vsel %vm644_vm12, 1, %v6429_v0  ;;  %vm889_vm12 = vcmp.eq.s32.totalorder %v4020_v11, 3 }
  0x70   :  { %496 = vperm.xlu1 %3760, %v417_v21   ;;  %493 = vperm.xlu0 %3759, %v416_v22   ;;  %v662_v21 = vsel %vm630_vm13, 1, %v6429_v0  ;;  %vm647_vm13 = vcmp.eq.s32.totalorder %v4162_v54, 2 }
  0x74   :  { %502 = vperm.xlu1 %3760, %v419_v25   ;;  %499 = vperm.xlu0 %3759, %v418_v26   ;;  %v665_v26 = vsel %vm633_vm14, 1, %v6429_v0  ;;  %vm646_vm14 = vcmp.eq.s32.totalorder %v4167_v55, 2 }
  0x75   :  { %v678_v54 = vsel %vm646_vm14, 1, %v6429_v0  ;;  %vm891_vm14 = vcmp.eq.s32.totalorder %v4034_v15, 3 }
  0x76   :  { %v923_v15 = vsel %vm891_vm14, 1, %v6429_v0  ;;  %vm1402_vm14 = vcmp.eq.s32.totalorder %v3985_v2, 5 }
  0x78   :  { %508 = vperm.xlu1 %3760, %v421_v33   ;;  %505 = vperm.xlu0 %3759, %v420_v34   ;;  %v667_v34 = vsel %vm635_vm0, 1, %v6429_v0  ;;  %vm648_vm0 = vcmp.eq.s32.totalorder %v4184_v60, 2 }
  0x7c   :  { %514 = vperm.xlu1 %3760, %v423_v37   ;;  %511 = vperm.xlu0 %3759, %v422_v38   ;;  %v666_v37 = vsel %vm634_vm1, 1, %v6429_v0  ;;  %v52_v38 = vld [vmem:[%s6418_s0 + $0x70] sm:$0xff]  ;;  %vm651_vm1 = vcmp.eq.s32.totalorder %v4201_v6, 2  ;;  %v685_v6 = vsel %vm653_vm3, 1, %v6429_v0 }
  0x7d   :  { %3559 = vmatprep.mubr.msk.f32.mxu0 %vm2182_vm6, %v52_v38  ;;  %v683_v59 = vsel %vm651_vm1, 1, %v6429_v0  ;;  %vm892_vm1 = vcmp.eq.s32.totalorder %v4053_v20, 3 }
  0x7e   :  { %3560 = vmatmul.mubr.msk.f32.gmra.mrb[14].mxu0 %vm2182_vm6, %v53_v23  ;;  %v924_v20 = vsel %vm892_vm1, 1, %v6429_v0 }
  0x80   :  { %520 = vperm.xlu1 %3760, %v425_v41   ;;  %517 = vperm.xlu0 %3759, %v424_v42   ;;  %v669_v42 = vsel %vm637_vm2, 1, %v6429_v0  ;;  %vm650_vm2 = vcmp.eq.s32.totalorder %v4206_v9, 2 }
  0x81   :  { %v682_v60 = vsel %vm650_vm2, 1, %v6429_v0 }
  0x83   :  { %v4331_v45 = vpop.permute.xlu1 %173  ;;  %v4333_v46 = vpop.permute.xlu0 %167 }
  0x84   :  { %690 = vperm.xlu1 %3760, %v655_v43   ;;  %687 = vperm.xlu0 %3759, %v654_v44   ;;  %v671_v44 = vsel %vm639_vm4, 1, %v6429_v0  ;;  %vm652_vm4 = vcmp.eq.s32.totalorder %v4221_v17, 2  ;;  %v914_v17 = vsel %vm882_vm7, 1, %v6429_v0  ;;  %vm1143_vm7 = vcmp.eq.s32.totalorder %v3998_v4, 4 }
  0x85   :  { %v684_v9 = vsel %vm652_vm4, 1, %v6429_v0 }
  0x87   :  { %v4346_v53 = vpop.permute.xlu1 %176  ;;  %v4348_v56 = vpop.permute.xlu0 %170 }
  0x88   :  { %696 = vperm.xlu1 %3760, %v657_v49   ;;  %693 = vperm.xlu0 %3759, %v656_v50   ;;  %v670_v49 = vsel %vm638_vm5, 1, %v6429_v0  ;;  %vm883_vm5 = vcmp.eq.s32.totalorder %v3998_v4, 3 }
  0x89   :  { %v915_v14 = vsel %vm883_vm5, 1, %v6429_v0 }
  0x8b   :  { %v4355_v61 = vpop.permute.xlu1 %182  ;;  %v4357_v62 = vpop.permute.xlu0 %179 }
  0x8c   :  { %702 = vperm.xlu1 %3760, %v659_v57   ;;  %699 = vperm.xlu0 %3759, %v658_v58  }
  0x8f   :  { %v4363_v10 = vpop.permute.xlu1 %188  ;;  %v4365_v13 = vpop.permute.xlu0 %185 }
  0x90   :  { %6434 = vst [vmem:[#allocation2_spill] sm:$0xff] %v4365_v13  ;;  %708 = vperm.xlu1 %3760, %v661_v63   ;;  %705 = vperm.xlu0 %3759, %v660_v5   ;;  %v54_v5 = vld [vmem:[%s6418_s0 + $0x80] sm:$0xff] }
  0x91   :  { %3562 = vmatprep.mubr.msk.f32.mxu1 %vm2182_vm6, %v54_v5 }
  0x92   :  { %3563 = vmatmul.mubr.msk.f32.vlgmr.msra.gmra.mrb[0].mxu1 %vm2182_vm6, %v55_v47  ;;  %v919_v47 = vsel %vm887_vm10, 1, %v6429_v0 }
  0x93   :  { %v4371_v22 = vpop.permute.xlu1 %194  ;;  %v4373_v25 = vpop.permute.xlu0 %191 }
  0x94   :  { %714 = vperm.xlu1 %3760, %v663_v18   ;;  %711 = vperm.xlu0 %3759, %v662_v21   ;;  %v679_v21 = vsel %vm647_vm13, 1, %v6429_v0  ;;  %vm888_vm13 = vcmp.eq.s32.totalorder %v4025_v12, 3  ;;  %vm271_vm2 = vcmp.eq.s32.totalorder %v4371_v22, 1  ;;  %vm270_vm3 = vcmp.eq.s32.totalorder %v4373_v25, 1 }
  0x97   :  { %v4379_v30 = vpop.permute.xlu1 %200  ;;  %v4381_v33 = vpop.permute.xlu0 %197 }
  0x98   :  { %720 = vperm.xlu1 %3760, %v665_v26   ;;  %717 = vperm.xlu0 %3759, %v664_v29   ;;  %v681_v29 = vsel %vm649_vm15, 1, %v6429_v0  ;;  %vm890_vm15 = vcmp.eq.s32.totalorder %v4039_v16, 3  ;;  %vm273_vm9 = vcmp.eq.s32.totalorder %v4379_v30, 1  ;;  %vm272_vm10 = vcmp.eq.s32.totalorder %v4381_v33, 1 }
  0x99   :  { %v922_v16 = vsel %vm890_vm15, 1, %v6429_v0 }
  0x9b   :  { %v4394_v24 = vpop.permute.xlu1 %206  ;;  %v4396_v41 = vpop.permute.xlu0 %203 }
  0x9c   :  { %726 = vperm.xlu1 %3760, %v667_v34   ;;  %723 = vperm.xlu0 %3759, %v666_v37   ;;  %v680_v34 = vsel %vm648_vm0, 1, %v6429_v0  ;;  %vm893_vm0 = vcmp.eq.s32.totalorder %v4048_v19, 3  ;;  %vm275_vm15 = vcmp.eq.s32.totalorder %v4394_v24, 1 }
  0x9d   :  { %v925_v19 = vsel %vm893_vm0, 1, %v6429_v0  ;;  %vm274_vm0 = vcmp.eq.s32.totalorder %v4396_v41, 1 }
  0x9f   :  { %v4403_v28 = vpop.permute.xlu1 %212  ;;  %v4405_v43 = vpop.permute.xlu0 %209 }
  0xa0   :  { %732 = vperm.xlu1 %3760, %v669_v42   ;;  %729 = vperm.xlu0 %3759, %v668_v27  }
  0xa3   :  { %v4411_v50 = vpop.permute.xlu1 %218  ;;  %v4413_v51 = vpop.permute.xlu0 %215 }
  0xa4   :  { %738 = vperm.xlu1 %3760, %v671_v44   ;;  %735 = vperm.xlu0 %3759, %v670_v49   ;;  %v56_v49 = vld [vmem:[%s6418_s0 + $0x90] sm:$0xff] }
  0xa5   :  { %3565 = vmatprep.mubr.msk.f32.mxu1 %vm2182_vm6, %v56_v49 }
  0xa7   :  { %v4419_v52 = vpop.permute.xlu1 %224  ;;  %v4421_v57 = vpop.permute.xlu0 %221 }
  0xa8   :  { %744 = vperm.xlu1 %3760, %v673_v31   ;;  %741 = vperm.xlu0 %3759, %v672_v32   ;;  %v57_v31 = vld [vmem:[%s6418_s0 + $0x98] sm:$0xff] }
  0xa9   :  { %3566 = vmatmul.mubr.msk.f32.gmra.mrb[2].mxu1 %vm2182_vm6, %v57_v31 }
  0xab   :  { %v4427_v58 = vpop.permute.xlu1 %230  ;;  %v4429_v63 = vpop.permute.xlu0 %227 }
  0xac   :  { %750 = vperm.xlu1 %3760, %v675_v35   ;;  %747 = vperm.xlu0 %3759, %v674_v36   ;;  %v917_v36 = vsel %vm885_vm8, 1, %v6429_v0  ;;  %vm1142_vm8 = vcmp.eq.s32.totalorder %v3985_v2, 4 }
  0xaf   :  { %v4442_v48 = vpop.permute.xlu1 %236  ;;  %v4444_v18 = vpop.permute.xlu0 %233 }
  0xb0   :  { %756 = vperm.xlu1 %3760, %v677_v39   ;;  %753 = vperm.xlu0 %3759, %v676_v40   ;;  %v294_v39 = vlaneseq }
  0xb3   :  { %v4451_v55 = vpop.permute.xlu1 %242  ;;  %v4453_v26 = vpop.permute.xlu0 %239 }
  0xb4   :  { %762 = vperm.xlu1 %3760, %v679_v21   ;;  %759 = vperm.xlu0 %3759, %v678_v54   ;;  %v918_v21 = vsel %vm886_vm11, 1, %v6429_v0  ;;  %v4507_v54 = vshrl.u32 %v294_v39, 7 }
  0xb6   :  { %v296_v11 = vsub.s32 0, %v4507_v54  ;;  %v556_v12 = vsub.s32 1, %v4507_v54 }
  0xb7   :  { %v4459_v37 = vpop.permute.xlu1 %248  ;;  %v4461_v38 = vpop.permute.xlu0 %245 }
  0xb8   :  { %768 = vperm.xlu1 %3760, %v681_v29   ;;  %765 = vperm.xlu0 %3759, %v680_v34   ;;  %v921_v29 = vsel %vm889_vm12, 1, %v6429_v0  ;;  %v920_v34 = vsel %vm888_vm13, 1, %v6429_v0  ;;  %vm1403_vm13 = vcmp.eq.s32.totalorder %v3998_v4, 5 }
  0xb9   :  { %v1435_v30 = vsel %vm1403_vm13, 1, %v6429_v0  ;;  %vm278_vm13 = vcmp.eq.s32.totalorder %v4413_v51, 1 }
  0xbb   :  { %v4467_v23 = vpop.permute.xlu1 %254  ;;  %v4469_v42 = vpop.permute.xlu0 %251 }
  0xbc   :  { %774 = vperm.xlu1 %3760, %v683_v59   ;;  %771 = vperm.xlu0 %3759, %v682_v60  }
  0xbf   :  { %v4475_v27 = vpop.permute.xlu1 %260  ;;  %v4477_v44 = vpop.permute.xlu0 %257 }
  0xc0   :  { %780 = vperm.xlu1 %3760, %v685_v6   ;;  %777 = vperm.xlu0 %3759, %v684_v9   ;;  %v4526_v6 = vld [vmem:[%s6419_s3] sm:$0xff] }
  0xc1   :  { %v4535_v9 = vrot.slane %v4526_v6, %v296_v11  ;;  %v1175_v11 = vsel %vm1143_vm7, 1, %v6429_v0  ;;  %vm276_vm7 = vcmp.eq.s32.totalorder %v4405_v43, 1  ;;  %v3891_v43 = vld [vmem:[%s6416_s1] sm:$0xff] }
  0xc3   :  { %v4490_v32 = vpop.permute.xlu1 %430  ;;  %v4492_v35 = vpop.permute.xlu0 %427  ;;  %v307_v22 = vsel %vm271_vm2, %v4535_v9, 0.0  ;;  %v306_v25 = vsel %vm270_vm3, %v4535_v9, 0.0  ;;  %vm1662_vm3 = vcmp.eq.s32.totalorder %v3985_v2, 6  ;;  %v311_v33 = vsel %vm275_vm15, %v4535_v9, 0.0 }
  0xc4   :  { %950 = vperm.xlu1 %3760, %v915_v14   ;;  %947 = vperm.xlu0 %3759, %v914_v17   ;;  %v4538_v14 = vrot.slane %v4526_v6, %v556_v12  ;;  %v1174_v12 = vsel %vm1142_vm8, 1, %v6429_v0  ;;  %v310_v24 = vsel %vm274_vm0, %v4535_v9, 0.0  ;;  %vm1922_vm0 = vcmp.eq.s32.totalorder %v3891_v43, 7 }
  0xc7   :  { %v4499_v40 = vpop.permute.xlu1 %436  ;;  %v4501_v5 = vpop.permute.xlu0 %433 }
  0xc8   :  { %956 = vperm.xlu1 %3760, %v917_v36   ;;  %953 = vperm.xlu0 %3759, %v916_v3   ;;  %v58_v3 = vld [vmem:[%s6418_s0 + $0xa0] sm:$0xff] }
  0xc9   :  { %3568 = vmatprep.mubr.msk.f32.mxu1 %vm2182_vm6, %v58_v3 }
  0xcb   :  { %v4509_v7 = vpop.permute.xlu1 %442  ;;  %v4511_v8 = vpop.permute.xlu0 %439 }
  0xcc   :  { %962 = vperm.xlu1 %3760, %v919_v47   ;;  %959 = vperm.xlu0 %3759, %v918_v21   ;;  %v59_v21 = vld [vmem:[%s6418_s0 + $0xa8] sm:$0xff] }
  0xcd   :  { %3569 = vmatmul.mubr.msk.f32.gmra.mrb[4].mxu1 %vm2182_vm6, %v59_v21 }
  0xcf   :  { %v4519_v59 = vpop.permute.xlu1 %448  ;;  %v4521_v60 = vpop.permute.xlu0 %445 }
  0xd0   :  { %6435 = vst [vmem:[#allocation3_spill] sm:$0xff] %v4519_v59  ;;  %6436 = vst [vmem:[#allocation4_spill] sm:$0xff] %v4521_v60  ;;  %968 = vperm.xlu1 %3760, %v921_v29   ;;  %965 = vperm.xlu0 %3759, %v920_v34  }
  0xd3   :  { %v455_v17 = vpop.permute.xlu1 %454  ;;  %v452_v49 = vpop.permute.xlu0 %451 }
  0xd4   :  { %vm531_vm4 = vcmp.eq.s32.totalorder %v455_v17, 1  ;;  %vm530_vm5 = vcmp.eq.s32.totalorder %v452_v49, 1  ;;  %974 = vperm.xlu1 %3760, %v923_v15   ;;  %971 = vperm.xlu0 %3759, %v922_v16   ;;  %v309_v15 = vsel %vm273_vm9, %v4535_v9, 0.0  ;;  %v308_v16 = vsel %vm272_vm10, %v4535_v9, 0.0 }
  0xd5   :  { %v567_v31 = vsel %vm531_vm4, %v4538_v14, 0.0  ;;  %v566_v36 = vsel %vm530_vm5, %v4538_v14, 0.0  ;;  %vm1144_vm4 = vcmp.eq.s32.totalorder %v3980_v1, 4  ;;  %vm277_vm5 = vcmp.eq.s32.totalorder %v4403_v28, 1 }
  0xd6   :  { %v4553_v39 = vadd.f32 %v567_v31, %v307_v22  ;;  %v4555_v47 = vadd.f32 %v566_v36, %v306_v25  ;;  %v1434_v25 = vsel %vm1402_vm14, 1, %v6429_v0  ;;  %v1694_v1 = vsel %vm1662_vm3, 1, %v6429_v0 }
  0xd7   :  { %v461_v29 = vpop.permute.xlu1 %460  ;;  %v458_v34 = vpop.permute.xlu0 %457  ;;  %vm280_vm3 = vcmp.eq.s32.totalorder %v4421_v57, 1 }
  0xd8   :  { %vm533_vm11 = vcmp.eq.s32.totalorder %v461_v29, 1  ;;  %vm532_vm12 = vcmp.eq.s32.totalorder %v458_v34, 1  ;;  %980 = vperm.xlu1 %3760, %v925_v19   ;;  %977 = vperm.xlu0 %3759, %v924_v20   ;;  %v1176_v29 = vsel %vm1144_vm4, 1, %v6429_v0  ;;  %v3889_v34 = vld [vmem:[%s6416_s1 + $0x8] sm:$0xff] }
  0xd9   :  { %v569_v17 = vsel %vm533_vm11, %v4538_v14, 0.0  ;;  %v568_v49 = vsel %vm532_vm12, %v4538_v14, 0.0  ;;  %vm1663_vm10 = vcmp.eq.s32.totalorder %v3889_v34, 6  ;;  %vm279_vm12 = vcmp.eq.s32.totalorder %v4411_v50, 1 }
  0xda   :  { %v4576_v19 = vadd.f32 %v569_v17, %v309_v15  ;;  %v4578_v4 = vadd.f32 %v568_v49, %v308_v16  ;;  %v312_v15 = vsel %vm276_vm7, %v4535_v9, 0.0  ;;  %v1695_v28 = vsel %vm1663_vm10, 1, %v6429_v0 }
  0xdb   :  { %v467_v20 = vpop.permute.xlu1 %466  ;;  %v464_v22 = vpop.permute.xlu0 %463  ;;  %v1954_v50 = vsel %vm1922_vm0, 1, %v6429_v0  ;;  %vm1923_vm4 = vcmp.eq.s32.totalorder %v3889_v34, 7  ;;  %vm283_vm10 = vcmp.eq.s32.totalorder %v4427_v58, 1  ;;  %vm284_vm0 = vcmp.eq.s32.totalorder %v4444_v18, 1 }
  0xdc   :  { %vm535_vm1 = vcmp.eq.s32.totalorder %v467_v20, 1  ;;  %vm534_vm2 = vcmp.eq.s32.totalorder %v464_v22, 1  ;;  %1210 = vperm.xlu1 %3760, %v1175_v11   ;;  %1207 = vperm.xlu0 %3759, %v1174_v12   ;;  %v4602_v11 = vld [vmem:[%s6416_s1 + $0x18] sm:$0xff]  ;;  %v313_v12 = vsel %vm277_vm5, %v4535_v9, 0.0 }
  0xdd   :  { %v571_v41 = vsel %vm535_vm1, %v4538_v14, 0.0  ;;  %v570_v31 = vsel %vm534_vm2, %v4538_v14, 0.0  ;;  %vm1145_vm11 = vcmp.eq.s32.totalorder %v4602_v11, 4  ;;  %vm281_vm2 = vcmp.eq.s32.totalorder %v4419_v52, 1 }
  0xde   :  { %v4590_v36 = vadd.f32 %v571_v41, %v311_v33  ;;  %v4592_v3 = vadd.f32 %v570_v31, %v310_v24  ;;  %v4627_v33 = vld [vmem:[%s6416_s1 + $0x10] sm:$0xff]  ;;  %v315_v24 = vsel %vm279_vm12, %v4535_v9, 0.0  ;;  %v314_v41 = vsel %vm278_vm13, %v4535_v9, 0.0 }
  0xdf   :  { %v473_v21 = vpop.permute.xlu1 %472  ;;  %v470_v2 = vpop.permute.xlu0 %469  ;;  %vm1404_vm1 = vcmp.eq.s32.totalorder %v4627_v33, 5  ;;  %v317_v51 = vsel %vm281_vm2, %v4535_v9, 0.0  ;;  %v316_v52 = vsel %vm280_vm3, %v4535_v9, 0.0  ;;  %vm285_vm13 = vcmp.eq.s32.totalorder %v4442_v48, 1 }
  0xe0   :  { %vm537_vm8 = vcmp.eq.s32.totalorder %v473_v21, 1  ;;  %vm536_vm9 = vcmp.eq.s32.totalorder %v470_v2, 1  ;;  %1470 = vperm.xlu1 %3760, %v1435_v30   ;;  %1467 = vperm.xlu0 %3759, %v1434_v25   ;;  %v1177_v25 = vsel %vm1145_vm11, 1, %v6429_v0  ;;  %vm282_vm11 = vcmp.eq.s32.totalorder %v4429_v63, 1  ;;  %v4701_v63 = vld [vmem:[%s6416_s1 + $0x28] sm:$0xff] }
  0xe1   :  { %v573_v16 = vsel %vm537_vm8, %v4538_v14, 0.0  ;;  %v572_v17 = vsel %vm536_vm9, %v4538_v14, 0.0  ;;  %vm1405_vm8 = vcmp.eq.s32.totalorder %v4602_v11, 5  ;;  %vm1664_vm9 = vcmp.eq.s32.totalorder %v4627_v33, 6 }
  0xe2   :  { %v4615_v49 = vadd.f32 %v573_v16, %v313_v12  ;;  %v4617_v20 = vadd.f32 %v572_v17, %v312_v15  ;;  %v1436_v15 = vsel %vm1404_vm1, 1, %v6429_v0  ;;  %v60_v17 = vld [vmem:[%s6418_s0 + $0xb0] sm:$0xff]  ;;  %v1696_v34 = vsel %vm1664_vm9, 1, %v6429_v0 }
  0xe3   :  { %v479_v22 = vpop.permute.xlu1 %478  ;;  %v476_v30 = vpop.permute.xlu0 %475  ;;  %3571 = vmatprep.mubr.msk.f32.mxu1 %vm2182_vm6, %v60_v17  ;;  %vm287_vm1 = vcmp.eq.s32.totalorder %v4451_v55, 1  ;;  %vm1665_vm2 = vcmp.eq.s32.totalorder %v4602_v11, 6  ;;  %vm1147_vm3 = vcmp.eq.s32.totalorder %v4701_v63, 4  ;;  %v2574_v17 = vld [vmem:[%s6420_s5] sm:$0xff]  ;;  %v64_v55 = vld [vmem:[%s6418_s0 + $0xd0] sm:$0xff] }
  0xe4   :  { %vm539_vm14 = vcmp.eq.s32.totalorder %v479_v22, 1  ;;  %vm538_vm15 = vcmp.eq.s32.totalorder %v476_v30, 1  ;;  %1727 = vperm.xlu1 %3760, %v1694_v1   ;;  %1213 = vperm.xlu0 %3759, %v1176_v29   ;;  %v1697_v18 = vsel %vm1665_vm2, 1, %v6429_v0  ;;  %vm291_vm2 = vcmp.eq.s32.totalorder %v4467_v23, 1 }
  0xe5   :  { %v575_v31 = vsel %vm539_vm14, %v4538_v14, 0.0  ;;  %v574_v21 = vsel %vm538_vm15, %v4538_v14, 0.0 }
  0xe6   :  { %v4640_v2 = vadd.f32 %v575_v31, %v315_v24  ;;  %v4642_v1 = vadd.f32 %v574_v21, %v314_v41  ;;  %v1955_v24 = vsel %vm1923_vm4, 1, %v6429_v0  ;;  %v1437_v41 = vsel %vm1405_vm8, 1, %v6429_v0  ;;  %v4673_v31 = vld [vmem:[%s6416_s1 + $0x20] sm:$0xff] }
  0xe7   :  { %v485_v29 = vpop.permute.xlu1 %484  ;;  %v482_v12 = vpop.permute.xlu0 %481  ;;  %vm1146_vm12 = vcmp.eq.s32.totalorder %v4673_v31, 4  ;;  %v319_v21 = vsel %vm283_vm10, %v4535_v9, 0.0  ;;  %vm286_vm4 = vcmp.eq.s32.totalorder %v4453_v26, 1  ;;  %vm1924_vm8 = vcmp.eq.s32.totalorder %v4627_v33, 7  ;;  %v2576_v26 = vld [vmem:[%s6420_s5 + $0x10] sm:$0xff] }
  0xe8   :  { %vm541_vm5 = vcmp.eq.s32.totalorder %v485_v29, 1  ;;  %vm540_vm7 = vcmp.eq.s32.totalorder %v482_v12, 1  ;;  %1730 = vperm.xlu1 %3760, %v1695_v28   ;;  %1216 = vperm.xlu0 %3759, %v1177_v25   ;;  %v61_v28 = vld [vmem:[%s6418_s0 + $0xb8] sm:$0xff]  ;;  %v318_v29 = vsel %vm282_vm11, %v4535_v9, 0.0  ;;  %vm1406_vm9 = vcmp.eq.s32.totalorder %v4673_v31, 5 }
  0xe9   :  { %v577_v57 = vsel %vm541_vm5, %v4538_v14, 0.0  ;;  %v576_v16 = vsel %vm540_vm7, %v4538_v14, 0.0  ;;  %3572 = vmatmul.mubr.msk.f32.gmra.mrb[6].mxu1 %vm2182_vm6, %v61_v28  ;;  %v2575_v28 = vld [vmem:[%s6420_s5 + $0x8] sm:$0xff]  ;;  %vm289_vm10 = vcmp.eq.s32.totalorder %v4459_v37, 1  ;;  %v66_v37 = vld [vmem:[%s6418_s0 + $0xe0] sm:$0xff] }
  0xea   :  { %v4657_v22 = vadd.f32 %v577_v57, %v317_v51  ;;  %v4659_v30 = vadd.f32 %v576_v16, %v316_v52  ;;  %v1178_v51 = vsel %vm1146_vm12, 1, %v6429_v0  ;;  %v321_v52 = vsel %vm285_vm13, %v4535_v9, 0.0  ;;  %v62_v16 = vld [vmem:[%s6418_s0 + $0xc0] sm:$0xff] }
  0xeb   :  { %v491_v25 = vpop.permute.xlu1 %490  ;;  %v488_v43 = vpop.permute.xlu0 %487  ;;  %3574 = vmatprep.mubr.msk.f32.mxu1 %vm2182_vm6, %v62_v16  ;;  %vm288_vm13 = vcmp.eq.s32.totalorder %v4461_v38, 1 }
  0xec   :  { %vm543_vm14 = vcmp.eq.s32.totalorder %v491_v25, 1  ;;  %vm542_vm15 = vcmp.eq.s32.totalorder %v488_v43, 1  ;;  %1987 = vperm.xlu1 %3760, %v1954_v50   ;;  %1473 = vperm.xlu0 %3759, %v1436_v15   ;;  %v320_v25 = vsel %vm284_vm0, %v4535_v9, 0.0  ;;  %v324_v33 = vsel %vm288_vm13, %v4535_v9, 0.0 }
  0xed   :  { %v579_v12 = vsel %vm543_vm14, %v4538_v14, 0.0  ;;  %v578_v48 = vsel %vm542_vm15, %v4538_v14, 0.0  ;;  %vm1925_vm14 = vcmp.eq.s32.totalorder %v4602_v11, 7  ;;  %vm1407_vm15 = vcmp.eq.s32.totalorder %v4701_v63, 5  ;;  %v68_v11 = vld [vmem:[%s6418_s0 + $0xf0] sm:$0xff] }
  0xee   :  { %v4690_v50 = vadd.f32 %v579_v12, %v319_v21  ;;  %v4692_v15 = vadd.f32 %v578_v48, %v318_v29  ;;  %v3722_v21 = vpack.c.bf16 %v2575_v28, %v2574_v17  ;;  %v1179_v48 = vsel %vm1147_vm3, 1, %v6429_v0  ;;  %v2577_v17 = vld [vmem:[%s6420_s5 + $0x18] sm:$0xff] }
  0xef   :  { %v497_v58 = vpop.permute.xlu1 %496  ;;  %v494_v57 = vpop.permute.xlu0 %493  ;;  %vm290_vm3 = vcmp.eq.s32.totalorder %v4469_v42, 1  ;;  %vm1667_vm13 = vcmp.eq.s32.totalorder %v4701_v63, 6 }
  0xf0   :  { %vm545_vm5 = vcmp.eq.s32.totalorder %v497_v58, 1  ;;  %vm544_vm7 = vcmp.eq.s32.totalorder %v494_v57, 1  ;;  %1990 = vperm.xlu1 %3760, %v1955_v24   ;;  %1476 = vperm.xlu0 %3759, %v1437_v41   ;;  %v63_v41 = vld [vmem:[%s6418_s0 + $0xc8] sm:$0xff]  ;;  %v323_v58 = vsel %vm287_vm1, %v4535_v9, 0.0  ;;  %v326_v23 = vsel %vm290_vm3, %v4535_v9, 0.0 }
  0xf1   :  { %v581_v43 = vsel %vm545_vm5, %v4538_v14, 0.0  ;;  %v580_v24 = vsel %vm544_vm7, %v4538_v14, 0.0  ;;  %3575 = vmatmul.mubr.msk.f32.gmra.mrb[8].mxu1 %vm2182_vm6, %v63_v41  ;;  %3723 = vmatprep.subr.bf16.mxu1 %v3722_v21  ;;  %v1956_v41 = vsel %vm1924_vm8, 1, %v6429_v0 }
  0xf2   :  { %v4723_v29 = vadd.f32 %v581_v43, %v321_v52  ;;  %v4725_v12 = vadd.f32 %v580_v24, %v320_v25  ;;  %v322_v52 = vsel %vm286_vm4, %v4535_v9, 0.0  ;;  %3725 = vmatpush3.bf16.msra.mxu1 %v3722_v21  ;;  %3577 = vmatprep.mubr.msk.f32.mxu1 %vm2182_vm6, %v64_v55  ;;  %v325_v21 = vsel %vm289_vm10, %v4535_v9, 0.0 }
  0xf3   :  { %v503_v57 = vpop.permute.xlu1 %502  ;;  %v500_v16 = vpop.permute.xlu0 %499  ;;  %v1438_v55 = vsel %vm1406_vm9, 1, %v6429_v0  ;;  %vm1666_vm4 = vcmp.eq.s32.totalorder %v4673_v31, 6  ;;  %vm293_vm9 = vcmp.eq.s32.totalorder %v4475_v27, 1  ;;  %vm292_vm10 = vcmp.eq.s32.totalorder %v4477_v44, 1 }
  0xf4   :  { %vm547_vm11 = vcmp.eq.s32.totalorder %v503_v57, 1  ;;  %vm546_vm12 = vcmp.eq.s32.totalorder %v500_v16, 1  ;;  %1733 = vperm.xlu1 %3760, %v1696_v34   ;;  %1219 = vperm.xlu0 %3759, %v1178_v51   ;;  %v65_v34 = vld [vmem:[%s6418_s0 + $0xd8] sm:$0xff]  ;;  %v3726_v51 = vpack.c.bf16 %v2577_v17, %v2576_v26  ;;  %v329_v44 = vsel %vm293_vm9, %v4535_v9, 0.0 }
  0xf5   :  { %v583_v28 = vsel %vm547_vm11, %v4538_v14, 0.0  ;;  %v582_v25 = vsel %vm546_vm12, %v4538_v14, 0.0  ;;  %3578 = vmatmul.mubr.msk.f32.gmra.mrb[10].mxu1 %vm2182_vm6, %v65_v34 }
  0xf6   :  { %v4759_v43 = vadd.f32 %v583_v28, %v323_v58  ;;  %v4761_v24 = vadd.f32 %v582_v25, %v322_v52  ;;  %3727 = vmatprep.subr.bf16.mxu1 %v3726_v51  ;;  %v2578_v58 = vld [vmem:[%s6420_s5 + $0x20] sm:$0xff]  ;;  %v2579_v52 = vld [vmem:[%s6420_s5 + $0x28] sm:$0xff]  ;;  %3580 = vmatprep.mubr.msk.f32.mxu1 %vm2182_vm6, %v66_v37  ;;  %v2581_v37 = vld [vmem:[%s6420_s5 + $0x38] sm:$0xff] }
  0xf7   :  { %v509_v57 = vpop.permute.xlu1 %508  ;;  %v506_v16 = vpop.permute.xlu0 %505  ;;  %3729 = vmatpush3.bf16.msra.mxu1 %v3726_v51  ;;  %v1957_v51 = vsel %vm1925_vm14, 1, %v6429_v0 }
  0xf8   :  { %vm549_vm0 = vcmp.eq.s32.totalorder %v509_v57, 1  ;;  %vm548_vm1 = vcmp.eq.s32.totalorder %v506_v16, 1  ;;  %1736 = vperm.xlu1 %3760, %v1697_v18   ;;  %1222 = vperm.xlu0 %3759, %v1179_v48   ;;  %v67_v18 = vld [vmem:[%s6418_s0 + $0xe8] sm:$0xff]  ;;  %v3730_v48 = vpack.c.bf16 %v2579_v52, %v2578_v58  ;;  %v1439_v57 = vsel %vm1407_vm15, 1, %v6429_v0 }
  0xf9   :  { %v585_v38 = vsel %vm549_vm0, %v4538_v14, 0.0  ;;  %v584_v26 = vsel %vm548_vm1, %v4538_v14, 0.0  ;;  %3581 = vmatmul.mubr.msk.f32.gmra.mrb[12].mxu1 %vm2182_vm6, %v67_v18  ;;  %v327_v16 = vsel %vm291_vm2, %v4535_v9, 0.0  ;;  %vm1926_vm15 = vcmp.eq.s32.totalorder %v4673_v31, 7 }
  0xfa   :  { %v4795_v17 = vadd.f32 %v585_v38, %v325_v21  ;;  %v4797_v28 = vadd.f32 %v584_v26, %v324_v33  ;;  %v4810_v21 = vld [vmem:[%s6416_s1 + $0x30] sm:$0xff]  ;;  %3731 = vmatprep.subr.bf16.mxu1 %v3730_v48  ;;  %3583 = vmatprep.mubr.msk.f32.mxu1 %vm2182_vm6, %v68_v11  ;;  %vm1927_vm1 = vcmp.eq.s32.totalorder %v4701_v63, 7 }
  0xfb   :  { %v515_v25 = vpop.permute.xlu1 %514  ;;  %v512_v34 = vpop.permute.xlu0 %511  ;;  %vm1148_vm5 = vcmp.eq.s32.totalorder %v4810_v21, 4  ;;  %v2580_v33 = vld [vmem:[%s6420_s5 + $0x30] sm:$0xff]  ;;  %3733 = vmatpush3.bf16.msra.mxu1 %v3730_v48  ;;  %v1698_v48 = vsel %vm1666_vm4, 1, %v6429_v0  ;;  %vm1408_vm0 = vcmp.eq.s32.totalorder %v4810_v21, 5  ;;  %vm1668_vm3 = vcmp.eq.s32.totalorder %v4810_v21, 6 }
  0xfc   :  { %vm551_vm7 = vcmp.eq.s32.totalorder %v515_v25, 1  ;;  %vm550_vm8 = vcmp.eq.s32.totalorder %v512_v34, 1  ;;  %1993 = vperm.xlu1 %3760, %v1956_v41   ;;  %1479 = vperm.xlu0 %3759, %v1438_v55   ;;  %v69_v55 = vld [vmem:[%s6418_s0 + $0xf8] sm:$0xff]  ;;  %v3734_v52 = vpack.c.bf16 %v2581_v37, %v2580_v33  ;;  %v1180_v27 = vsel %vm1148_vm5, 1, %v6429_v0 }
  0xfd   :  { %v587_v58 = vsel %vm551_vm7, %v4538_v14, 0.0  ;;  %v586_v41 = vsel %vm550_vm8, %v4538_v14, 0.0  ;;  %3584 = vmatmul.mubr.msk.f32.gmra.mrb[14].mxu1 %vm2182_vm6, %v69_v55  ;;  %v328_v25 = vsel %vm292_vm10, %v4535_v9, 0.0  ;;  %vm1928_vm10 = vcmp.eq.s32.totalorder %v4810_v21, 7 }
  0xfe   :  { %v4836_v38 = vadd.f32 %v587_v58, %v327_v16  ;;  %v4838_v42 = vadd.f32 %v586_v41, %v326_v23  ;;  %3735 = vmatprep.subr.bf16.mxu1 %v3734_v52  ;;  %v4866_v23 = vpop.f32.mrb[0].mxu0  ;;  %v1699_v58 = vsel %vm1667_vm13, 1, %v6429_v0 }
  0xff   :  { %v521_v26 = vpop.permute.xlu1 %520  ;;  %v518_v18 = vpop.permute.xlu0 %517  ;;  %3737 = vmatpush3.bf16.msra.mxu1 %v3734_v52 }
 0x100   :  { %vm553_vm11 = vcmp.eq.s32.totalorder %v521_v26, 1  ;;  %vm552_vm12 = vcmp.eq.s32.totalorder %v518_v18, 1  ;;  %1996 = vperm.xlu1 %3760, %v1957_v51   ;;  %1482 = vperm.xlu0 %3759, %v1439_v57   ;;  %v4859_v57 = vld [vmem:[%s6416_s1 + $0x38] sm:$0xff]  ;;  %v4870_v55 = vpop.f32.mrb[1].mxu0 }
 0x101   :  { %v589_v34 = vsel %vm553_vm11, %v4538_v14, 0.0  ;;  %v588_v16 = vsel %vm552_vm12, %v4538_v14, 0.0  ;;  %vm1149_vm14 = vcmp.eq.s32.totalorder %v4859_v57, 4  ;;  %v4878_v18 = vpop.f32.mrb[2].mxu0  ;;  %vm1409_vm2 = vcmp.eq.s32.totalorder %v4859_v57, 5 }
 0x102   :  { %v4851_v11 = vadd.f32 %v589_v34, %v329_v44  ;;  %v4853_v51 = vadd.f32 %v588_v16, %v328_v25  ;;  %v1181_v41 = vsel %vm1149_vm14, 1, %v6429_v0  ;;  %6437 = vst [vmem:[#allocation5_spill] sm:$0xff] %v4878_v18  ;;  %v4882_v44 = vpop.f32.mrb[3].mxu0  ;;  %v1959_v34 = vsel %vm1927_vm1, 1, %v6429_v0 }
 0x103   :  { %v4862_v33 = vpop.permute.xlu1 %690  ;;  %v4864_v37 = vpop.permute.xlu0 %687  ;;  %6438 = vst [vmem:[#allocation6_spill] sm:$0xff] %v4882_v44  ;;  %v1441_v16 = vsel %vm1409_vm2, 1, %v6429_v0  ;;  %v1700_v18 = vsel %vm1668_vm3, 1, %v6429_v0  ;;  %vm1669_vm5 = vcmp.eq.s32.totalorder %v4859_v57, 6  ;;  %vm1929_vm14 = vcmp.eq.s32.totalorder %v4859_v57, 7 }
 0x104   :  { %1739 = vperm.xlu1 %3760, %v1698_v48   ;;  %1225 = vperm.xlu0 %3759, %v1180_v27   ;;  %v1958_v48 = vsel %vm1926_vm15, 1, %v6429_v0  ;;  %v1440_v27 = vsel %vm1408_vm0, 1, %v6429_v0  ;;  %v4899_v63 = vpop.f32.mrb[4].mxu0 }
 0x105   :  { %6440 = vst [vmem:[#allocation8_spill] sm:$0xff] %v4899_v63  ;;  %v4914_v63 = vld [vmem:[%s6416_s1 + $0x48] sm:$0xff] }
 0x106   :  { %vm1151_vm7 = vcmp.eq.s32.totalorder %v4914_v63, 4  ;;  %vm1411_vm15 = vcmp.eq.s32.totalorder %v4914_v63, 5 }
 0x107   :  { %v4874_v52 = vpop.permute.xlu1 %696  ;;  %v4876_v26 = vpop.permute.xlu0 %693 }
 0x108   :  { %1742 = vperm.xlu1 %3760, %v1699_v58   ;;  %1228 = vperm.xlu0 %3759, %v1181_v41   ;;  %v4896_v58 = vld [vmem:[%s6416_s1 + $0x40] sm:$0xff]  ;;  %v816_v41 = vsub.s32 2, %v4507_v54 }
 0x109   :  { %vm1150_vm4 = vcmp.eq.s32.totalorder %v4896_v58, 4  ;;  %vm1410_vm11 = vcmp.eq.s32.totalorder %v4896_v58, 5  ;;  %vm1670_vm2 = vcmp.eq.s32.totalorder %v4896_v58, 6 }
 0x10b   :  { %v4886_v31 = vpop.permute.xlu1 %702  ;;  %v4888_v25 = vpop.permute.xlu0 %699 }
 0x10c   :  { %6439 = vst [vmem:[#allocation7_spill] sm:$0xff] %v4886_v31  ;;  %1999 = vperm.xlu1 %3760, %v1958_v48   ;;  %1485 = vperm.xlu0 %3759, %v1440_v27   ;;  %v4906_v27 = vpop.f32.mrb[5].mxu0  ;;  %v1182_v31 = vsel %vm1150_vm4, 1, %v6429_v0 }
 0x10d   :  { %6443 = vst [vmem:[#allocation11_spill] sm:$0xff] %v4906_v27 }
 0x10f   :  { %v4902_v60 = vpop.permute.xlu1 %708  ;;  %v4904_v48 = vpop.permute.xlu0 %705 }
 0x110   :  { %6441 = vst [vmem:[#allocation9_spill] sm:$0xff] %v4902_v60  ;;  %6442 = vst [vmem:[#allocation10_spill] sm:$0xff] %v4904_v48  ;;  %2002 = vperm.xlu1 %3760, %v1959_v34   ;;  %1488 = vperm.xlu0 %3759, %v1441_v16   ;;  %v4918_v60 = vrot.slane %v4526_v6, %v816_v41  ;;  %v6444_v48 = vmov 0  }
 0x111   :  { %v1701_v44 = vsel %vm1669_vm5, 1, %v6444_v48  ;;  %v1183_v59 = vsel %vm1151_vm7, 1, %v6444_v48  ;;  %vm1671_vm7 = vcmp.eq.s32.totalorder %v4914_v63, 6 }
 0x113   :  { %v715_v34 = vpop.permute.xlu1 %714  ;;  %v712_v16 = vpop.permute.xlu0 %711 }
 0x114   :  { %vm791_vm8 = vcmp.eq.s32.totalorder %v715_v34, 1  ;;  %vm790_vm9 = vcmp.eq.s32.totalorder %v712_v16, 1  ;;  %1745 = vperm.xlu1 %3760, %v1700_v18   ;;  %1231 = vperm.xlu0 %3759, %v1182_v31  }
 0x115   :  { %v827_v0 = vsel %vm791_vm8, %v4918_v60, 0.0  ;;  %v826_v27 = vsel %vm790_vm9, %v4918_v60, 0.0 }
 0x116   :  { %v4925_v13 = vadd.f32 %v827_v0, %v4553_v39  ;;  %v4928_v6 = vadd.f32 %v826_v27, %v4555_v47  ;;  %v1960_v0 = vsel %vm1928_vm10, 1, %v6444_v48  ;;  %v1442_v39 = vsel %vm1410_vm11, 1, %v6444_v48 }
 0x117   :  { %v721_v18 = vpop.permute.xlu1 %720  ;;  %v718_v31 = vpop.permute.xlu0 %717 }
 0x118   :  { %vm793_vm12 = vcmp.eq.s32.totalorder %v721_v18, 1  ;;  %vm792_vm13 = vcmp.eq.s32.totalorder %v718_v31, 1  ;;  %1748 = vperm.xlu1 %3760, %v1701_v44   ;;  %1234 = vperm.xlu0 %3759, %v1183_v59   ;;  %v1443_v18 = vsel %vm1411_vm15, 1, %v6444_v48  ;;  %v4958_v31 = vld [vmem:[%s6416_s1 + $0x50] sm:$0xff] }
 0x119   :  { %v829_v41 = vsel %vm793_vm12, %v4918_v60, 0.0  ;;  %v828_v34 = vsel %vm792_vm13, %v4918_v60, 0.0  ;;  %vm1152_vm3 = vcmp.eq.s32.totalorder %v4958_v31, 4  ;;  %vm1412_vm11 = vcmp.eq.s32.totalorder %v4958_v31, 5 }
 0x11a   :  { %v4937_v47 = vadd.f32 %v829_v41, %v4576_v19  ;;  %v4940_v21 = vadd.f32 %v828_v34, %v4578_v4  ;;  %v1961_v19 = vsel %vm1929_vm14, 1, %v6444_v48  ;;  %v4961_v41 = vpop.f32.mrb[6].mxu0 }
 0x11b   :  { %v727_v44 = vpop.permute.xlu1 %726  ;;  %v724_v59 = vpop.permute.xlu0 %723 }
 0x11c   :  { %6445 = vst [vmem:[#allocation12_spill] sm:$0xff] %v4937_v47  ;;  %6446 = vst [vmem:[#allocation13_spill] sm:$0xff] %v4940_v21  ;;  %vm795_vm0 = vcmp.eq.s32.totalorder %v727_v44, 1  ;;  %vm794_vm1 = vcmp.eq.s32.totalorder %v724_v59, 1  ;;  %2005 = vperm.xlu1 %3760, %v1960_v0   ;;  %1491 = vperm.xlu0 %3759, %v1442_v39   ;;  %v1702_v44 = vsel %vm1670_vm2, 1, %v6444_v48  ;;  %v1184_v59 = vsel %vm1152_vm3, 1, %v6444_v48 }
 0x11d   :  { %v831_v27 = vsel %vm795_vm0, %v4918_v60, 0.0  ;;  %v830_v16 = vsel %vm794_vm1, %v4918_v60, 0.0  ;;  %vm1930_vm0 = vcmp.eq.s32.totalorder %v4896_v58, 7  ;;  %vm1931_vm3 = vcmp.eq.s32.totalorder %v4914_v63, 7 }
 0x11e   :  { %v4949_v4 = vadd.f32 %v831_v27, %v4590_v36  ;;  %v4952_v57 = vadd.f32 %v830_v16, %v4592_v3  ;;  %v4963_v36 = vpop.f32.mrb[7].mxu0 }
 0x11f   :  { %v733_v34 = vpop.permute.xlu1 %732  ;;  %v730_v0 = vpop.permute.xlu0 %729 }
 0x120   :  { %6447 = vst [vmem:[#allocation14_spill] sm:$0xff] %v4949_v4  ;;  %6448 = vst [vmem:[#allocation15_spill] sm:$0xff] %v4952_v57  ;;  %vm797_vm4 = vcmp.eq.s32.totalorder %v733_v34, 1  ;;  %vm796_vm5 = vcmp.eq.s32.totalorder %v730_v0, 1  ;;  %2008 = vperm.xlu1 %3760, %v1961_v19   ;;  %1494 = vperm.xlu0 %3759, %v1443_v18   ;;  %v4979_v19 = vld [vmem:[%s6416_s1 + $0x58] sm:$0xff]  ;;  %v1703_v0 = vsel %vm1671_vm7, 1, %v6444_v48 }
 0x121   :  { %v833_v3 = vsel %vm797_vm4, %v4918_v60, 0.0  ;;  %v832_v39 = vsel %vm796_vm5, %v4918_v60, 0.0  ;;  %vm1153_vm8 = vcmp.eq.s32.totalorder %v4979_v19, 4  ;;  %vm1413_vm4 = vcmp.eq.s32.totalorder %v4979_v19, 5 }
 0x122   :  { %v4970_v27 = vadd.f32 %v833_v3, %v4615_v49  ;;  %v4973_v16 = vadd.f32 %v832_v39, %v4617_v20  ;;  %v1185_v3 = vsel %vm1153_vm8, 1, %v6444_v48  ;;  %vm1672_vm8 = vcmp.eq.s32.totalorder %v4958_v31, 6 }
 0x123   :  { %v739_v18 = vpop.permute.xlu1 %738  ;;  %v736_v34 = vpop.permute.xlu0 %735  ;;  %v1856_v4 = vsub.s32 6, %v4507_v54 }
 0x124   :  { %6449 = vst [vmem:[#allocation16_spill] sm:$0xff] %v4970_v27  ;;  %6450 = vst [vmem:[#allocation17_spill] sm:$0xff] %v4973_v16  ;;  %vm799_vm9 = vcmp.eq.s32.totalorder %v739_v18, 1  ;;  %vm798_vm10 = vcmp.eq.s32.totalorder %v736_v34, 1  ;;  %1751 = vperm.xlu1 %3760, %v1702_v44   ;;  %1237 = vperm.xlu0 %3759, %v1184_v59   ;;  %v4996_v44 = vld [vmem:[%s6416_s1 + $0x60] sm:$0xff]  ;;  %v1444_v34 = vsel %vm1412_vm11, 1, %v6444_v48 }
 0x125   :  { %v835_v49 = vsel %vm799_vm9, %v4918_v60, 0.0  ;;  %v834_v20 = vsel %vm798_vm10, %v4918_v60, 0.0  ;;  %vm894_vm12 = vcmp.eq.s32.totalorder %v4996_v44, 3  ;;  %vm1154_vm9 = vcmp.eq.s32.totalorder %v4996_v44, 4 }
 0x126   :  { %v4987_v39 = vadd.f32 %v835_v49, %v4640_v2  ;;  %v4990_v27 = vadd.f32 %v834_v20, %v4642_v1  ;;  %v926_v49 = vsel %vm894_vm12, 1, %v6444_v48  ;;  %vm1673_vm12 = vcmp.eq.s32.totalorder %v4979_v19, 6 }
 0x127   :  { %v745_v59 = vpop.permute.xlu1 %744  ;;  %v742_v18 = vpop.permute.xlu0 %741  ;;  %v1596_v16 = vsub.s32 5, %v4507_v54 }
 0x128   :  { %6451 = vst [vmem:[#allocation18_spill] sm:$0xff] %v4987_v39  ;;  %6452 = vst [vmem:[#allocation19_spill] sm:$0xff] %v4990_v27  ;;  %vm801_vm13 = vcmp.eq.s32.totalorder %v745_v59, 1  ;;  %vm800_vm14 = vcmp.eq.s32.totalorder %v742_v18, 1  ;;  %1754 = vperm.xlu1 %3760, %v1703_v0   ;;  %1240 = vperm.xlu0 %3759, %v1185_v3   ;;  %v5012_v59 = vld [vmem:[%s6416_s1 + $0x68] sm:$0xff] }
 0x129   :  { %v837_v2 = vsel %vm801_vm13, %v4918_v60, 0.0  ;;  %v836_v1 = vsel %vm800_vm14, %v4918_v60, 0.0  ;;  %vm895_vm15 = vcmp.eq.s32.totalorder %v5012_v59, 3  ;;  %vm1155_vm13 = vcmp.eq.s32.totalorder %v5012_v59, 4 }
 0x12a   :  { %v5004_v20 = vadd.f32 %v837_v2, %v4657_v22  ;;  %v5007_v39 = vadd.f32 %v836_v1, %v4659_v30  ;;  %v927_v18 = vsel %vm895_vm15, 1, %v6444_v48  ;;  %v1962_v2 = vsel %vm1930_vm0, 1, %v6444_v48 }
 0x12b   :  { %v751_v0 = vpop.permute.xlu1 %750  ;;  %v748_v3 = vpop.permute.xlu0 %747  ;;  %vm1414_vm0 = vcmp.eq.s32.totalorder %v4996_v44, 5 }
 0x12c   :  { %6453 = vst [vmem:[#allocation20_spill] sm:$0xff] %v5004_v20  ;;  %6454 = vst [vmem:[#allocation21_spill] sm:$0xff] %v5007_v39  ;;  %vm803_vm1 = vcmp.eq.s32.totalorder %v751_v0, 1  ;;  %vm802_vm2 = vcmp.eq.s32.totalorder %v748_v3, 1  ;;  %1497 = vperm.xlu1 %3760, %v1444_v34   ;;  %983 = vperm.xlu0 %3759, %v926_v49   ;;  %v1445_v3 = vsel %vm1413_vm4, 1, %v6444_v48 }
 0x12d   :  { %v839_v22 = vsel %vm803_vm1, %v4918_v60, 0.0  ;;  %v838_v30 = vsel %vm802_vm2, %v4918_v60, 0.0 }
 0x12e   :  { %v5021_v1 = vadd.f32 %v839_v22, %v4690_v50  ;;  %v5024_v20 = vadd.f32 %v838_v30, %v4692_v15  ;;  %v1963_v50 = vsel %vm1931_vm3, 1, %v6444_v48  ;;  %v5040_v22 = vpop.f32.mrb[8].mxu0 }
 0x12f   :  { %v757_v58 = vpop.permute.xlu1 %756  ;;  %v754_v34 = vpop.permute.xlu0 %753 }
 0x130   :  { %6455 = vst [vmem:[#allocation22_spill] sm:$0xff] %v5021_v1  ;;  %6456 = vst [vmem:[#allocation23_spill] sm:$0xff] %v5024_v20  ;;  %vm805_vm5 = vcmp.eq.s32.totalorder %v757_v58, 1  ;;  %vm804_vm7 = vcmp.eq.s32.totalorder %v754_v34, 1  ;;  %986 = vperm.xlu1 %3760, %v927_v18   ;;  %2011 = vperm.xlu0 %3759, %v1962_v2   ;;  %v5042_v2 = vpop.f32.mrb[9].mxu0  ;;  %v1186_v34 = vsel %vm1154_vm9, 1, %v6444_v48 }
 0x131   :  { %v841_v49 = vsel %vm805_vm5, %v4918_v60, 0.0  ;;  %v840_v0 = vsel %vm804_vm7, %v4918_v60, 0.0  ;;  %vm1932_vm5 = vcmp.eq.s32.totalorder %v4958_v31, 7  ;;  %vm1933_vm9 = vcmp.eq.s32.totalorder %v4979_v19, 7 }
 0x132   :  { %v5033_v15 = vadd.f32 %v841_v49, %v4723_v29  ;;  %v5036_v63 = vadd.f32 %v840_v0, %v4725_v12  ;;  %v1704_v12 = vsel %vm1672_vm8, 1, %v6444_v48  ;;  %v1336_v1 = vsub.s32 4, %v4507_v54 }
 0x133   :  { %v763_v30 = vpop.permute.xlu1 %762  ;;  %v760_v18 = vpop.permute.xlu0 %759 }
 0x134   :  { %6457 = vst [vmem:[#allocation24_spill] sm:$0xff] %v5033_v15  ;;  %6458 = vst [vmem:[#allocation25_spill] sm:$0xff] %v5036_v63  ;;  %vm807_vm10 = vcmp.eq.s32.totalorder %v763_v30, 1  ;;  %vm806_vm11 = vcmp.eq.s32.totalorder %v760_v18, 1  ;;  %2014 = vperm.xlu1 %3760, %v1963_v50   ;;  %1500 = vperm.xlu0 %3759, %v1445_v3  }
 0x135   :  { %v843_v29 = vsel %vm807_vm10, %v4918_v60, 0.0  ;;  %v842_v58 = vsel %vm806_vm11, %v4918_v60, 0.0  ;;  %vm1415_vm10 = vcmp.eq.s32.totalorder %v5012_v59, 5  ;;  %vm1674_vm11 = vcmp.eq.s32.totalorder %v4996_v44, 6 }
 0x136   :  { %v5049_v49 = vadd.f32 %v843_v29, %v4759_v43  ;;  %v5052_v0 = vadd.f32 %v842_v58, %v4761_v24  ;;  %v1705_v43 = vsel %vm1673_vm12, 1, %v6444_v48  ;;  %v1187_v29 = vsel %vm1155_vm13, 1, %v6444_v48 }
 0x137   :  { %v769_v50 = vpop.permute.xlu1 %768  ;;  %v766_v3 = vpop.permute.xlu0 %765  ;;  %vm1675_vm13 = vcmp.eq.s32.totalorder %v5012_v59, 6 }
 0x138   :  { %6459 = vst [vmem:[#allocation26_spill] sm:$0xff] %v5049_v49  ;;  %6460 = vst [vmem:[#allocation27_spill] sm:$0xff] %v5052_v0  ;;  %vm809_vm14 = vcmp.eq.s32.totalorder %v769_v50, 1  ;;  %vm808_vm15 = vcmp.eq.s32.totalorder %v766_v3, 1  ;;  %1757 = vperm.xlu1 %3760, %v1704_v12   ;;  %1243 = vperm.xlu0 %3759, %v1186_v34   ;;  %v5070_v12 = vld [vmem:[%s6416_s1 + $0x70] sm:$0xff]  ;;  %v1446_v3 = vsel %vm1414_vm0, 1, %v6444_v48 }
 0x139   :  { %v845_v30 = vsel %vm809_vm14, %v4918_v60, 0.0  ;;  %v844_v18 = vsel %vm808_vm15, %v4918_v60, 0.0  ;;  %vm896_vm1 = vcmp.eq.s32.totalorder %v5070_v12, 3  ;;  %vm1156_vm12 = vcmp.eq.s32.totalorder %v5070_v12, 4 }
 0x13a   :  { %v5061_v24 = vadd.f32 %v845_v30, %v4795_v17  ;;  %v5064_v58 = vadd.f32 %v844_v18, %v4797_v28  ;;  %v928_v30 = vsel %vm896_vm1, 1, %v6444_v48  ;;  %vm1416_vm15 = vcmp.eq.s32.totalorder %v5070_v12, 5 }
 0x13b   :  { %v775_v34 = vpop.permute.xlu1 %774  ;;  %v772_v50 = vpop.permute.xlu0 %771 }
 0x13c   :  { %6461 = vst [vmem:[#allocation28_spill] sm:$0xff] %v5061_v24  ;;  %6462 = vst [vmem:[#allocation29_spill] sm:$0xff] %v5064_v58  ;;  %vm811_vm2 = vcmp.eq.s32.totalorder %v775_v34, 1  ;;  %vm810_vm3 = vcmp.eq.s32.totalorder %v772_v50, 1  ;;  %1760 = vperm.xlu1 %3760, %v1705_v43   ;;  %1246 = vperm.xlu0 %3759, %v1187_v29   ;;  %v5086_v34 = vld [vmem:[%s6416_s1 + $0x78] sm:$0xff]  ;;  %v5144_v58 = vld [vmem:[%s6416_s1 + $0x88] sm:$0xff] }
 0x13d   :  { %v847_v17 = vsel %vm811_vm2, %v4918_v60, 0.0  ;;  %v846_v28 = vsel %vm810_vm3, %v4918_v60, 0.0  ;;  %vm897_vm4 = vcmp.eq.s32.totalorder %v5086_v34, 3  ;;  %vm1157_vm14 = vcmp.eq.s32.totalorder %v5086_v34, 4 }
 0x13e   :  { %v5078_v18 = vadd.f32 %v847_v17, %v4836_v38  ;;  %v5081_v24 = vadd.f32 %v846_v28, %v4838_v42  ;;  %v929_v50 = vsel %vm897_vm4, 1, %v6444_v48  ;;  %v1964_v17 = vsel %vm1932_vm5, 1, %v6444_v48 }
 0x13f   :  { %v781_v43 = vpop.permute.xlu1 %780  ;;  %v778_v29 = vpop.permute.xlu0 %777  ;;  %vm899_vm1 = vcmp.eq.s32.totalorder %v5144_v58, 3  ;;  %vm1934_vm2 = vcmp.eq.s32.totalorder %v4996_v44, 7  ;;  %vm1935_vm3 = vcmp.eq.s32.totalorder %v5012_v59, 7  ;;  %vm1417_vm4 = vcmp.eq.s32.totalorder %v5086_v34, 5 }
 0x140   :  { %6463 = vst [vmem:[#allocation30_spill] sm:$0xff] %v5078_v18  ;;  %6464 = vst [vmem:[#allocation31_spill] sm:$0xff] %v5081_v24  ;;  %vm813_vm7 = vcmp.eq.s32.totalorder %v781_v43, 1  ;;  %vm812_vm8 = vcmp.eq.s32.totalorder %v778_v29, 1  ;;  %1503 = vperm.xlu1 %3760, %v1446_v3   ;;  %989 = vperm.xlu0 %3759, %v928_v30   ;;  %v1965_v30 = vsel %vm1933_vm9, 1, %v6444_v48  ;;  %v1447_v43 = vsel %vm1415_vm10, 1, %v6444_v48 }
 0x141   :  { %v849_v38 = vsel %vm813_vm7, %v4918_v60, 0.0  ;;  %v848_v42 = vsel %vm812_vm8, %v4918_v60, 0.0  ;;  %vm264_vm5 = vcmp.eq.s32.totalorder %v4331_v45, 1  ;;  %vm262_vm7 = vcmp.eq.s32.totalorder %v4333_v46, 1 }
 0x142   :  { %v5095_v28 = vadd.f32 %v849_v38, %v4851_v11  ;;  %v5098_v18 = vadd.f32 %v848_v42, %v4853_v51  ;;  %v5110_v11 = vpop.f32.mrb[10].mxu0  ;;  %v1706_v38 = vsel %vm1674_vm11, 1, %v6444_v48  ;;  %v1188_v42 = vsel %vm1156_vm12, 1, %v6444_v48 }
 0x143   :  { %v5102_v31 = vpop.permute.xlu1 %950  ;;  %v5104_v3 = vpop.permute.xlu0 %947  ;;  %6467 = vst [vmem:[#allocation34_spill] sm:$0xff] %v5110_v11  ;;  %vm265_vm8 = vcmp.eq.s32.totalorder %v4346_v53, 1  ;;  %vm263_vm9 = vcmp.eq.s32.totalorder %v4348_v56, 1  ;;  %v1967_v44 = vsel %vm1935_vm3, 1, %v6444_v48  ;;  %v1449_v59 = vsel %vm1417_vm4, 1, %v6444_v48 }
 0x144   :  { %6465 = vst [vmem:[#allocation32_spill] sm:$0xff] %v5095_v28  ;;  %6466 = vst [vmem:[#allocation33_spill] sm:$0xff] %v5098_v18  ;;  %992 = vperm.xlu1 %3760, %v929_v50   ;;  %2017 = vperm.xlu0 %3759, %v1964_v17   ;;  %v5116_v29 = vpop.f32.mrb[11].mxu0  ;;  %v1707_v28 = vsel %vm1675_vm13, 1, %v6444_v48  ;;  %vm523_vm10 = vcmp.eq.s32.totalorder %v4490_v32, 1  ;;  %vm522_vm11 = vcmp.eq.s32.totalorder %v4492_v35, 1 }
 0x145   :  { %6468 = vst [vmem:[#allocation35_spill] sm:$0xff] %v5116_v29  ;;  %vm1676_vm12 = vcmp.eq.s32.totalorder %v5070_v12, 6  ;;  %v5170_v45 = vpop.f32.mrb[12].mxu0  ;;  %v5173_v46 = vsel %vm264_vm5, %v4535_v9, 0.0  ;;  %v298_v53 = vsel %vm262_vm7, %v4535_v9, 0.0  ;;  %v1076_v56 = vsub.s32 3, %v4507_v54 }
 0x146   :  { %6470 = vst [vmem:[#allocation37_spill] sm:$0xff] %v5170_v45  ;;  %v5186_v20 = vpop.f32.mrb[13].mxu0  ;;  %v558_v39 = vsel %vm522_vm11, %v4538_v14, 0.0  ;;  %v1708_v27 = vsel %vm1676_vm12, 1, %v6444_v48  ;;  %v3907_v35 = vld [vmem:[%s6419_s3] sm:$0xff]  ;;  %vm269_vm3 = vcmp.eq.s32.totalorder %v4363_v10, 1 }
 0x147   :  { %v5112_v51 = vpop.permute.xlu1 %956  ;;  %v5114_v19 = vpop.permute.xlu0 %953  ;;  %6471 = vst [vmem:[#allocation38_spill] sm:$0xff] %v5186_v20  ;;  %v590_v11 = vadd.f32 %v558_v39, %v298_v53  ;;  %vm1042_vm4 = vcmp.eq.s32.totalorder %v5104_v3, 1  ;;  %v5220_v29 = vrot.slane %v3907_v35, %v1336_v1  ;;  %vm525_vm7 = vcmp.eq.s32.totalorder %v4499_v40, 1 }
 0x148   :  { %2020 = vperm.xlu1 %3760, %v1965_v30   ;;  %1506 = vperm.xlu0 %3759, %v1447_v43   ;;  %v1189_v30 = vsel %vm1157_vm14, 1, %v6444_v48  ;;  %v5132_v43 = vld [vmem:[%s6416_s1 + $0x80] sm:$0xff]  ;;  %vm267_vm14 = vcmp.eq.s32.totalorder %v4355_v61, 1  ;;  %v559_v61 = vsel %vm523_vm10, %v4538_v14, 0.0  ;;  %v5241_v39 = vrot.slane %v3907_v35, %v1596_v16 }
 0x149   :  { %vm898_vm0 = vcmp.eq.s32.totalorder %v5132_v43, 3  ;;  %vm1158_vm13 = vcmp.eq.s32.totalorder %v5132_v43, 4  ;;  %vm1418_vm5 = vcmp.eq.s32.totalorder %v5132_v43, 5  ;;  %v5243_v1 = vrot.slane %v3907_v35, %v1856_v4 }
 0x14a   :  { %vm1043_vm11 = vcmp.eq.s32.totalorder %v5102_v31, 1 }
 0x14b   :  { %v5122_v50 = vpop.permute.xlu1 %962  ;;  %v5124_v17 = vpop.permute.xlu0 %959 }
 0x14c   :  { %1763 = vperm.xlu1 %3760, %v1706_v38   ;;  %1249 = vperm.xlu0 %3759, %v1188_v42   ;;  %v1448_v38 = vsel %vm1416_vm15, 1, %v6444_v48  ;;  %v930_v42 = vsel %vm898_vm0, 1, %v6444_v48  ;;  %vm266_vm15 = vcmp.eq.s32.totalorder %v4357_v62, 1  ;;  %v1190_v62 = vsel %vm1158_vm13, 1, %v6444_v48 }
 0x14d   :  { %vm782_vm0 = vcmp.eq.s32.totalorder %v4864_v37, 1  ;;  %v5207_v32 = vsel %vm266_vm15, %v4535_v9, 0.0  ;;  %v5237_v37 = vld [vmem:[%s6416_s1 + $0x90] sm:$0xff] }
 0x14e   :  { %vm900_vm10 = vcmp.eq.s32.totalorder %v5237_v37, 3 }
 0x14f   :  { %v5135_v18 = vpop.permute.xlu1 %968  ;;  %v5137_v24 = vpop.permute.xlu0 %965 }
 0x150   :  { %1766 = vperm.xlu1 %3760, %v1707_v28   ;;  %1252 = vperm.xlu0 %3759, %v1189_v30   ;;  %v931_v28 = vsel %vm899_vm1, 1, %v6444_v48  ;;  %v1966_v30 = vsel %vm1934_vm2, 1, %v6444_v48  ;;  %vm1677_vm1 = vcmp.eq.s32.totalorder %v5086_v34, 6  ;;  %vm1159_vm2 = vcmp.eq.s32.totalorder %v5144_v58, 4 }
 0x151   :  { %v1709_v47 = vsel %vm1677_vm1, 1, %v6444_v48  ;;  %v1191_v21 = vsel %vm1159_vm2, 1, %v6444_v48  ;;  %vm524_vm1 = vcmp.eq.s32.totalorder %v4501_v5, 1 }
 0x153   :  { %v5148_v49 = vpop.permute.xlu1 %974  ;;  %v5150_v0 = vpop.permute.xlu0 %971 }
 0x154   :  { %1509 = vperm.xlu1 %3760, %v1448_v38   ;;  %995 = vperm.xlu0 %3759, %v930_v42  }
 0x157   :  { %v5156_v15 = vpop.permute.xlu1 %980  ;;  %v5158_v63 = vpop.permute.xlu0 %977 }
 0x158   :  { %6469 = vst [vmem:[#allocation36_spill] sm:$0xff] %v5156_v15  ;;  %998 = vperm.xlu1 %3760, %v931_v28   ;;  %2023 = vperm.xlu0 %3759, %v1966_v30   ;;  %v5181_v28 = vsel %vm265_vm8, %v4535_v9, 0.0  ;;  %v299_v30 = vsel %vm263_vm9, %v4535_v9, 0.0  ;;  %vm783_vm8 = vcmp.eq.s32.totalorder %v4862_v33, 1  ;;  %v932_v15 = vsel %vm900_vm10, 1, %v6444_v48 }
 0x159   :  { %v591_v57 = vadd.f32 %v559_v61, %v299_v30  ;;  %v2116_v30 = vsub.s32 7, %v4507_v54  ;;  %v819_v4 = vsel %vm783_vm8, %v4918_v60, 0.0  ;;  %v5261_v54 = vld [vmem:[%s6416_s1 + $0x98] sm:$0xff]  ;;  %vm1419_vm8 = vcmp.eq.s32.totalorder %v5144_v58, 5 }
 0x15a   :  { %vm901_vm13 = vcmp.eq.s32.totalorder %v5261_v54, 3 }
 0x15b   :  { %v5178_v38 = vpop.permute.xlu1 %1210  ;;  %v1208_v42 = vpop.permute.xlu0 %1207 }
 0x15c   :  { %2026 = vperm.xlu1 %3760, %v1967_v44   ;;  %1512 = vperm.xlu0 %3759, %v1449_v59   ;;  %v5201_v44 = vsel %vm267_vm14, %v4535_v9, 0.0  ;;  %v5212_v59 = vrot.slane %v3907_v35, %v1076_v56  ;;  %v818_v56 = vsel %vm782_vm0, %v4918_v60, 0.0  ;;  %vm1302_vm9 = vcmp.eq.s32.totalorder %v1208_v42, 1 }
 0x15d   :  { %v850_v61 = vadd.f32 %v818_v56, %v590_v11  ;;  %v1338_v16 = vsel %vm1302_vm9, %v5220_v29, 0.0  ;;  %vm1303_vm14 = vcmp.eq.s32.totalorder %v5178_v38, 1  ;;  %vm1936_vm0 = vcmp.eq.s32.totalorder %v5070_v12, 7 }
 0x15e   :  { %v1079_v33 = vsel %vm1043_vm11, %v5212_v59, 0.0  ;;  %v5271_v11 = vrot.slane %v3907_v35, %v2116_v30  ;;  %v851_v42 = vadd.f32 %v819_v4, %v591_v57  ;;  %v933_v12 = vsel %vm901_vm13, 1, %v6444_v48 }
 0x15f   :  { %v5215_v45 = vpop.permute.xlu1 %1470  ;;  %v1468_v20 = vpop.permute.xlu0 %1467  ;;  %v1339_v38 = vsel %vm1303_vm14, %v5220_v29, 0.0  ;;  %v5285_v57 = vsel %vm269_vm3, %v4535_v9, 0.0  ;;  %vm784_vm9 = vcmp.eq.s32.totalorder %v4876_v26, 1  ;;  %vm1678_vm3 = vcmp.eq.s32.totalorder %v5132_v43, 6 }
 0x160   :  { %1769 = vperm.xlu1 %3760, %v1708_v27   ;;  %1255 = vperm.xlu0 %3759, %v1190_v62   ;;  %v1078_v27 = vsel %vm1042_vm4, %v5212_v59, 0.0  ;;  %vm1562_vm12 = vcmp.eq.s32.totalorder %v1468_v20, 1  ;;  %v1450_v62 = vsel %vm1418_vm5, 1, %v6444_v48  ;;  %vm1563_vm2 = vcmp.eq.s32.totalorder %v5215_v45, 1 }
 0x161   :  { %vm1937_vm4 = vcmp.eq.s32.totalorder %v5086_v34, 7  ;;  %v1111_v35 = vadd.f32 %v1079_v33, %v851_v42  ;;  %v560_v45 = vsel %vm524_vm1, %v4538_v14, 0.0  ;;  %v1451_v33 = vsel %vm1419_vm8, 1, %v6444_v48  ;;  %v5307_v42 = vpop.f32.mrb[14].mxu0 }
 0x162   :  { %v1969_v5 = vsel %vm1937_vm4, 1, %v6444_v48  ;;  %v820_v34 = vsel %vm784_vm9, %v4918_v60, 0.0  ;;  %vm1679_vm11 = vcmp.eq.s32.totalorder %v5144_v58, 6  ;;  %vm1044_vm13 = vcmp.eq.s32.totalorder %v5114_v19, 1  ;;  %v5325_v26 = vpop.f32.mrb[15].mxu0 }
 0x163   :  { %v1728_v3 = vpop.permute.xlu1 %1727  ;;  %v5245_v53 = vpop.permute.xlu0 %1213  ;;  %vm1045_vm4 = vcmp.eq.s32.totalorder %v5112_v51, 1 }
 0x164   :  { %1772 = vperm.xlu1 %3760, %v1709_v47   ;;  %1258 = vperm.xlu0 %3759, %v1191_v21   ;;  %v1110_v47 = vadd.f32 %v1078_v27, %v850_v61  ;;  %vm1822_vm15 = vcmp.eq.s32.totalorder %v1728_v3, 1  ;;  %v1598_v21 = vsel %vm1562_vm12, %v5241_v39, 0.0  ;;  %v1968_v3 = vsel %vm1936_vm0, 1, %v6444_v48 }
 0x165   :  { %v1858_v27 = vsel %vm1822_vm15, %v5243_v1, 0.0  ;;  %v1599_v61 = vsel %vm1563_vm2, %v5241_v39, 0.0  ;;  %vm527_vm12 = vcmp.eq.s32.totalorder %v4509_v7, 1  ;;  %vm1161_vm15 = vcmp.eq.s32.totalorder %v5261_v54, 4 }
 0x166   :  { %v1370_v56 = vadd.f32 %v1338_v16, %v1110_v47  ;;  %v1371_v16 = vadd.f32 %v1339_v38, %v1111_v35  ;;  %v5317_v38 = vld [vmem:[%s6421_s4] ss:$0 sm:$0xff]  ;;  %vm785_vm0 = vcmp.eq.s32.totalorder %v4874_v52, 1  ;;  %vm1304_vm1 = vcmp.eq.s32.totalorder %v5245_v53, 1 }
 0x167   :  { %v1731_v20 = vpop.permute.xlu1 %1730  ;;  %v5269_v31 = vpop.permute.xlu0 %1216  ;;  %vm1420_vm2 = vcmp.eq.s32.totalorder %v5237_v37, 5  ;;  %v821_v19 = vsel %vm785_vm0, %v4918_v60, 0.0  ;;  %v1081_v53 = vsel %vm1045_vm4, %v5212_v59, 0.0  ;;  %vm786_vm0 = vcmp.eq.s32.totalorder %v4888_v25, 1 }
 0x168   :  { %1515 = vperm.xlu1 %3760, %v1450_v62   ;;  %1001 = vperm.xlu0 %3759, %v932_v15   ;;  %v1630_v30 = vadd.f32 %v1598_v21, %v1370_v56  ;;  %vm1823_vm5 = vcmp.eq.s32.totalorder %v1731_v20, 1  ;;  %v561_v15 = vsel %vm525_vm7, %v4538_v14, 0.0  ;;  %v1631_v21 = vadd.f32 %v1599_v61, %v1371_v16 }
 0x169   :  { %v1859_v10 = vsel %vm1823_vm5, %v5243_v1, 0.0  ;;  %vm1160_vm7 = vcmp.eq.s32.totalorder %v5237_v37, 4  ;;  %v593_v56 = vadd.f32 %v561_v15, %v5181_v28  ;;  %vm1305_vm9 = vcmp.eq.s32.totalorder %v5269_v31, 1 }
 0x16a   :  { %v1890_v47 = vadd.f32 %v1858_v27, %v1630_v30  ;;  %v1891_v28 = vadd.f32 %v1859_v10, %v1631_v21  ;;  %v1710_v30 = vsel %vm1678_vm3, 1, %v6444_v48  ;;  %v1192_v15 = vsel %vm1160_vm7, 1, %v6444_v48  ;;  %v5362_v21 = vld [vmem:[%s6416_s1 + $0xa0] sm:$0xff] }
 0x16b   :  { %v1988_v62 = vpop.permute.xlu1 %1987  ;;  %v5294_v4 = vpop.permute.xlu0 %1473  ;;  %v1711_v10 = vsel %vm1679_vm11, 1, %v6444_v48  ;;  %vm902_vm8 = vcmp.eq.s32.totalorder %v5362_v21, 3  ;;  %vm526_vm3 = vcmp.eq.s32.totalorder %v4511_v8, 1  ;;  %v1452_v31 = vsel %vm1420_vm2, 1, %v6444_v48 }
 0x16c   :  { %vm2082_vm10 = vcmp.eq.s32.totalorder %v1988_v62, 1  ;;  %1004 = vperm.xlu1 %3760, %v933_v12   ;;  %2029 = vperm.xlu0 %3759, %v1968_v3   ;;  %v592_v12 = vadd.f32 %v560_v45, %v5173_v46  ;;  %v1080_v62 = vsel %vm1044_vm13, %v5212_v59, 0.0  ;;  %vm1564_vm5 = vcmp.eq.s32.totalorder %v5294_v4, 1 }
 0x16d   :  { %v2118_v40 = vsel %vm2082_vm10, %v5271_v11, 0.0  ;;  %v1341_v51 = vsel %vm1305_vm9, %v5220_v29, 0.0  ;;  %v934_v4 = vsel %vm902_vm8, 1, %v6444_v48  ;;  %vm1421_vm2 = vcmp.eq.s32.totalorder %v5261_v54, 5 }
 0x16e   :  { %v2150_v20 = vadd.f32 %v2118_v40, %v1890_v47  ;;  %v852_v61 = vadd.f32 %v820_v34, %v592_v12  ;;  %vm1680_vm4 = vcmp.eq.s32.totalorder %v5237_v37, 6  ;;  %vm1046_vm9 = vcmp.eq.s32.totalorder %v5124_v17, 1 }
 0x16f   :  { %v1991_v27 = vpop.permute.xlu1 %1990  ;;  %v5319_v3 = vpop.permute.xlu0 %1476 }
 0x170   :  { %vm2083_vm14 = vcmp.eq.s32.totalorder %v1991_v27, 1  ;;  %v2346_v46 = vadd.f32 %v4870_v55, %v2150_v20  ;;  %2032 = vperm.xlu1 %3760, %v1969_v5   ;;  %1518 = vperm.xlu0 %3759, %v1451_v33   ;;  %v1340_v5 = vsel %vm1304_vm1, %v5220_v29, 0.0  ;;  %v1193_v33 = vsel %vm1161_vm15, 1, %v6444_v48 }
 0x171   :  { %v2119_v35 = vsel %vm2083_vm14, %v5271_v11, 0.0  ;;  %v1600_v20 = vsel %vm1564_vm5, %v5241_v39, 0.0  ;;  %v853_v27 = vadd.f32 %v821_v19, %v593_v56  ;;  %vm1565_vm7 = vcmp.eq.s32.totalorder %v5319_v3, 1 }
 0x172   :  { %v2151_v55 = vadd.f32 %v2119_v35, %v1891_v28  ;;  %v2510_v45 = vadd.f32 %v5317_v38, %v2346_v46  ;;  %v5388_v35 = vld [vmem:[%s6416_s1 + $0xa8] sm:$0xff]  ;;  %vm1938_vm14 = vcmp.eq.s32.totalorder %v5132_v43, 7  ;;  %v563_v3 = vsel %vm527_vm12, %v4538_v14, 0.0  ;;  %v6472_v43 = vld [vmem:[#allocation2_spill] sm:$0xff] }
 0x173   :  { %v1734_v16 = vpop.permute.xlu1 %1733  ;;  %v5341_v47 = vpop.permute.xlu0 %1219  ;;  %vm903_vm11 = vcmp.eq.s32.totalorder %v5388_v35, 3  ;;  %v1113_v56 = vadd.f32 %v1081_v53, %v853_v27  ;;  %vm2589_vm15 = vcmask 523264   ;;  %vm1939_vm12 = vcmp.eq.s32.totalorder %v5144_v58, 7 }
 0x174   :  { %v2351_v40 = vadd.f32 %v4866_v23, %v2151_v55  ;;  %3761 = vtanh.f32 %v2510_v45  ;;  %1775 = vperm.xlu1 %3760, %v1710_v30   ;;  %1261 = vperm.xlu0 %3759, %v1192_v15   ;;  %v1112_v23 = vadd.f32 %v1080_v62, %v852_v61  ;;  %vm1824_vm10 = vcmp.eq.s32.totalorder %v1734_v16, 1 }
 0x175   :  { %v1860_v46 = vsel %vm1824_vm10, %v5243_v1, 0.0  ;;  %v562_v15 = vsel %vm526_vm3, %v4538_v14, 0.0  ;;  %v1601_v55 = vsel %vm1565_vm7, %v5241_v39, 0.0  ;;  %v1373_v62 = vadd.f32 %v1341_v51, %v1113_v56 }
 0x176   :  { %v2511_v52 = vadd.f32 %v5317_v38, %v2351_v40  ;;  %v1372_v28 = vadd.f32 %v1340_v5, %v1112_v23  ;;  %v935_v8 = vsel %vm903_vm11, 1, %v6444_v48  ;;  %v1970_v40 = vsel %vm1938_vm14, 1, %v6444_v48 }
 0x177   :  { %v1737_v12 = vpop.permute.xlu1 %1736  ;;  %v5374_v34 = vpop.permute.xlu0 %1222  ;;  %v1633_v5 = vadd.f32 %v1601_v55, %v1373_v62  ;;  %v595_v23 = vadd.f32 %v563_v3, %v5201_v44  ;;  %v822_v53 = vsel %vm786_vm0, %v4918_v60, 0.0  ;;  %vm268_vm5 = vcmp.eq.s32.totalorder %v6472_v43, 1 }
 0x178   :  { %3763 = vtanh.f32 %v2511_v52  ;;  %1778 = vperm.xlu1 %3760, %v1711_v10   ;;  %1264 = vperm.xlu0 %3759, %v1193_v33   ;;  %v1632_v30 = vadd.f32 %v1600_v20, %v1372_v28  ;;  %vm1825_vm13 = vcmp.eq.s32.totalorder %v1737_v12, 1  ;;  %v594_v52 = vadd.f32 %v562_v15, %v5207_v32  ;;  %v6474_v32 = vld [vmem:[#allocation6_spill] sm:$0xff]  ;;  %v5436_v3 = vpop.f32.mrb[0].mxu1 }
 0x179   :  { %v1861_v7 = vsel %vm1825_vm13, %v5243_v1, 0.0  ;;  %v1971_v28 = vsel %vm1939_vm12, 1, %v6444_v48  ;;  %v1453_v51 = vsel %vm1421_vm2, 1, %v6444_v48  ;;  %vm1162_vm3 = vcmp.eq.s32.totalorder %v5362_v21, 4  ;;  %v5451_v17 = vpop.f32.mrb[1].mxu1 }
 0x17a   :  { %v1892_v16 = vadd.f32 %v1860_v46, %v1632_v30  ;;  %v1893_v44 = vadd.f32 %v1861_v7, %v1633_v5  ;;  %vm1306_vm11 = vcmp.eq.s32.totalorder %v5341_v47, 1  ;;  %v854_v15 = vadd.f32 %v822_v53, %v594_v52 }
 0x17b   :  { %v1994_v45 = vpop.permute.xlu1 %1993  ;;  %v5399_v61 = vpop.permute.xlu0 %1479  ;;  %v1082_v58 = vsel %vm1046_vm9, %v5212_v59, 0.0  ;;  %v1712_v62 = vsel %vm1680_vm4, 1, %v6444_v48  ;;  %vm1681_vm13 = vcmp.eq.s32.totalorder %v5261_v54, 6  ;;  %vm1047_vm14 = vcmp.eq.s32.totalorder %v5122_v50, 1 }
 0x17c   :  { %vm2084_vm1 = vcmp.eq.s32.totalorder %v1994_v45, 1  ;;  %1521 = vperm.xlu1 %3760, %v1452_v31   ;;  %1007 = vperm.xlu0 %3759, %v934_v4   ;;  %v6473_v31 = vld [vmem:[#allocation3_spill] sm:$0xff]  ;;  %vm1566_vm0 = vcmp.eq.s32.totalorder %v5399_v61, 1  ;;  %vm1307_vm12 = vcmp.eq.s32.totalorder %v5374_v34, 1  ;;  %v1083_v52 = vsel %vm1047_vm14, %v5212_v59, 0.0 }
 0x17d   :  { %v2120_v10 = vsel %vm2084_vm1, %v5271_v11, 0.0  ;;  %vm529_vm8 = vcmp.eq.s32.totalorder %v6473_v31, 1  ;;  %v6475_v4 = vld [vmem:[#allocation7_spill] sm:$0xff]  ;;  %vm1163_vm1 = vcmp.eq.s32.totalorder %v5388_v35, 4  ;;  %v1602_v47 = vsel %vm1566_vm0, %v5241_v39, 0.0 }
 0x17e   :  { %v3762_v19 = vpop.eup %3761  ;;  %v2152_v33 = vadd.f32 %v2120_v10, %v1892_v16  ;;  %vm787_vm7 = vcmp.eq.s32.totalorder %v6475_v4, 1  ;;  %v6476_v16 = vld [vmem:[#allocation5_spill] sm:$0xff]  ;;  %v1713_v34 = vsel %vm1681_vm13, 1, %v6444_v48  ;;  %v1343_v50 = vsel %vm1307_vm12, %v5220_v29, 0.0 }
 0x17f   :  { %v1997_v20 = vpop.permute.xlu1 %1996  ;;  %v5417_v12 = vpop.permute.xlu0 %1482  ;;  %3602 = vmatprep.mubr.msk.f32.mxu1 %vm2589_vm15, %v3762_v19  ;;  %v823_v10 = vsel %vm787_vm7, %v4918_v60, 0.0  ;;  %v1114_v19 = vadd.f32 %v1082_v58, %v854_v15  ;;  %v1195_v61 = vsel %vm1163_vm1, 1, %v6444_v48  ;;  %v6478_v15 = vld [vmem:[#allocation10_spill] sm:$0xff]  ;;  %vm1941_vm0 = vcmp.eq.s32.totalorder %v5261_v54, 7 }
 0x180   :  { %vm2085_vm10 = vcmp.eq.s32.totalorder %v1997_v20, 1  ;;  %v2356_v27 = vadd.f32 %v6474_v32, %v2152_v33  ;;  %1010 = vperm.xlu1 %3760, %v935_v8   ;;  %2035 = vperm.xlu0 %3759, %v1970_v40   ;;  %v1342_v8 = vsel %vm1306_vm11, %v5220_v29, 0.0  ;;  %v1194_v40 = vsel %vm1162_vm3, 1, %v6444_v48  ;;  %v6477_v33 = vld [vmem:[#allocation4_spill] sm:$0xff] }
 0x181   :  { %v2121_v25 = vsel %vm2085_vm10, %v5271_v11, 0.0  ;;  %vm528_vm4 = vcmp.eq.s32.totalorder %v6477_v33, 1  ;;  %v1374_v32 = vadd.f32 %v1342_v8, %v1114_v19  ;;  %vm1567_vm9 = vcmp.eq.s32.totalorder %v5417_v12, 1 }
 0x182   :  { %v3764_v46 = vpop.eup %3763  ;;  %v2153_v56 = vadd.f32 %v2121_v25, %v1893_v44  ;;  %v2512_v30 = vadd.f32 %v5317_v38, %v2356_v27  ;;  %v855_v44 = vadd.f32 %v823_v10, %v595_v23  ;;  %vm1422_vm10 = vcmp.eq.s32.totalorder %v5362_v21, 5  ;;  %v5487_v23 = vld [vmem:[%s6416_s1 + $0xb0] sm:$0xff]  ;;  %v5514_v10 = vld [vmem:[%s6416_s1 + $0xb8] sm:$0xff] }
 0x183   :  { %v1740_v55 = vpop.permute.xlu1 %1739  ;;  %v5441_v45 = vpop.permute.xlu0 %1225  ;;  %3603 = vmatmul.mubr.msk.f32.vlgmr.msra.gmra.mrb[16].mxu1 %vm2589_vm15, %v3764_v46  ;;  %vm904_vm7 = vcmp.eq.s32.totalorder %v5487_v23, 3  ;;  %v304_v12 = vsel %vm268_vm5, %v4535_v9, 0.0  ;;  %v564_v46 = vsel %vm528_vm4, %v4538_v14, 0.0  ;;  %v1603_v4 = vsel %vm1567_vm9, %v5241_v39, 0.0 }
 0x184   :  { %v2361_v7 = vadd.f32 %v6476_v16, %v2153_v56  ;;  %3765 = vtanh.f32 %v2512_v30  ;;  %2038 = vperm.xlu1 %3760, %v1971_v28   ;;  %1524 = vperm.xlu0 %3759, %v1453_v51   ;;  %vm1826_vm2 = vcmp.eq.s32.totalorder %v1740_v55, 1  ;;  %v1115_v25 = vadd.f32 %v1083_v52, %v855_v44 }
 0x185   :  { %v1862_v27 = vsel %vm1826_vm2, %v5243_v1, 0.0  ;;  %v1634_v28 = vadd.f32 %v1602_v47, %v1374_v32  ;;  %v565_v51 = vsel %vm529_vm8, %v4538_v14, 0.0  ;;  %vm788_vm11 = vcmp.eq.s32.totalorder %v6478_v15, 1  ;;  %v6480_v47 = vld [vmem:[#allocation11_spill] sm:$0xff] }
 0x186   :  { %v2513_v5 = vadd.f32 %v5317_v38, %v2361_v7  ;;  %v1375_v58 = vadd.f32 %v1343_v50, %v1115_v25  ;;  %v1454_v14 = vsel %vm1422_vm10, 1, %v6444_v48  ;;  %v936_v31 = vsel %vm904_vm7, 1, %v6444_v48 }
 0x187   :  { %v1743_v53 = vpop.permute.xlu1 %1742  ;;  %v5472_v20 = vpop.permute.xlu0 %1228  ;;  %v1894_v55 = vadd.f32 %v1862_v27, %v1634_v28  ;;  %vm905_vm5 = vcmp.eq.s32.totalorder %v5514_v10, 3  ;;  %vm1940_vm8 = vcmp.eq.s32.totalorder %v5237_v37, 7  ;;  %v597_v8 = vadd.f32 %v565_v51, %v5285_v57 }
 0x188   :  { %3767 = vtanh.f32 %v2513_v5  ;;  %1781 = vperm.xlu1 %3760, %v1712_v62   ;;  %1267 = vperm.xlu0 %3759, %v1194_v40   ;;  %vm1827_vm3 = vcmp.eq.s32.totalorder %v1743_v53, 1  ;;  %v1635_v16 = vadd.f32 %v1603_v4, %v1375_v58  ;;  %v6479_v40 = vld [vmem:[#allocation9_spill] sm:$0xff]  ;;  %v824_v19 = vsel %vm788_vm11, %v4918_v60, 0.0  ;;  %v6481_v4 = vld [vmem:[#allocation8_spill] sm:$0xff]  ;;  %v5560_v58 = vpop.f32.mrb[2].mxu1 }
 0x189   :  { %v1863_v9 = vsel %vm1827_vm3, %v5243_v1, 0.0  ;;  %vm789_vm14 = vcmp.eq.s32.totalorder %v6479_v40, 1  ;;  %vm1048_vm1 = vcmp.eq.s32.totalorder %v5137_v24, 1  ;;  %v596_v57 = vadd.f32 %v564_v46, %v304_v12 }
 0x18a   :  { %v1895_v52 = vadd.f32 %v1863_v9, %v1635_v16  ;;  %v937_v44 = vsel %vm905_vm5, 1, %v6444_v48  ;;  %v1972_v32 = vsel %vm1940_vm8, 1, %v6444_v48  ;;  %vm1308_vm2 = vcmp.eq.s32.totalorder %v5441_v45, 1  ;;  %v5573_v16 = vpop.f32.mrb[3].mxu1 }
 0x18b   :  { %v2000_v56 = vpop.permute.xlu1 %1999  ;;  %v5500_v30 = vpop.permute.xlu0 %1485  ;;  %vm1423_vm4 = vcmp.eq.s32.totalorder %v5388_v35, 5  ;;  %v825_v25 = vsel %vm789_vm14, %v4918_v60, 0.0  ;;  %v856_v28 = vadd.f32 %v824_v19, %v596_v57  ;;  %v1084_v12 = vsel %vm1048_vm1, %v5212_v59, 0.0 }
 0x18c   :  { %vm2086_vm13 = vcmp.eq.s32.totalorder %v2000_v56, 1  ;;  %1784 = vperm.xlu1 %3760, %v1713_v34   ;;  %1270 = vperm.xlu0 %3759, %v1195_v61   ;;  %v1973_v46 = vsel %vm1941_vm0, 1, %v6444_v48  ;;  %vm1049_vm9 = vcmp.eq.s32.totalorder %v5135_v18, 1  ;;  %vm1568_vm10 = vcmp.eq.s32.totalorder %v5500_v30, 1 }
 0x18d   :  { %v2122_v43 = vsel %vm2086_vm13, %v5271_v11, 0.0  ;;  %v1344_v24 = vsel %vm1308_vm2, %v5220_v29, 0.0  ;;  %v1455_v56 = vsel %vm1423_vm4, 1, %v6444_v48  ;;  %vm1682_vm3 = vcmp.eq.s32.totalorder %v5362_v21, 6 }
 0x18e   :  { %v3766_v62 = vpop.eup %3765  ;;  %v2154_v7 = vadd.f32 %v2122_v43, %v1894_v55  ;;  %vm1164_vm7 = vcmp.eq.s32.totalorder %v5487_v23, 4  ;;  %v1116_v54 = vadd.f32 %v1084_v12, %v856_v28  ;;  %vm1309_vm11 = vcmp.eq.s32.totalorder %v5472_v20, 1 }
 0x18f   :  { %v2003_v5 = vpop.permute.xlu1 %2002  ;;  %v1489_v33 = vpop.permute.xlu0 %1488  ;;  %3605 = vmatprep.mubr.msk.f32.mxu1 %vm2589_vm15, %v3766_v62  ;;  %v857_v55 = vadd.f32 %v825_v25, %v597_v8  ;;  %v1085_v45 = vsel %vm1049_vm9, %v5212_v59, 0.0  ;;  %v1604_v9 = vsel %vm1568_vm10, %v5241_v39, 0.0  ;;  %v1714_v62 = vsel %vm1682_vm3, 1, %v6444_v48 }
 0x190   :  { %vm2087_vm12 = vcmp.eq.s32.totalorder %v2003_v5, 1  ;;  %v2366_v53 = vadd.f32 %v6480_v47, %v2154_v7  ;;  %1527 = vperm.xlu1 %3760, %v1454_v14   ;;  %1013 = vperm.xlu0 %3759, %v936_v31   ;;  %v1376_v31 = vadd.f32 %v1344_v24, %v1116_v54  ;;  %vm1569_vm5 = vcmp.eq.s32.totalorder %v1489_v33, 1  ;;  %v5609_v54 = vld [vmem:[%s6416_s1 + $0xc8] sm:$0xff] }
 0x191   :  { %v2123_v34 = vsel %vm2087_vm12, %v5271_v11, 0.0  ;;  %v1345_v18 = vsel %vm1309_vm11, %v5220_v29, 0.0  ;;  %v1196_v7 = vsel %vm1164_vm7, 1, %v6444_v48  ;;  %vm1683_vm8 = vcmp.eq.s32.totalorder %v5388_v35, 6 }
 0x192   :  { %v3768_v50 = vpop.eup %3767  ;;  %v2155_v27 = vadd.f32 %v2123_v34, %v1895_v52  ;;  %v2514_v61 = vadd.f32 %v5317_v38, %v2366_v53  ;;  %v1117_v8 = vadd.f32 %v1085_v45, %v857_v55  ;;  %v1636_v40 = vadd.f32 %v1604_v9, %v1376_v31 }
 0x193   :  { %v1746_v51 = vpop.permute.xlu1 %1745  ;;  %v5543_v37 = vpop.permute.xlu0 %1231  ;;  %3606 = vmatmul.mubr.msk.f32.gmra.mrb[18].mxu1 %vm2589_vm15, %v3768_v50  ;;  %vm1165_vm0 = vcmp.eq.s32.totalorder %v5514_v10, 4  ;;  %v1605_v19 = vsel %vm1569_vm5, %v5241_v39, 0.0  ;;  %v1715_v57 = vsel %vm1683_vm8, 1, %v6444_v48  ;;  %vm1424_vm12 = vcmp.eq.s32.totalorder %v5487_v23, 5 }
 0x194   :  { %v2371_v60 = vadd.f32 %v6481_v4, %v2155_v27  ;;  %3769 = vtanh.f32 %v2514_v61  ;;  %1016 = vperm.xlu1 %3760, %v937_v44   ;;  %2041 = vperm.xlu0 %3759, %v1972_v32   ;;  %vm1828_vm13 = vcmp.eq.s32.totalorder %v1746_v51, 1  ;;  %v1377_v20 = vadd.f32 %v1345_v18, %v1117_v8  ;;  %v5595_v27 = vld [vmem:[%s6416_s1 + $0xc0] sm:$0xff] }
 0x195   :  { %v1864_v30 = vsel %vm1828_vm13, %v5243_v1, 0.0  ;;  %v1197_v34 = vsel %vm1165_vm0, 1, %v6444_v48  ;;  %vm906_vm2 = vcmp.eq.s32.totalorder %v5595_v27, 3  ;;  %vm907_vm9 = vcmp.eq.s32.totalorder %v5609_v54, 3 }
 0x196   :  { %v2515_v15 = vadd.f32 %v5317_v38, %v2371_v60  ;;  %v1896_v52 = vadd.f32 %v1864_v30, %v1636_v40  ;;  %v1637_v32 = vadd.f32 %v1605_v19, %v1377_v20  ;;  %v938_v4 = vsel %vm906_vm2, 1, %v6444_v48 }
 0x197   :  { %v1749_v43 = vpop.permute.xlu1 %1748  ;;  %v5568_v14 = vpop.permute.xlu0 %1234  ;;  %vm1942_vm10 = vcmp.eq.s32.totalorder %v5362_v21, 7  ;;  %vm1050_vm3 = vcmp.eq.s32.totalorder %v5150_v0, 1  ;;  %v939_v45 = vsel %vm907_vm9, 1, %v6444_v48  ;;  %vm1310_vm7 = vcmp.eq.s32.totalorder %v5543_v37, 1 }
 0x198   :  { %3771 = vtanh.f32 %v2515_v15  ;;  %2044 = vperm.xlu1 %3760, %v1973_v46   ;;  %1530 = vperm.xlu0 %3759, %v1455_v56   ;;  %vm1829_vm14 = vcmp.eq.s32.totalorder %v1749_v43, 1  ;;  %v1456_v46 = vsel %vm1424_vm12, 1, %v6444_v48  ;;  %v1974_v9 = vsel %vm1942_vm10, 1, %v6444_v48 }
 0x199   :  { %v1865_v47 = vsel %vm1829_vm14, %v5243_v1, 0.0  ;;  %vm1943_vm11 = vcmp.eq.s32.totalorder %v5388_v35, 7  ;;  %vm1425_vm13 = vcmp.eq.s32.totalorder %v5514_v10, 5  ;;  %v1086_v43 = vsel %vm1050_vm3, %v5212_v59, 0.0 }
 0x19a   :  { %v1897_v28 = vadd.f32 %v1865_v47, %v1637_v32  ;;  %vm1051_vm5 = vcmp.eq.s32.totalorder %v5148_v49, 1  ;;  %v1975_v37 = vsel %vm1943_vm11, 1, %v6444_v48  ;;  %v1457_v35 = vsel %vm1425_vm13, 1, %v6444_v48 }
 0x19b   :  { %v2006_v5 = vpop.permute.xlu1 %2005  ;;  %v5585_v33 = vpop.permute.xlu0 %1491  ;;  %vm1684_vm14 = vcmp.eq.s32.totalorder %v5487_v23, 6  ;;  %vm1311_vm0 = vcmp.eq.s32.totalorder %v5568_v14, 1  ;;  %vm1166_vm12 = vcmp.eq.s32.totalorder %v5595_v27, 4  ;;  %v1087_v18 = vsel %vm1051_vm5, %v5212_v59, 0.0 }
 0x19c   :  { %vm2088_vm1 = vcmp.eq.s32.totalorder %v2006_v5, 1  ;;  %1787 = vperm.xlu1 %3760, %v1714_v62   ;;  %1273 = vperm.xlu0 %3759, %v1196_v7   ;;  %vm1570_vm8 = vcmp.eq.s32.totalorder %v5585_v33, 1  ;;  %v1118_v62 = vadd.f32 %v1086_v43, %v4928_v6  ;;  %v1716_v6 = vsel %vm1684_vm14, 1, %v6444_v48  ;;  %v5682_v43 = vld [vmem:[%s6416_s1 + $0xd8] sm:$0xff] }
 0x19d   :  { %v2124_v53 = vsel %vm2088_vm1, %v5271_v11, 0.0  ;;  %v1606_v30 = vsel %vm1570_vm8, %v5241_v39, 0.0  ;;  %v1347_v19 = vsel %vm1311_vm0, %v5220_v29, 0.0  ;;  %v1198_v33 = vsel %vm1166_vm12, 1, %v6444_v48 }
 0x19e   :  { %v3770_v44 = vpop.eup %3769  ;;  %v2156_v50 = vadd.f32 %v2124_v53, %v1896_v52  ;;  %v1119_v52 = vadd.f32 %v1087_v18, %v4925_v13  ;;  %vm1167_vm10 = vcmp.eq.s32.totalorder %v5609_v54, 4  ;;  %vm909_vm5 = vcmp.eq.s32.totalorder %v5682_v43, 3 }
 0x19f   :  { %v2009_v61 = vpop.permute.xlu1 %2008  ;;  %v5598_v25 = vpop.permute.xlu0 %1494  ;;  %3608 = vmatprep.mubr.msk.f32.mxu1 %vm2589_vm15, %v3770_v44  ;;  %vm1944_vm8 = vcmp.eq.s32.totalorder %v5487_v23, 7  ;;  %vm1052_vm14 = vcmp.eq.s32.totalorder %v5158_v63, 1  ;;  %vm1427_vm12 = vcmp.eq.s32.totalorder %v5609_v54, 5 }
 0x1a0   :  { %vm2089_vm4 = vcmp.eq.s32.totalorder %v2009_v61, 1  ;;  %v2376_v12 = vadd.f32 %v4963_v36, %v2156_v50  ;;  %1790 = vperm.xlu1 %3760, %v1715_v57   ;;  %1276 = vperm.xlu0 %3759, %v1197_v34   ;;  %v5636_v49 = vpop.f32.mrb[4].mxu1  ;;  %vm1571_vm2 = vcmp.eq.s32.totalorder %v5598_v25, 1  ;;  %v1379_v44 = vadd.f32 %v1347_v19, %v1119_v52 }
 0x1a1   :  { %v2125_v51 = vsel %vm2089_vm4, %v5271_v11, 0.0  ;;  %v5646_v14 = vpop.f32.mrb[5].mxu1  ;;  %vm1685_vm4 = vcmp.eq.s32.totalorder %v5514_v10, 6  ;;  %v1607_v53 = vsel %vm1571_vm2, %v5241_v39, 0.0  ;;  %v1199_v25 = vsel %vm1167_vm10, 1, %v6444_v48 }
 0x1a2   :  { %v3772_v60 = vpop.eup %3771  ;;  %v2157_v24 = vadd.f32 %v2125_v51, %v1897_v28  ;;  %v2516_v56 = vadd.f32 %v5317_v38, %v2376_v12  ;;  %v1717_v61 = vsel %vm1685_vm4, 1, %v6444_v48  ;;  %v1639_v12 = vadd.f32 %v1607_v53, %v1379_v44 }
 0x1a3   :  { %v1752_v36 = vpop.permute.xlu1 %1751  ;;  %v5613_v15 = vpop.permute.xlu0 %1237  ;;  %3609 = vmatmul.mubr.msk.f32.gmra.mrb[20].mxu1 %vm2589_vm15, %v3772_v60  ;;  %v1088_v23 = vsel %vm1052_vm14, %v5212_v59, 0.0 }
 0x1a4   :  { %v2381_v55 = vadd.f32 %v4961_v41, %v2157_v24  ;;  %3773 = vtanh.f32 %v2516_v56  ;;  %1533 = vperm.xlu1 %3760, %v1456_v46   ;;  %1019 = vperm.xlu0 %3759, %v938_v4   ;;  %v1346_v41 = vsel %vm1310_vm7, %v5220_v29, 0.0  ;;  %vm1830_vm1 = vcmp.eq.s32.totalorder %v1752_v36, 1  ;;  %v5668_v46 = vld [vmem:[%s6416_s1 + $0xd0] sm:$0xff] }
 0x1a5   :  { %v1378_v40 = vadd.f32 %v1346_v41, %v1118_v62  ;;  %v1866_v5 = vsel %vm1830_vm1, %v5243_v1, 0.0  ;;  %vm1426_vm7 = vcmp.eq.s32.totalorder %v5595_v27, 5  ;;  %vm908_vm11 = vcmp.eq.s32.totalorder %v5668_v46, 3 }
 0x1a6   :  { %v2517_v21 = vadd.f32 %v5317_v38, %v2381_v55  ;;  %v1458_v55 = vsel %vm1426_vm7, 1, %v6444_v48  ;;  %vm1312_vm0 = vcmp.eq.s32.totalorder %v5613_v15, 1  ;;  %vm1945_vm1 = vcmp.eq.s32.totalorder %v5514_v10, 7 }
 0x1a7   :  { %v1755_v0 = vpop.permute.xlu1 %1754  ;;  %v5625_v31 = vpop.permute.xlu0 %1240  ;;  %v1638_v47 = vadd.f32 %v1606_v30, %v1378_v40  ;;  %v1348_v15 = vsel %vm1312_vm0, %v5220_v29, 0.0  ;;  %v1977_v30 = vsel %vm1945_vm1, 1, %v6444_v48  ;;  %v1459_v10 = vsel %vm1427_vm12, 1, %v6444_v48  ;;  %v6483_v40 = vld [vmem:[#allocation13_spill] sm:$0xff] }
 0x1a8   :  { %3775 = vtanh.f32 %v2517_v21  ;;  %1022 = vperm.xlu1 %3760, %v939_v45   ;;  %2047 = vperm.xlu0 %3759, %v1974_v9   ;;  %vm1831_vm9 = vcmp.eq.s32.totalorder %v1755_v0, 1  ;;  %v940_v45 = vsel %vm908_vm11, 1, %v6444_v48  ;;  %vm1313_vm10 = vcmp.eq.s32.totalorder %v5625_v31, 1 }
 0x1a9   :  { %v1898_v32 = vadd.f32 %v1866_v5, %v1638_v47  ;;  %v1867_v50 = vsel %vm1831_vm9, %v5243_v1, 0.0  ;;  %vm1686_vm9 = vcmp.eq.s32.totalorder %v5595_v27, 6  ;;  %vm1168_vm7 = vcmp.eq.s32.totalorder %v5668_v46, 4 }
 0x1aa   :  { %v1899_v24 = vadd.f32 %v1867_v50, %v1639_v12  ;;  %v1718_v31 = vsel %vm1686_vm9, 1, %v6444_v48  ;;  %v1349_v53 = vsel %vm1313_vm10, %v5220_v29, 0.0  ;;  %v1200_v44 = vsel %vm1168_vm7, 1, %v6444_v48  ;;  %v6484_v50 = vld [vmem:[#allocation12_spill] sm:$0xff] }
 0x1ab   :  { %v5640_v7 = vpop.permute.xlu1 %1497  ;;  %v5642_v8 = vpop.permute.xlu0 %983  ;;  %vm1428_vm0 = vcmp.eq.s32.totalorder %v5668_v46, 5  ;;  %vm1429_vm7 = vcmp.eq.s32.totalorder %v5682_v43, 5 }
 0x1ac   :  { %2050 = vperm.xlu1 %3760, %v1975_v37   ;;  %1536 = vperm.xlu0 %3759, %v1457_v35   ;;  %v941_v37 = vsel %vm909_vm5, 1, %v6444_v48  ;;  %v1976_v35 = vsel %vm1944_vm8, 1, %v6444_v48  ;;  %vm1572_vm4 = vcmp.eq.s32.totalorder %v5640_v7, 1  ;;  %vm1169_vm8 = vcmp.eq.s32.totalorder %v5682_v43, 4 }
 0x1ad   :  { %v1608_v5 = vsel %vm1572_vm4, %v5241_v39, 0.0  ;;  %vm1946_vm4 = vcmp.eq.s32.totalorder %v5595_v27, 7  ;;  %vm1054_vm9 = vcmp.eq.s32.totalorder %v5642_v8, 1 }
 0x1ae   :  { %v3774_v20 = vpop.eup %3773  ;;  %v1090_v8 = vsel %vm1054_vm9, %v5212_v59, 0.0 }
 0x1af   :  { %v5655_v57 = vpop.permute.xlu1 %986  ;;  %v2012_v34 = vpop.permute.xlu0 %2011  ;;  %3611 = vmatprep.mubr.msk.f32.mxu1 %vm2589_vm15, %v3774_v20 }
 0x1b0   :  { %vm2090_vm3 = vcmp.eq.s32.totalorder %v2012_v34, 1  ;;  %1793 = vperm.xlu1 %3760, %v1716_v6   ;;  %1279 = vperm.xlu0 %3759, %v1198_v33   ;;  %v1120_v6 = vadd.f32 %v1088_v23, %v6483_v40 }
 0x1b1   :  { %v2126_v13 = vsel %vm2090_vm3, %v5271_v11, 0.0 }
 0x1b2   :  { %v3776_v28 = vpop.eup %3775  ;;  %v2158_v51 = vadd.f32 %v2126_v13, %v1898_v32  ;;  %v1380_v52 = vadd.f32 %v1348_v15, %v1120_v6 }
 0x1b3   :  { %v2015_v4 = vpop.permute.xlu1 %2014  ;;  %v5671_v60 = vpop.permute.xlu0 %1500  ;;  %3612 = vmatmul.mubr.msk.f32.gmra.mrb[22].mxu1 %vm2589_vm15, %v3776_v28 }
 0x1b4   :  { %vm2091_vm13 = vcmp.eq.s32.totalorder %v2015_v4, 1  ;;  %v2386_v56 = vadd.f32 %v5042_v2, %v2158_v51  ;;  %1796 = vperm.xlu1 %3760, %v1717_v61   ;;  %1282 = vperm.xlu0 %3759, %v1199_v25   ;;  %vm1573_vm11 = vcmp.eq.s32.totalorder %v5671_v60, 1  ;;  %v1640_v61 = vadd.f32 %v1608_v5, %v1380_v52 }
 0x1b5   :  { %v2127_v36 = vsel %vm2091_vm13, %v5271_v11, 0.0  ;;  %vm1687_vm13 = vcmp.eq.s32.totalorder %v5609_v54, 6  ;;  %v1609_v25 = vsel %vm1573_vm11, %v5241_v39, 0.0  ;;  %vm1055_vm11 = vcmp.eq.s32.totalorder %v5655_v57, 1 }
 0x1b6   :  { %v2159_v9 = vadd.f32 %v2127_v36, %v1899_v24  ;;  %v2518_v21 = vadd.f32 %v5317_v38, %v2386_v56  ;;  %v1719_v56 = vsel %vm1687_vm13, 1, %v6444_v48  ;;  %v1201_v36 = vsel %vm1169_vm8, 1, %v6444_v48 }
 0x1b7   :  { %v1758_v2 = vpop.permute.xlu1 %1757  ;;  %v5686_v0 = vpop.permute.xlu0 %1243 }
 0x1b8   :  { %v2391_v41 = vadd.f32 %v5040_v22, %v2159_v9  ;;  %3777 = vtanh.f32 %v2518_v21  ;;  %1539 = vperm.xlu1 %3760, %v1458_v55   ;;  %1025 = vperm.xlu0 %3759, %v940_v45   ;;  %v6482_v22 = vld [vmem:[#allocation36_spill] sm:$0xff]  ;;  %vm1832_vm3 = vcmp.eq.s32.totalorder %v1758_v2, 1  ;;  %v5740_v21 = vld [vmem:[%s6416_s1 + $0xe0] sm:$0xff]  ;;  %vm1314_vm10 = vcmp.eq.s32.totalorder %v5686_v0, 1 }
 0x1b9   :  { %vm1053_vm2 = vcmp.eq.s32.totalorder %v6482_v22, 1  ;;  %v1868_v34 = vsel %vm1832_vm3, %v5243_v1, 0.0  ;;  %vm910_vm1 = vcmp.eq.s32.totalorder %v5740_v21, 3  ;;  %vm1947_vm3 = vcmp.eq.s32.totalorder %v5609_v54, 7 }
 0x1ba   :  { %v2519_v62 = vadd.f32 %v5317_v38, %v2391_v41  ;;  %v1089_v7 = vsel %vm1053_vm2, %v5212_v59, 0.0  ;;  %v1900_v4 = vadd.f32 %v1868_v34, %v1640_v61  ;;  %v942_v22 = vsel %vm910_vm1, 1, %v6444_v48 }
 0x1bb   :  { %v1761_v63 = vpop.permute.xlu1 %1760  ;;  %v5697_v18 = vpop.permute.xlu0 %1246  ;;  %v1121_v13 = vadd.f32 %v1089_v7, %v6484_v50  ;;  %v6486_v7 = vld [vmem:[#allocation34_spill] sm:$0xff]  ;;  %v1979_v54 = vsel %vm1947_vm3, 1, %v6444_v48 }
 0x1bc   :  { %3779 = vtanh.f32 %v2519_v62  ;;  %1028 = vperm.xlu1 %3760, %v941_v37   ;;  %2053 = vperm.xlu0 %3759, %v1976_v35   ;;  %v5708_v19 = vpop.f32.mrb[6].mxu1  ;;  %vm1833_vm5 = vcmp.eq.s32.totalorder %v1761_v63, 1  ;;  %v6485_v35 = vld [vmem:[#allocation35_spill] sm:$0xff]  ;;  %v1460_v63 = vsel %vm1428_vm0, 1, %v6444_v48  ;;  %vm1315_vm8 = vcmp.eq.s32.totalorder %v5697_v18, 1 }
 0x1bd   :  { %v5718_v47 = vpop.f32.mrb[7].mxu1  ;;  %v1381_v51 = vadd.f32 %v1349_v53, %v1121_v13  ;;  %v1869_v60 = vsel %vm1833_vm5, %v5243_v1, 0.0  ;;  %vm1688_vm5 = vcmp.eq.s32.totalorder %v5668_v46, 6  ;;  %v6487_v13 = vld [vmem:[#allocation15_spill] sm:$0xff]  ;;  %vm1170_vm0 = vcmp.eq.s32.totalorder %v5740_v21, 4 }
 0x1be   :  { %v1122_v61 = vadd.f32 %v1090_v8, %v6487_v13  ;;  %v1720_v57 = vsel %vm1688_vm5, 1, %v6444_v48 }
 0x1bf   :  { %v5712_v33 = vpop.permute.xlu1 %1503  ;;  %v5714_v20 = vpop.permute.xlu0 %989  ;;  %v1641_v45 = vadd.f32 %v1609_v25, %v1381_v51 }
 0x1c0   :  { %2056 = vperm.xlu1 %3760, %v1977_v30   ;;  %1542 = vperm.xlu0 %3759, %v1459_v10   ;;  %v5754_v10 = vld [vmem:[%s6416_s1 + $0xe8] sm:$0xff]  ;;  %vm1574_vm13 = vcmp.eq.s32.totalorder %v5712_v33, 1  ;;  %vm1056_vm5 = vcmp.eq.s32.totalorder %v5714_v20, 1 }
 0x1c1   :  { %v1901_v37 = vadd.f32 %v1869_v60, %v1641_v45  ;;  %vm911_vm2 = vcmp.eq.s32.totalorder %v5754_v10, 3  ;;  %v1610_v51 = vsel %vm1574_vm13, %v5241_v39, 0.0  ;;  %v1351_v45 = vsel %vm1315_vm8, %v5220_v29, 0.0 }
 0x1c2   :  { %v3778_v32 = vpop.eup %3777  ;;  %v943_v52 = vsel %vm911_vm2, 1, %v6444_v48  ;;  %vm1948_vm13 = vcmp.eq.s32.totalorder %v5668_v46, 7 }
 0x1c3   :  { %v5727_v28 = vpop.permute.xlu1 %992  ;;  %v2018_v12 = vpop.permute.xlu0 %2017  ;;  %3614 = vmatprep.mubr.msk.f32.mxu1 %vm2589_vm15, %v3778_v32  ;;  %v1461_v32 = vsel %vm1429_vm7, 1, %v6444_v48 }
 0x1c4   :  { %vm2092_vm14 = vcmp.eq.s32.totalorder %v2018_v12, 1  ;;  %1799 = vperm.xlu1 %3760, %v1718_v31   ;;  %1285 = vperm.xlu0 %3759, %v1200_v44   ;;  %v1978_v31 = vsel %vm1946_vm4, 1, %v6444_v48  ;;  %v5768_v27 = vpop.f32.mrb[8].mxu1  ;;  %v1091_v12 = vsel %vm1055_vm11, %v5212_v59, 0.0  ;;  %vm1171_vm4 = vcmp.eq.s32.totalorder %v5754_v10, 4 }
 0x1c5   :  { %v2128_v24 = vsel %vm2092_vm14, %v5271_v11, 0.0  ;;  %v5775_v0 = vpop.f32.mrb[9].mxu1 }
 0x1c6   :  { %v3780_v55 = vpop.eup %3779  ;;  %v2160_v9 = vadd.f32 %v2128_v24, %v1900_v4  ;;  %v2943_v24 = vld [vmem:[%s6422_s7] sm:$0xff] }
 0x1c7   :  { %v2021_v2 = vpop.permute.xlu1 %2020  ;;  %v5743_v41 = vpop.permute.xlu0 %1506  ;;  %3615 = vmatmul.mubr.msk.f32.gmra.mrb[24].mxu1 %vm2589_vm15, %v3780_v55 }
 0x1c8   :  { %vm2093_vm12 = vcmp.eq.s32.totalorder %v2021_v2, 1  ;;  %v2396_v62 = vadd.f32 %v6485_v35, %v2160_v9  ;;  %1802 = vperm.xlu1 %3760, %v1719_v56   ;;  %1288 = vperm.xlu0 %3759, %v1201_v36   ;;  %v5781_v50 = vpop.f32.mrb[10].mxu1  ;;  %v2944_v56 = vld [vmem:[%s6422_s7 + $0x8] sm:$0xff]  ;;  %vm1575_vm1 = vcmp.eq.s32.totalorder %v5743_v41, 1  ;;  %v1202_v2 = vsel %vm1170_vm0, 1, %v6444_v48  ;;  %v2945_v41 = vld [vmem:[%s6422_s7 + $0x10] sm:$0xff] }
 0x1c9   :  { %v2129_v23 = vsel %vm2093_vm12, %v5271_v11, 0.0  ;;  %v5786_v25 = vpop.f32.mrb[11].mxu1  ;;  %v3738_v55 = vpack.c.bf16 %v2944_v56, %v2943_v24  ;;  %vm1689_vm12 = vcmp.eq.s32.totalorder %v5682_v43, 6  ;;  %v6489_v56 = vld [vmem:[#allocation38_spill] sm:$0xff]  ;;  %vm1431_vm0 = vcmp.eq.s32.totalorder %v5754_v10, 5 }
 0x1ca   :  { %v2161_v15 = vadd.f32 %v2129_v23, %v1901_v37  ;;  %v2520_v30 = vadd.f32 %v5317_v38, %v2396_v62  ;;  %v6488_v62 = vld [vmem:[#allocation14_spill] sm:$0xff] }
 0x1cb   :  { %v1764_v40 = vpop.permute.xlu1 %1763  ;;  %v5758_v6 = vpop.permute.xlu0 %1249  ;;  %v1123_v23 = vadd.f32 %v1091_v12, %v6488_v62  ;;  %3739 = vmatprep.subr.bf16.mxu0 %v3738_v55  ;;  %v5852_v12 = vld [vmem:[%s6416_s1 + $0xf0] sm:$0xff] }
 0x1cc   :  { %v2401_v5 = vadd.f32 %v6486_v7, %v2161_v15  ;;  %3781 = vtanh.f32 %v2520_v30  ;;  %1545 = vperm.xlu1 %3760, %v1460_v63   ;;  %1031 = vperm.xlu0 %3759, %v942_v22   ;;  %vm1834_vm14 = vcmp.eq.s32.totalorder %v1764_v40, 1  ;;  %v5808_v33 = vpop.f32.mrb[12].mxu1  ;;  %v1611_v22 = vsel %vm1575_vm1, %v5241_v39, 0.0 }
 0x1cd   :  { %v1870_v9 = vsel %vm1834_vm14, %v5243_v1, 0.0  ;;  %v5819_v37 = vpop.f32.mrb[13].mxu1  ;;  %3741 = vmatpush3.bf16.msra.mxu0 %v3738_v55  ;;  %v1383_v40 = vadd.f32 %v1351_v45, %v1123_v23  ;;  %vm912_vm3 = vcmp.eq.s32.totalorder %v5852_v12, 3  ;;  %v2948_v55 = vld [vmem:[%s6422_s7 + $0x28] sm:$0xff]  ;;  %v5871_v23 = vld [vmem:[%s6421_s4] ss:$0 sm:$0xff] }
 0x1ce   :  { %v2521_v53 = vadd.f32 %v5317_v38, %v2401_v5  ;;  %v1350_v38 = vsel %vm1314_vm10, %v5220_v29, 0.0  ;;  %v1721_v5 = vsel %vm1689_vm12, 1, %v6444_v48  ;;  %vm1430_vm10 = vcmp.eq.s32.totalorder %v5740_v21, 5 }
 0x1cf   :  { %v1767_v34 = vpop.permute.xlu1 %1766  ;;  %v5771_v44 = vpop.permute.xlu0 %1252  ;;  %v1382_v36 = vadd.f32 %v1350_v38, %v1122_v61  ;;  %v1203_v38 = vsel %vm1171_vm4, 1, %v6444_v48  ;;  %v1643_v13 = vadd.f32 %v1611_v22, %v1383_v40  ;;  %v5877_v22 = vld [vmem:[%s6416_s1 + $0xf8] sm:$0xff]  ;;  %vm1316_vm8 = vcmp.eq.s32.totalorder %v5758_v6, 1 }
 0x1d0   :  { %3783 = vtanh.f32 %v2521_v53  ;;  %1034 = vperm.xlu1 %3760, %v943_v52   ;;  %2059 = vperm.xlu0 %3759, %v1978_v31   ;;  %vm1835_vm2 = vcmp.eq.s32.totalorder %v1767_v34, 1  ;;  %v5823_v18 = vpop.f32.mrb[14].mxu1  ;;  %v2946_v31 = vld [vmem:[%s6422_s7 + $0x18] sm:$0xff]  ;;  %vm913_vm11 = vcmp.eq.s32.totalorder %v5877_v22, 3  ;;  %vm1949_vm14 = vcmp.eq.s32.totalorder %v5682_v43, 7 }
 0x1d1   :  { %v1642_v63 = vadd.f32 %v1610_v51, %v1382_v36  ;;  %v5834_v52 = vpop.f32.mrb[15].mxu1  ;;  %v1871_v53 = vsel %vm1835_vm2, %v5243_v1, 0.0  ;;  %v945_v46 = vsel %vm913_vm11, 1, %v6444_v48  ;;  %vm1057_vm1 = vcmp.eq.s32.totalorder %v5727_v28, 1 }
 0x1d2   :  { %v1903_v24 = vadd.f32 %v1871_v53, %v1643_v13  ;;  %v1980_v53 = vsel %vm1948_vm13, 1, %v6444_v48  ;;  %v1352_v6 = vsel %vm1316_vm8, %v5220_v29, 0.0  ;;  %v1981_v13 = vsel %vm1949_vm14, 1, %v6444_v48 }
 0x1d3   :  { %v5794_v4 = vpop.permute.xlu1 %1509  ;;  %v5796_v60 = vpop.permute.xlu0 %995  ;;  %v1902_v7 = vadd.f32 %v1870_v9, %v1642_v63  ;;  %v1462_v9 = vsel %vm1430_vm10, 1, %v6444_v48  ;;  %v1463_v43 = vsel %vm1431_vm0, 1, %v6444_v48  ;;  %vm1690_vm2 = vcmp.eq.s32.totalorder %v5740_v21, 6 }
 0x1d4   :  { %2062 = vperm.xlu1 %3760, %v1979_v54   ;;  %1548 = vperm.xlu0 %3759, %v1461_v32   ;;  %v3742_v54 = vpack.c.bf16 %v2946_v31, %v2945_v41  ;;  %v2949_v41 = vld [vmem:[%s6422_s7 + $0x30] sm:$0xff]  ;;  %v2950_v31 = vld [vmem:[%s6422_s7 + $0x38] sm:$0xff]  ;;  %vm1576_vm12 = vcmp.eq.s32.totalorder %v5794_v4, 1  ;;  %vm1317_vm4 = vcmp.eq.s32.totalorder %v5771_v44, 1  ;;  %vm1172_vm10 = vcmp.eq.s32.totalorder %v5852_v12, 4 }
 0x1d5   :  { %v1093_v28 = vsel %vm1057_vm1, %v5212_v59, 0.0  ;;  %v1612_v4 = vsel %vm1576_vm12, %v5241_v39, 0.0  ;;  %v1353_v44 = vsel %vm1317_vm4, %v5220_v29, 0.0  ;;  %vm1173_vm13 = vcmp.eq.s32.totalorder %v5877_v22, 4 }
 0x1d6   :  { %v3782_v35 = vpop.eup %3781  ;;  %3743 = vmatprep.subr.bf16.mxu0 %v3742_v54  ;;  %vm1950_vm8 = vcmp.eq.s32.totalorder %v5740_v21, 7  ;;  %vm1432_vm14 = vcmp.eq.s32.totalorder %v5852_v12, 5  ;;  %vm1951_vm1 = vcmp.eq.s32.totalorder %v5754_v10, 7  ;;  %vm1433_vm12 = vcmp.eq.s32.totalorder %v5877_v22, 5 }
 0x1d7   :  { %v5828_v15 = vpop.permute.xlu1 %998  ;;  %v2024_v30 = vpop.permute.xlu0 %2023  ;;  %3617 = vmatprep.mubr.msk.f32.mxu1 %vm2589_vm15, %v3782_v35  ;;  %3745 = vmatpush3.bf16.msra.mxu0 %v3742_v54 }
 0x1d8   :  { %vm2094_vm9 = vcmp.eq.s32.totalorder %v2024_v30, 1  ;;  %1805 = vperm.xlu1 %3760, %v1720_v57   ;;  %1291 = vperm.xlu0 %3759, %v1202_v2   ;;  %v2947_v57 = vld [vmem:[%s6422_s7 + $0x20] sm:$0xff]  ;;  %v944_v2 = vsel %vm912_vm3, 1, %v6444_v48 }
 0x1d9   :  { %v2130_v8 = vsel %vm2094_vm9, %v5271_v11, 0.0  ;;  %v3746_v35 = vpack.c.bf16 %v2948_v55, %v2947_v57  ;;  %v1722_v57 = vsel %vm1690_vm2, 1, %v6444_v48  ;;  %vm1058_vm2 = vcmp.eq.s32.totalorder %v5796_v60, 1 }
 0x1da   :  { %v3784_v32 = vpop.eup %3783  ;;  %v2162_v61 = vadd.f32 %v2130_v8, %v1902_v7  ;;  %v6490_v7 = vld [vmem:[#allocation37_spill] sm:$0xff]  ;;  %v3750_v8 = vpack.c.bf16 %v2950_v31, %v2949_v41 }
 0x1db   :  { %v2027_v34 = vpop.permute.xlu1 %2026  ;;  %v5855_v51 = vpop.permute.xlu0 %1512  ;;  %3618 = vmatmul.mubr.msk.f32.gmra.mrb[26].mxu1 %vm2589_vm15, %v3784_v32  ;;  %3747 = vmatprep.subr.bf16.mxu0 %v3746_v35 }
 0x1dc   :  { %vm2095_vm7 = vcmp.eq.s32.totalorder %v2027_v34, 1  ;;  %v2406_v36 = vadd.f32 %v6489_v56, %v2162_v61  ;;  %1808 = vperm.xlu1 %3760, %v1721_v5   ;;  %1294 = vperm.xlu0 %3759, %v1203_v38   ;;  %v1092_v38 = vsel %vm1056_vm5, %v5212_v59, 0.0  ;;  %v6491_v61 = vld [vmem:[#allocation17_spill] sm:$0xff]  ;;  %vm1577_vm3 = vcmp.eq.s32.totalorder %v5855_v51, 1 }
 0x1dd   :  { %v2131_v45 = vsel %vm2095_vm7, %v5271_v11, 0.0  ;;  %3749 = vmatpush3.bf16.msra.mxu0 %v3746_v35  ;;  %v1124_v34 = vadd.f32 %v1092_v38, %v6491_v61  ;;  %vm1691_vm7 = vcmp.eq.s32.totalorder %v5754_v10, 6  ;;  %v1613_v51 = vsel %vm1577_vm3, %v5241_v39, 0.0 }
 0x1de   :  { %v2163_v62 = vadd.f32 %v2131_v45, %v1903_v24  ;;  %v2522_v63 = vadd.f32 %v5871_v23, %v2406_v36  ;;  %3751 = vmatprep.subr.bf16.mxu0 %v3750_v8  ;;  %v1204_v45 = vsel %vm1172_vm10, 1, %v6444_v48  ;;  %vm1692_vm10 = vcmp.eq.s32.totalorder %v5852_v12, 6 }
 0x1df   :  { %v1770_v30 = vpop.permute.xlu1 %1769  ;;  %v5881_v40 = vpop.permute.xlu0 %1255  ;;  %v1384_v36 = vadd.f32 %v1352_v6, %v1124_v34  ;;  %v1982_v34 = vsel %vm1950_vm8, 1, %v6444_v48  ;;  %vm1059_vm3 = vcmp.eq.s32.totalorder %v5828_v15, 1  ;;  %vm1952_vm8 = vcmp.eq.s32.totalorder %v5852_v12, 7 }
 0x1e0   :  { %v2411_v5 = vadd.f32 %v6490_v7, %v2163_v62  ;;  %3785 = vtanh.f32 %v2522_v63  ;;  %1551 = vperm.xlu1 %3760, %v1462_v9   ;;  %1037 = vperm.xlu0 %3759, %v944_v2   ;;  %vm1836_vm9 = vcmp.eq.s32.totalorder %v1770_v30, 1  ;;  %v6492_v2 = vld [vmem:[#allocation16_spill] sm:$0xff]  ;;  %vm1318_vm4 = vcmp.eq.s32.totalorder %v5881_v40, 1 }
 0x1e1   :  { %3753 = vmatpush3.bf16.msra.mxu0 %v3750_v8  ;;  %v1872_v55 = vsel %vm1836_vm9, %v5243_v1, 0.0  ;;  %v1125_v35 = vadd.f32 %v1093_v28, %v6492_v2  ;;  %v1644_v62 = vadd.f32 %v1612_v4, %v1384_v36  ;;  %v1464_v28 = vsel %vm1432_vm14, 1, %v6444_v48 }
 0x1e2   :  { %v2523_v20 = vadd.f32 %v5871_v23, %v2411_v5  ;;  %vm1693_vm9 = vcmp.eq.s32.totalorder %v5877_v22, 6  ;;  %v1724_v2 = vsel %vm1692_vm10, 1, %v6444_v48  ;;  %v1095_v15 = vsel %vm1059_vm3, %v5212_v59, 0.0 }
 0x1e3   :  { %v1773_v54 = vpop.permute.xlu1 %1772  ;;  %v5898_v32 = vpop.permute.xlu0 %1258  ;;  %v1385_v7 = vadd.f32 %v1353_v44, %v1125_v35  ;;  %v1904_v5 = vadd.f32 %v1872_v55, %v1644_v62  ;;  %v1983_v44 = vsel %vm1951_vm1, 1, %v6444_v48  ;;  %v1465_v55 = vsel %vm1433_vm12, 1, %v6444_v48  ;;  %v6493_v35 = vld [vmem:[#allocation19_spill] sm:$0xff] }
 0x1e4   :  { %3787 = vtanh.f32 %v2523_v20  ;;  %1040 = vperm.xlu1 %3760, %v945_v46   ;;  %2065 = vperm.xlu0 %3759, %v1980_v53   ;;  %vm1837_vm11 = vcmp.eq.s32.totalorder %v1773_v54, 1  ;;  %v1723_v46 = vsel %vm1691_vm7, 1, %v6444_v48  ;;  %v1205_v53 = vsel %vm1173_vm13, 1, %v6444_v48 }
 0x1e5   :  { %v1873_v41 = vsel %vm1837_vm11, %v5243_v1, 0.0  ;;  %v1645_v20 = vadd.f32 %v1613_v51, %v1385_v7  ;;  %v1725_v40 = vsel %vm1693_vm9, 1, %v6444_v48  ;;  %vm1953_vm11 = vcmp.eq.s32.totalorder %v5877_v22, 7 }
 0x1e6   :  { %vm1319_vm13 = vcmp.eq.s32.totalorder %v5898_v32, 1  ;;  %v1985_v32 = vsel %vm1953_vm11, 1, %v6444_v48 }
 0x1e7   :  { %v5911_v24 = vpop.permute.xlu1 %1515  ;;  %v5913_v56 = vpop.permute.xlu0 %1001  ;;  %v1355_v22 = vsel %vm1319_vm13, %v5220_v29, 0.0 }
 0x1e8   :  { %2068 = vperm.xlu1 %3760, %v1981_v13   ;;  %1554 = vperm.xlu0 %3759, %v1463_v43   ;;  %v1905_v13 = vadd.f32 %v1873_v41, %v1645_v20  ;;  %vm1578_vm7 = vcmp.eq.s32.totalorder %v5911_v24, 1  ;;  %v1984_v41 = vsel %vm1952_vm8, 1, %v6444_v48 }
 0x1e9   :  { %v1614_v24 = vsel %vm1578_vm7, %v5241_v39, 0.0 }
 0x1ea   :  { %v3786_v9 = vpop.eup %3785 }
 0x1eb   :  { %v5924_v63 = vpop.permute.xlu1 %1004  ;;  %v2030_v30 = vpop.permute.xlu0 %2029  ;;  %3620 = vmatprep.mubr.msk.f32.mxu1 %vm2589_vm15, %v3786_v9 }
 0x1ec   :  { %vm2096_vm5 = vcmp.eq.s32.totalorder %v2030_v30, 1  ;;  %1811 = vperm.xlu1 %3760, %v1722_v57   ;;  %1297 = vperm.xlu0 %3759, %v1204_v45   ;;  %v1094_v45 = vsel %vm1058_vm2, %v5212_v59, 0.0  ;;  %vm1060_vm2 = vcmp.eq.s32.totalorder %v5913_v56, 1  ;;  %vm1061_vm9 = vcmp.eq.s32.totalorder %v5924_v63, 1 }
 0x1ed   :  { %v2132_v31 = vsel %vm2096_vm5, %v5271_v11, 0.0  ;;  %v1126_v62 = vadd.f32 %v1094_v45, %v6493_v35 }
 0x1ee   :  { %v3788_v8 = vpop.eup %3787  ;;  %v2164_v38 = vadd.f32 %v2132_v31, %v1904_v5  ;;  %v6494_v31 = vld [vmem:[#allocation18_spill] sm:$0xff] }
 0x1ef   :  { %v2033_v54 = vpop.permute.xlu1 %2032  ;;  %v1519_v6 = vpop.permute.xlu0 %1518  ;;  %3621 = vmatmul.mubr.msk.f32.gmra.mrb[28].mxu1 %vm2589_vm15, %v3788_v8 }
 0x1f0   :  { %vm2097_vm0 = vcmp.eq.s32.totalorder %v2033_v54, 1  ;;  %v2416_v43 = vadd.f32 %v5325_v26, %v2164_v38  ;;  %1814 = vperm.xlu1 %3760, %v1723_v46   ;;  %1300 = vperm.xlu0 %3759, %v1205_v53   ;;  %vm1579_vm14 = vcmp.eq.s32.totalorder %v1519_v6, 1  ;;  %v1127_v46 = vadd.f32 %v1095_v15, %v6494_v31 }
 0x1f1   :  { %v2133_v61 = vsel %vm2097_vm0, %v5271_v11, 0.0  ;;  %v1615_v8 = vsel %vm1579_vm14, %v5241_v39, 0.0 }
 0x1f2   :  { %v2165_v4 = vadd.f32 %v2133_v61, %v1905_v13  ;;  %v2524_v21 = vadd.f32 %v5871_v23, %v2416_v43  ;;  %v1387_v54 = vadd.f32 %v1355_v22, %v1127_v46 }
 0x1f3   :  { %v1776_v36 = vpop.permute.xlu1 %1775  ;;  %v5943_v57 = vpop.permute.xlu0 %1261 }
 0x1f4   :  { %v2421_v26 = vadd.f32 %v5307_v42, %v2165_v4  ;;  %3789 = vtanh.f32 %v2524_v21  ;;  %2071 = vperm.xlu1 %3760, %v1982_v34   ;;  %1557 = vperm.xlu0 %3759, %v1464_v28   ;;  %v1354_v42 = vsel %vm1318_vm4, %v5220_v29, 0.0  ;;  %vm1838_vm5 = vcmp.eq.s32.totalorder %v1776_v36, 1 }
 0x1f5   :  { %v1386_v7 = vadd.f32 %v1354_v42, %v1126_v62  ;;  %v1874_v5 = vsel %vm1838_vm5, %v5243_v1, 0.0  ;;  %v1647_v61 = vadd.f32 %v1615_v8, %v1387_v54  ;;  %vm1320_vm4 = vcmp.eq.s32.totalorder %v5943_v57, 1  ;;  %v6495_v62 = vld [vmem:[#allocation21_spill] sm:$0xff] }
 0x1f6   :  { %v2525_v10 = vadd.f32 %v5871_v23, %v2421_v26  ;;  %v1356_v35 = vsel %vm1320_vm4, %v5220_v29, 0.0 }
 0x1f7   :  { %v1779_v60 = vpop.permute.xlu1 %1778  ;;  %v5954_v9 = vpop.permute.xlu0 %1264  ;;  %v1646_v53 = vadd.f32 %v1614_v24, %v1386_v7 }
 0x1f8   :  { %3791 = vtanh.f32 %v2525_v10  ;;  %2074 = vperm.xlu1 %3760, %v1983_v44   ;;  %1560 = vperm.xlu0 %3759, %v1465_v55   ;;  %vm1839_vm0 = vcmp.eq.s32.totalorder %v1779_v60, 1  ;;  %vm1321_vm3 = vcmp.eq.s32.totalorder %v5954_v9, 1 }
 0x1f9   :  { %v1906_v6 = vadd.f32 %v1874_v5, %v1646_v53  ;;  %v1875_v13 = vsel %vm1839_vm0, %v5243_v1, 0.0  ;;  %v1357_v63 = vsel %vm1321_vm3, %v5220_v29, 0.0  ;;  %v6496_v5 = vld [vmem:[#allocation20_spill] sm:$0xff] }
 0x1fa   :  { %v1907_v21 = vadd.f32 %v1875_v13, %v1647_v61 }
 0x1fb   :  { %v1522_v51 = vpop.permute.xlu1 %1521  ;;  %v5967_v30 = vpop.permute.xlu0 %1007 }
 0x1fc   :  { %1820 = vperm.xlu1 %3760, %v1725_v40   ;;  %1817 = vperm.xlu0 %3759, %v1724_v2   ;;  %v1096_v40 = vsel %vm1060_vm2, %v5212_v59, 0.0  ;;  %vm1580_vm10 = vcmp.eq.s32.totalorder %v1522_v51, 1  ;;  %vm1062_vm14 = vcmp.eq.s32.totalorder %v5967_v30, 1 }
 0x1fd   :  { %v1128_v56 = vadd.f32 %v1096_v40, %v6495_v62  ;;  %v1616_v57 = vsel %vm1580_vm10, %v5241_v39, 0.0  ;;  %v6497_v40 = vld [vmem:[#allocation23_spill] sm:$0xff] }
 0x1fe   :  { %v3790_v12 = vpop.eup %3789 }
 0x1ff   :  { %v5975_v20 = vpop.permute.xlu1 %1010  ;;  %v2036_v38 = vpop.permute.xlu0 %2035  ;;  %3623 = vmatprep.mubr.msk.f32.mxu1 %vm2589_vm15, %v3790_v12  ;;  %v1388_v7 = vadd.f32 %v1356_v35, %v1128_v56 }
 0x200   :  { %vm2098_vm1 = vcmp.eq.s32.totalorder %v2036_v38, 1  ;;  %2080 = vperm.xlu1 %3760, %v1985_v32   ;;  %2077 = vperm.xlu0 %3759, %v1984_v41  }
 0x201   :  { %v2134_v48 = vsel %vm2098_vm1, %v5271_v11, 0.0  ;;  %v1648_v41 = vadd.f32 %v1616_v57, %v1388_v7  ;;  %vm1063_vm1 = vcmp.eq.s32.totalorder %v5975_v20, 1  ;;  %v6498_v57 = vld [vmem:[#allocation22_spill] sm:$0xff] }
 0x202   :  { %v3792_v43 = vpop.eup %3791  ;;  %v2166_v34 = vadd.f32 %v2134_v48, %v1906_v6 }
 0x203   :  { %v2039_v28 = vpop.permute.xlu1 %2038  ;;  %v1525_v4 = vpop.permute.xlu0 %1524  ;;  %3624 = vmatmul.mubr.msk.f32.gmra.mrb[30].mxu1 %vm2589_vm15, %v3792_v43 }
 0x204   :  { %vm2099_vm12 = vcmp.eq.s32.totalorder %v2039_v28, 1  ;;  %v2426_v36 = vadd.f32 %v5451_v17, %v2166_v34  ;;  %vm1581_vm11 = vcmp.eq.s32.totalorder %v1525_v4, 1 }
 0x205   :  { %v2135_v26 = vsel %vm2099_vm12, %v5271_v11, 0.0  ;;  %v1617_v9 = vsel %vm1581_vm11, %v5241_v39, 0.0 }
 0x206   :  { %v2167_v44 = vadd.f32 %v2135_v26, %v1907_v21  ;;  %v2526_v55 = vadd.f32 %v5871_v23, %v2426_v36 }
 0x207   :  { %v1782_v10 = vpop.permute.xlu1 %1781  ;;  %v5984_v45 = vpop.permute.xlu0 %1267 }
 0x208   :  { %v2431_v60 = vadd.f32 %v5436_v3, %v2167_v44  ;;  %3793 = vtanh.f32 %v2526_v55  ;;  %vm1840_vm7 = vcmp.eq.s32.totalorder %v1782_v10, 1  ;;  %v1097_v3 = vsel %vm1061_vm9, %v5212_v59, 0.0 }
 0x209   :  { %v1876_v51 = vsel %vm1840_vm7, %v5243_v1, 0.0  ;;  %v1129_v32 = vadd.f32 %v1097_v3, %v6496_v5  ;;  %vm1322_vm0 = vcmp.eq.s32.totalorder %v5984_v45, 1  ;;  %v1098_v10 = vsel %vm1062_vm14, %v5212_v59, 0.0 }
 0x20a   :  { %v2527_v42 = vadd.f32 %v5871_v23, %v2431_v60  ;;  %v1908_v53 = vadd.f32 %v1876_v51, %v1648_v41  ;;  %v1130_v30 = vadd.f32 %v1098_v10, %v6497_v40 }
 0x20b   :  { %v1785_v17 = vpop.permute.xlu1 %1784  ;;  %v5991_v2 = vpop.permute.xlu0 %1270  ;;  %v1389_v46 = vadd.f32 %v1357_v63, %v1129_v32 }
 0x20c   :  { %3795 = vtanh.f32 %v2527_v42  ;;  %vm1841_vm13 = vcmp.eq.s32.totalorder %v1785_v17, 1  ;;  %v1358_v42 = vsel %vm1322_vm0, %v5220_v29, 0.0  ;;  %vm1323_vm2 = vcmp.eq.s32.totalorder %v5991_v2, 1 }
 0x20d   :  { %v1877_v8 = vsel %vm1841_vm13, %v5243_v1, 0.0  ;;  %v1649_v6 = vadd.f32 %v1617_v9, %v1389_v46  ;;  %v1390_v62 = vadd.f32 %v1358_v42, %v1130_v30  ;;  %v1359_v20 = vsel %vm1323_vm2, %v5220_v29, 0.0  ;;  %v6500_v30 = vld [vmem:[#allocation24_spill] sm:$0xff] }
 0x20f   :  { %v1528_v15 = vpop.permute.xlu1 %1527  ;;  %v5999_v24 = vpop.permute.xlu0 %1013  ;;  %v1909_v61 = vadd.f32 %v1877_v8, %v1649_v6 }
 0x210   :  { %vm1582_vm12 = vcmp.eq.s32.totalorder %v1528_v15, 1  ;;  %vm1064_vm11 = vcmp.eq.s32.totalorder %v5999_v24, 1 }
 0x211   :  { %v1618_v45 = vsel %vm1582_vm12, %v5241_v39, 0.0 }
 0x212   :  { %v3794_v22 = vpop.eup %3793  ;;  %v1650_v7 = vadd.f32 %v1618_v45, %v1390_v62 }
 0x213   :  { %v6005_v12 = vpop.permute.xlu1 %1016  ;;  %v2042_v31 = vpop.permute.xlu0 %2041  ;;  %3626 = vmatprep.mubr.msk.f32.mxu1 %vm2589_vm15, %v3794_v22 }
 0x214   :  { %vm2100_vm5 = vcmp.eq.s32.totalorder %v2042_v31, 1 }
 0x215   :  { %v2136_v38 = vsel %vm2100_vm5, %v5271_v11, 0.0  ;;  %vm1065_vm5 = vcmp.eq.s32.totalorder %v6005_v12, 1 }
 0x216   :  { %v3796_v54 = vpop.eup %3795  ;;  %v2168_v13 = vadd.f32 %v2136_v38, %v1908_v53 }
 0x217   :  { %v2045_v48 = vpop.permute.xlu1 %2044  ;;  %v1531_v43 = vpop.permute.xlu0 %1530  ;;  %3627 = vmatmul.mubr.msk.f32.gmra.mrb[32].mxu1 %vm2589_vm15, %v3796_v54 }
 0x218   :  { %vm2101_vm8 = vcmp.eq.s32.totalorder %v2045_v48, 1  ;;  %v2436_v34 = vadd.f32 %v5573_v16, %v2168_v13  ;;  %vm1583_vm9 = vcmp.eq.s32.totalorder %v1531_v43, 1 }
 0x219   :  { %v2137_v28 = vsel %vm2101_vm8, %v5271_v11, 0.0  ;;  %v1619_v2 = vsel %vm1583_vm9, %v5241_v39, 0.0 }
 0x21a   :  { %v2169_v4 = vadd.f32 %v2137_v28, %v1909_v61  ;;  %v2528_v21 = vadd.f32 %v5871_v23, %v2436_v34 }
 0x21b   :  { %v1788_v36 = vpop.permute.xlu1 %1787  ;;  %v6014_v26 = vpop.permute.xlu0 %1273 }
 0x21c   :  { %v2441_v44 = vadd.f32 %v5560_v58, %v2169_v4  ;;  %3797 = vtanh.f32 %v2528_v21  ;;  %vm1842_vm4 = vcmp.eq.s32.totalorder %v1788_v36, 1  ;;  %v1099_v58 = vsel %vm1063_vm1, %v5212_v59, 0.0 }
 0x21d   :  { %v1878_v56 = vsel %vm1842_vm4, %v5243_v1, 0.0  ;;  %v1131_v15 = vadd.f32 %v1099_v58, %v6498_v57  ;;  %vm1324_vm13 = vcmp.eq.s32.totalorder %v6014_v26, 1  ;;  %v1100_v4 = vsel %vm1064_vm11, %v5212_v59, 0.0 }
 0x21e   :  { %v2529_v55 = vadd.f32 %v5871_v23, %v2441_v44  ;;  %v1910_v5 = vadd.f32 %v1878_v56, %v1650_v7  ;;  %v1360_v36 = vsel %vm1324_vm13, %v5220_v29, 0.0  ;;  %v6499_v44 = vld [vmem:[#allocation25_spill] sm:$0xff] }
 0x21f   :  { %v1791_v16 = vpop.permute.xlu1 %1790  ;;  %v6021_v60 = vpop.permute.xlu0 %1276  ;;  %v1391_v22 = vadd.f32 %v1359_v20, %v1131_v15  ;;  %v1132_v24 = vadd.f32 %v1100_v4, %v6499_v44 }
 0x220   :  { %3799 = vtanh.f32 %v2529_v55  ;;  %vm1843_vm10 = vcmp.eq.s32.totalorder %v1791_v16, 1  ;;  %vm1325_vm14 = vcmp.eq.s32.totalorder %v6021_v60, 1 }
 0x221   :  { %v1879_v32 = vsel %vm1843_vm10, %v5243_v1, 0.0  ;;  %v1651_v31 = vadd.f32 %v1619_v2, %v1391_v22  ;;  %v1392_v16 = vadd.f32 %v1360_v36, %v1132_v24  ;;  %v1361_v12 = vsel %vm1325_vm14, %v5220_v29, 0.0  ;;  %v6502_v36 = vld [vmem:[#allocation26_spill] sm:$0xff] }
 0x223   :  { %v1534_v17 = vpop.permute.xlu1 %1533  ;;  %v6029_v35 = vpop.permute.xlu0 %1019  ;;  %v1911_v38 = vadd.f32 %v1879_v32, %v1651_v31 }
 0x224   :  { %vm1584_vm8 = vcmp.eq.s32.totalorder %v1534_v17, 1  ;;  %vm1066_vm9 = vcmp.eq.s32.totalorder %v6029_v35, 1 }
 0x225   :  { %v1620_v26 = vsel %vm1584_vm8, %v5241_v39, 0.0 }
 0x226   :  { %v3798_v3 = vpop.eup %3797  ;;  %v1652_v45 = vadd.f32 %v1620_v26, %v1392_v16 }
 0x227   :  { %v6035_v63 = vpop.permute.xlu1 %1022  ;;  %v2048_v51 = vpop.permute.xlu0 %2047  ;;  %3629 = vmatprep.mubr.msk.f32.mxu1 %vm2589_vm15, %v3798_v3 }
 0x228   :  { %vm2102_vm3 = vcmp.eq.s32.totalorder %v2048_v51, 1 }
 0x229   :  { %v2138_v41 = vsel %vm2102_vm3, %v5271_v11, 0.0  ;;  %vm1067_vm3 = vcmp.eq.s32.totalorder %v6035_v63, 1 }
 0x22a   :  { %v3800_v9 = vpop.eup %3799  ;;  %v2170_v46 = vadd.f32 %v2138_v41, %v1910_v5 }
 0x22b   :  { %v2051_v53 = vpop.permute.xlu1 %2050  ;;  %v1537_v8 = vpop.permute.xlu0 %1536  ;;  %3630 = vmatmul.mubr.msk.f32.gmra.mrb[34].mxu1 %vm2589_vm15, %v3800_v9 }
 0x22c   :  { %vm2103_vm7 = vcmp.eq.s32.totalorder %v2051_v53, 1  ;;  %v2446_v54 = vadd.f32 %v5646_v14, %v2170_v46  ;;  %vm1585_vm1 = vcmp.eq.s32.totalorder %v1537_v8, 1 }
 0x22d   :  { %v2139_v6 = vsel %vm2103_vm7, %v5271_v11, 0.0  ;;  %v1621_v60 = vsel %vm1585_vm1, %v5241_v39, 0.0 }
 0x22e   :  { %v2171_v13 = vadd.f32 %v2139_v6, %v1911_v38  ;;  %v2530_v48 = vadd.f32 %v5871_v23, %v2446_v54  ;;  %v1102_v54 = vsel %vm1066_vm9, %v5212_v59, 0.0 }
 0x22f   :  { %v1794_v43 = vpop.permute.xlu1 %1793  ;;  %v6044_v61 = vpop.permute.xlu0 %1279 }
 0x230   :  { %v2451_v34 = vadd.f32 %v5636_v49, %v2171_v13  ;;  %3801 = vtanh.f32 %v2530_v48  ;;  %vm1844_vm0 = vcmp.eq.s32.totalorder %v1794_v43, 1  ;;  %v1101_v49 = vsel %vm1065_vm5, %v5212_v59, 0.0  ;;  %v6501_v48 = vld [vmem:[#allocation27_spill] sm:$0xff] }
 0x231   :  { %v1880_v42 = vsel %vm1844_vm0, %v5243_v1, 0.0  ;;  %v1133_v58 = vadd.f32 %v1101_v49, %v6500_v30  ;;  %vm1326_vm10 = vcmp.eq.s32.totalorder %v6044_v61, 1  ;;  %v1134_v35 = vadd.f32 %v1102_v54, %v6501_v48 }
 0x232   :  { %v2531_v28 = vadd.f32 %v5871_v23, %v2451_v34  ;;  %v1912_v56 = vadd.f32 %v1880_v42, %v1652_v45  ;;  %v1362_v13 = vsel %vm1326_vm10, %v5220_v29, 0.0 }
 0x233   :  { %v1797_v14 = vpop.permute.xlu1 %1796  ;;  %v6051_v21 = vpop.permute.xlu0 %1282  ;;  %v1393_v20 = vadd.f32 %v1361_v12, %v1133_v58 }
 0x234   :  { %3803 = vtanh.f32 %v2531_v28  ;;  %vm1845_vm12 = vcmp.eq.s32.totalorder %v1797_v14, 1  ;;  %vm1327_vm11 = vcmp.eq.s32.totalorder %v6051_v21, 1  ;;  %v1394_v28 = vadd.f32 %v1362_v13, %v1134_v35 }
 0x235   :  { %v1881_v3 = vsel %vm1845_vm12, %v5243_v1, 0.0  ;;  %v1653_v7 = vadd.f32 %v1621_v60, %v1393_v20  ;;  %v1363_v63 = vsel %vm1327_vm11, %v5220_v29, 0.0 }
 0x237   :  { %v1540_v55 = vpop.permute.xlu1 %1539  ;;  %v6059_v10 = vpop.permute.xlu0 %1025  ;;  %v1913_v5 = vadd.f32 %v1881_v3, %v1653_v7 }
 0x238   :  { %vm1586_vm7 = vcmp.eq.s32.totalorder %v1540_v55, 1  ;;  %vm1068_vm1 = vcmp.eq.s32.totalorder %v6059_v10, 1  ;;  %v6503_v10 = vld [vmem:[#allocation29_spill] sm:$0xff] }
 0x239   :  { %v1622_v43 = vsel %vm1586_vm7, %v5241_v39, 0.0 }
 0x23a   :  { %v3802_v40 = vpop.eup %3801  ;;  %v1654_v24 = vadd.f32 %v1622_v43, %v1394_v28 }
 0x23b   :  { %v6065_v17 = vpop.permute.xlu1 %1028  ;;  %v2054_v62 = vpop.permute.xlu0 %2053  ;;  %3632 = vmatprep.mubr.msk.f32.mxu1 %vm2589_vm15, %v3802_v40 }
 0x23c   :  { %vm2104_vm2 = vcmp.eq.s32.totalorder %v2054_v62, 1 }
 0x23d   :  { %v2140_v57 = vsel %vm2104_vm2, %v5271_v11, 0.0  ;;  %vm1069_vm2 = vcmp.eq.s32.totalorder %v6065_v17, 1 }
 0x23e   :  { %v3804_v15 = vpop.eup %3803  ;;  %v2172_v2 = vadd.f32 %v2140_v57, %v1912_v56  ;;  %v6105_v56 = vld [vmem:[%s6423_s6] ss:$0 sm:$0xff] }
 0x23f   :  { %v2057_v51 = vpop.permute.xlu1 %2056  ;;  %v1543_v22 = vpop.permute.xlu0 %1542  ;;  %3633 = vmatmul.mubr.msk.f32.gmra.mrb[36].mxu1 %vm2589_vm15, %v3804_v15 }
 0x240   :  { %vm2105_vm4 = vcmp.eq.s32.totalorder %v2057_v51, 1  ;;  %v2456_v32 = vadd.f32 %v5718_v47, %v2172_v2  ;;  %vm1587_vm5 = vcmp.eq.s32.totalorder %v1543_v22, 1 }
 0x241   :  { %v2141_v41 = vsel %vm2105_vm4, %v5271_v11, 0.0  ;;  %v1623_v21 = vsel %vm1587_vm5, %v5241_v39, 0.0 }
 0x242   :  { %v2173_v9 = vadd.f32 %v2141_v41, %v1913_v5  ;;  %v2532_v31 = vadd.f32 %v5871_v23, %v2456_v32 }
 0x243   :  { %v1800_v46 = vpop.permute.xlu1 %1799  ;;  %v6074_v53 = vpop.permute.xlu0 %1285 }
 0x244   :  { %v2461_v8 = vadd.f32 %v5708_v19, %v2173_v9  ;;  %3805 = vtanh.f32 %v2532_v31  ;;  %vm1846_vm13 = vcmp.eq.s32.totalorder %v1800_v46, 1  ;;  %v1103_v19 = vsel %vm1067_vm3, %v5212_v59, 0.0 }
 0x245   :  { %v1882_v4 = vsel %vm1846_vm13, %v5243_v1, 0.0  ;;  %v1135_v44 = vadd.f32 %v1103_v19, %v6502_v36  ;;  %vm1328_vm12 = vcmp.eq.s32.totalorder %v6074_v53, 1  ;;  %v1104_v9 = vsel %vm1068_vm1, %v5212_v59, 0.0  ;;  %v6504_v19 = vld [vmem:[#allocation28_spill] sm:$0xff] }
 0x246   :  { %v2533_v38 = vadd.f32 %v5871_v23, %v2461_v8  ;;  %v1914_v16 = vadd.f32 %v1882_v4, %v1654_v24  ;;  %v1136_v8 = vadd.f32 %v1104_v9, %v6503_v10  ;;  %v1105_v53 = vsel %vm1069_vm2, %v5212_v59, 0.0 }
 0x247   :  { %v1803_v47 = vpop.permute.xlu1 %1802  ;;  %v6081_v6 = vpop.permute.xlu0 %1288  ;;  %v1395_v55 = vadd.f32 %v1363_v63, %v1135_v44  ;;  %v1137_v43 = vadd.f32 %v1105_v53, %v6504_v19 }
 0x248   :  { %3807 = vtanh.f32 %v2533_v38  ;;  %vm1847_vm8 = vcmp.eq.s32.totalorder %v1803_v47, 1  ;;  %vm1329_vm9 = vcmp.eq.s32.totalorder %v6081_v6, 1 }
 0x249   :  { %v1883_v12 = vsel %vm1847_vm8, %v5243_v1, 0.0  ;;  %v1655_v30 = vadd.f32 %v1623_v21, %v1395_v55  ;;  %v1365_v17 = vsel %vm1329_vm9, %v5220_v29, 0.0 }
 0x24b   :  { %v1546_v61 = vpop.permute.xlu1 %1545  ;;  %v6089_v34 = vpop.permute.xlu0 %1031  ;;  %v1915_v62 = vadd.f32 %v1883_v12, %v1655_v30 }
 0x24c   :  { %vm1588_vm4 = vcmp.eq.s32.totalorder %v1546_v61, 1  ;;  %vm1070_vm13 = vcmp.eq.s32.totalorder %v6089_v34, 1 }
 0x24d   :  { %v1624_v38 = vsel %vm1588_vm4, %v5241_v39, 0.0 }
 0x24e   :  { %v3806_v14 = vpop.eup %3805 }
 0x24f   :  { %v6095_v49 = vpop.permute.xlu1 %1034  ;;  %v2060_v26 = vpop.permute.xlu0 %2059  ;;  %3635 = vmatprep.mubr.msk.f32.mxu1 %vm2589_vm15, %v3806_v14  ;;  %v1397_v14 = vadd.f32 %v1365_v17, %v1137_v43 }
 0x250   :  { %vm2106_vm14 = vcmp.eq.s32.totalorder %v2060_v26, 1 }
 0x251   :  { %v2142_v42 = vsel %vm2106_vm14, %v5271_v11, 0.0  ;;  %vm1071_vm14 = vcmp.eq.s32.totalorder %v6095_v49, 1 }
 0x252   :  { %v3808_v40 = vpop.eup %3807  ;;  %v2174_v58 = vadd.f32 %v2142_v42, %v1914_v16 }
 0x253   :  { %v2063_v45 = vpop.permute.xlu1 %2062  ;;  %v1549_v60 = vpop.permute.xlu0 %1548  ;;  %3636 = vmatmul.mubr.msk.f32.gmra.mrb[38].mxu1 %vm2589_vm15, %v3808_v40 }
 0x254   :  { %v2466_v20 = vadd.f32 %v5775_v0, %v2174_v58  ;;  %vm2107_vm0 = vcmp.eq.s32.totalorder %v2063_v45, 1  ;;  %vm1589_vm3 = vcmp.eq.s32.totalorder %v1549_v60, 1 }
 0x255   :  { %v2143_v3 = vsel %vm2107_vm0, %v5271_v11, 0.0  ;;  %v1625_v6 = vsel %vm1589_vm3, %v5241_v39, 0.0 }
 0x256   :  { %v2534_v57 = vadd.f32 %v5871_v23, %v2466_v20  ;;  %v2175_v15 = vadd.f32 %v2143_v3, %v1915_v62  ;;  %v3604_v7 = vpop.f32.mrb[16].mxu1  ;;  %v1657_v55 = vadd.f32 %v1625_v6, %v1397_v14 }
 0x257   :  { %v2758_v2 = vadd.f32 %v3604_v7, %v6105_v56  ;;  %v1806_v51 = vpop.permute.xlu1 %1805  ;;  %v6110_v22 = vpop.permute.xlu0 %1291 }
 0x258   :  { %3809 = vtanh.f32 %v2534_v57  ;;  %v2471_v0 = vadd.f32 %v5768_v27, %v2175_v15  ;;  %v2752_v5 = vpop.f32.mrb[17].mxu1  ;;  %v1364_v27 = vsel %vm1328_vm12, %v5220_v29, 0.0  ;;  %vm1848_vm10 = vcmp.eq.s32.totalorder %v1806_v51, 1  ;;  %v6505_v51 = vld [vmem:[#allocation31_spill] sm:$0xff] }
 0x259   :  { %v2753_v32 = vadd.f32 %v6105_v56, %v2752_v5  ;;  %3811 = vtanh.f32 %v2758_v2  ;;  %v1396_v13 = vadd.f32 %v1364_v27, %v1136_v8  ;;  %v1884_v48 = vsel %vm1848_vm10, %v5243_v1, 0.0 }
 0x25a   :  { %v2535_v41 = vadd.f32 %v5871_v23, %v2471_v0  ;;  %vm1330_vm8 = vcmp.eq.s32.totalorder %v6110_v22, 1  ;;  %v1106_v15 = vsel %vm1070_vm13, %v5212_v59, 0.0  ;;  %v1107_v0 = vsel %vm1071_vm14, %v5212_v59, 0.0 }
 0x25b   :  { %3813 = vtanh.f32 %v2753_v32  ;;  %v1809_v31 = vpop.permute.xlu1 %1808  ;;  %v6118_v46 = vpop.permute.xlu0 %1294  ;;  %v1656_v61 = vadd.f32 %v1624_v38, %v1396_v13  ;;  %v1366_v2 = vsel %vm1330_vm8, %v5220_v29, 0.0  ;;  %v1138_v22 = vadd.f32 %v1106_v15, %v6505_v51 }
 0x25c   :  { %3815 = vtanh.f32 %v2535_v41  ;;  %vm1849_vm7 = vcmp.eq.s32.totalorder %v1809_v31, 1  ;;  %vm1331_vm1 = vcmp.eq.s32.totalorder %v6118_v46, 1 }
 0x25d   :  { %v1916_v36 = vadd.f32 %v1884_v48, %v1656_v61  ;;  %v1885_v24 = vsel %vm1849_vm7, %v5243_v1, 0.0  ;;  %v1398_v9 = vadd.f32 %v1366_v2, %v1138_v22  ;;  %v1367_v31 = vsel %vm1331_vm1, %v5220_v29, 0.0 }
 0x25e   :  { %v1917_v58 = vadd.f32 %v1885_v24, %v1657_v55  ;;  %v6507_v55 = vld [vmem:[#allocation33_spill] sm:$0xff] }
 0x25f   :  { %v1552_v54 = vpop.permute.xlu1 %1551  ;;  %v6126_v47 = vpop.permute.xlu0 %1037 }
 0x260   :  { %vm1590_vm0 = vcmp.eq.s32.totalorder %v1552_v54, 1  ;;  %vm1072_vm9 = vcmp.eq.s32.totalorder %v6126_v47, 1 }
 0x261   :  { %v1626_v49 = vsel %vm1590_vm0, %v5241_v39, 0.0  ;;  %v1108_v6 = vsel %vm1072_vm9, %v5212_v59, 0.0 }
 0x262   :  { %v3810_v35 = vpop.eup %3809  ;;  %v1658_v10 = vadd.f32 %v1626_v49, %v1398_v9 }
 0x263   :  { %v6132_v28 = vpop.permute.xlu1 %1040  ;;  %v2066_v63 = vpop.permute.xlu0 %2065  ;;  %3638 = vmatprep.mubr.msk.f32.mxu1 %vm2589_vm15, %v3810_v35 }
 0x264   :  { %v3812_v4 = vpop.eup %3811  ;;  %vm2108_vm11 = vcmp.eq.s32.totalorder %v2066_v63, 1  ;;  %vm1073_vm10 = vcmp.eq.s32.totalorder %v6132_v28, 1 }
 0x265   :  { %v3814_v44 = vpop.eup %3813  ;;  %v2144_v21 = vsel %vm2108_vm11, %v5271_v11, 0.0  ;;  %v1109_v47 = vsel %vm1073_vm10, %v5212_v59, 0.0 }
 0x266   :  { %v3816_v26 = vpop.eup %3815  ;;  %v2176_v16 = vadd.f32 %v2144_v21, %v1916_v36  ;;  %3666 = vmatprep.mubr.msk.f32.mxu0 %vm2589_vm15, %v3814_v44  ;;  %v3607_v12 = vpop.f32.mrb[18].mxu1 }
 0x267   :  { %v2768_v42 = vadd.f32 %v3607_v12, %v6105_v56  ;;  %3667 = vmatmul.mubr.msk.f32.vlgmr.msra.gmra.mrb[16].mxu0 %vm2589_vm15, %v3812_v4  ;;  %v2069_v40 = vpop.permute.xlu1 %2068  ;;  %v1555_v30 = vpop.permute.xlu0 %1554  ;;  %3639 = vmatmul.mubr.msk.f32.gmra.mrb[40].mxu1 %vm2589_vm15, %v3816_v26  ;;  %v6508_v12 = vld [vmem:[#allocation32_spill] sm:$0xff] }
 0x268   :  { %v2476_v45 = vadd.f32 %v5786_v25, %v2176_v16  ;;  %vm2109_vm5 = vcmp.eq.s32.totalorder %v2069_v40, 1  ;;  %v2762_v60 = vpop.f32.mrb[19].mxu1  ;;  %vm1591_vm2 = vcmp.eq.s32.totalorder %v1555_v30, 1  ;;  %v1140_v16 = vadd.f32 %v1108_v6, %v6507_v55 }
 0x269   :  { %v2145_v62 = vsel %vm2109_vm5, %v5271_v11, 0.0  ;;  %v2763_v20 = vadd.f32 %v6105_v56, %v2762_v60  ;;  %3817 = vtanh.f32 %v2768_v42  ;;  %v1627_v8 = vsel %vm1591_vm2, %v5241_v39, 0.0 }
 0x26a   :  { %v2536_v3 = vadd.f32 %v5871_v23, %v2476_v45  ;;  %v2177_v57 = vadd.f32 %v2145_v62, %v1917_v58  ;;  %v1141_v42 = vadd.f32 %v1109_v47, %v6508_v12 }
 0x26b   :  { %3819 = vtanh.f32 %v2763_v20  ;;  %v1812_v34 = vpop.permute.xlu1 %1811  ;;  %v1298_v7 = vpop.permute.xlu0 %1297 }
 0x26c   :  { %3821 = vtanh.f32 %v2536_v3  ;;  %v2481_v25 = vadd.f32 %v5781_v50, %v2177_v57  ;;  %vm1850_vm12 = vcmp.eq.s32.totalorder %v1812_v34, 1  ;;  %v6506_v50 = vld [vmem:[#allocation30_spill] sm:$0xff]  ;;  %vm1332_vm3 = vcmp.eq.s32.totalorder %v1298_v7, 1 }
 0x26d   :  { %v1139_v27 = vadd.f32 %v1107_v0, %v6506_v50  ;;  %v1886_v46 = vsel %vm1850_vm12, %v5243_v1, 0.0  ;;  %v1368_v4 = vsel %vm1332_vm3, %v5220_v29, 0.0 }
 0x26e   :  { %v2537_v5 = vadd.f32 %v5871_v23, %v2481_v25  ;;  %v1918_v17 = vadd.f32 %v1886_v46, %v1658_v10 }
 0x26f   :  { %v1815_v32 = vpop.permute.xlu1 %1814  ;;  %v1301_v41 = vpop.permute.xlu0 %1300  ;;  %v1399_v53 = vadd.f32 %v1367_v31, %v1139_v27  ;;  %v3923_v27 = vld [vmem:[%s6421_s4] ss:$0 sm:$0xff] }
 0x270   :  { %3823 = vtanh.f32 %v2537_v5  ;;  %vm1851_vm4 = vcmp.eq.s32.totalorder %v1815_v32, 1  ;;  %vm1333_vm7 = vcmp.eq.s32.totalorder %v1301_v41, 1 }
 0x271   :  { %v1887_v48 = vsel %vm1851_vm4, %v5243_v1, 0.0  ;;  %v1659_v19 = vadd.f32 %v1627_v8, %v1399_v53  ;;  %v1369_v36 = vsel %vm1333_vm7, %v5220_v29, 0.0 }
 0x272   :  { %v1401_v62 = vadd.f32 %v1369_v36, %v1141_v42 }
 0x273   :  { %v2072_v38 = vpop.permute.xlu1 %2071  ;;  %v1558_v54 = vpop.permute.xlu0 %1557  ;;  %v1919_v14 = vadd.f32 %v1887_v48, %v1659_v19 }
 0x274   :  { %v3818_v13 = vpop.eup %3817  ;;  %vm2110_vm11 = vcmp.eq.s32.totalorder %v2072_v38, 1  ;;  %vm1592_vm13 = vcmp.eq.s32.totalorder %v1558_v54, 1 }
 0x275   :  { %v3820_v35 = vpop.eup %3819  ;;  %v2146_v43 = vsel %vm2110_vm11, %v5271_v11, 0.0  ;;  %v1628_v20 = vsel %vm1592_vm13, %v5241_v39, 0.0 }
 0x276   :  { %v3822_v61 = vpop.eup %3821  ;;  %v2178_v63 = vadd.f32 %v2146_v43, %v1918_v17  ;;  %3669 = vmatprep.mubr.msk.f32.mxu0 %vm2589_vm15, %v3820_v35  ;;  %v3610_v28 = vpop.f32.mrb[20].mxu1 }
 0x277   :  { %v2778_v44 = vadd.f32 %v3610_v28, %v6105_v56  ;;  %3670 = vmatmul.mubr.msk.f32.gmra.mrb[18].mxu0 %vm2589_vm15, %v3818_v13  ;;  %v2075_v24 = vpop.permute.xlu1 %2074  ;;  %v1561_v21 = vpop.permute.xlu0 %1560  ;;  %3641 = vmatprep.mubr.msk.f32.mxu1 %vm2589_vm15, %v3822_v61 }
 0x278   :  { %v2486_v59 = vadd.f32 %v5819_v37, %v2178_v63  ;;  %vm2111_vm5 = vcmp.eq.s32.totalorder %v2075_v24, 1  ;;  %vm1593_vm8 = vcmp.eq.s32.totalorder %v1561_v21, 1  ;;  %v2772_v26 = vpop.f32.mrb[21].mxu1  ;;  %v1400_v37 = vadd.f32 %v1368_v4, %v1140_v16 }
 0x279   :  { %v2147_v29 = vsel %vm2111_vm5, %v5271_v11, 0.0  ;;  %v2773_v40 = vadd.f32 %v6105_v56, %v2772_v26  ;;  %3825 = vtanh.f32 %v2778_v44  ;;  %v1629_v60 = vsel %vm1593_vm8, %v5241_v39, 0.0 }
 0x27a   :  { %v3824_v30 = vpop.eup %3823  ;;  %v2538_v58 = vadd.f32 %v5871_v23, %v2486_v59  ;;  %v2179_v45 = vadd.f32 %v2147_v29, %v1919_v14  ;;  %v1661_v34 = vadd.f32 %v1629_v60, %v1401_v62  ;;  %v1660_v2 = vadd.f32 %v1628_v20, %v1400_v37 }
 0x27b   :  { %3827 = vtanh.f32 %v2773_v40  ;;  %v1821_v3 = vpop.permute.xlu1 %1820  ;;  %v1818_v57 = vpop.permute.xlu0 %1817  ;;  %3642 = vmatmul.mubr.msk.f32.gmra.mrb[42].mxu1 %vm2589_vm15, %v3824_v30 }
 0x27c   :  { %3829 = vtanh.f32 %v2538_v58  ;;  %v2491_v15 = vadd.f32 %v5808_v33, %v2179_v45  ;;  %vm1853_vm14 = vcmp.eq.s32.totalorder %v1821_v3, 1  ;;  %vm1852_vm0 = vcmp.eq.s32.totalorder %v1818_v57, 1 }
 0x27d   :  { %v1889_v7 = vsel %vm1853_vm14, %v5243_v1, 0.0  ;;  %v1888_v25 = vsel %vm1852_vm0, %v5243_v1, 0.0 }
 0x27e   :  { %v2539_v51 = vadd.f32 %v5871_v23, %v2491_v15  ;;  %v1921_v22 = vadd.f32 %v1889_v7, %v1661_v34  ;;  %v1920_v5 = vadd.f32 %v1888_v25, %v1660_v2 }
 0x27f   :  { %v2081_v39 = vpop.permute.xlu1 %2080  ;;  %v2078_v0 = vpop.permute.xlu0 %2077 }
 0x280   :  { %3831 = vtanh.f32 %v2539_v51  ;;  %vm2113_vm1 = vcmp.eq.s32.totalorder %v2081_v39, 1  ;;  %vm2112_vm12 = vcmp.eq.s32.totalorder %v2078_v0, 1 }
 0x281   :  { %v2149_v49 = vsel %vm2113_vm1, %v5271_v11, 0.0  ;;  %v2148_v33 = vsel %vm2112_vm12, %v5271_v11, 0.0 }
 0x282   :  { %v2181_v32 = vadd.f32 %v2149_v49, %v1921_v22  ;;  %v2180_v41 = vadd.f32 %v2148_v33, %v1920_v5 }
 0x283   :  { %v3826_v9 = vpop.eup %3825 }
 0x284   :  { %v2501_v31 = vadd.f32 %v5823_v18, %v2181_v32  ;;  %v2496_v1 = vadd.f32 %v5834_v52, %v2180_v41 }
 0x285   :  { %v3828_v50 = vpop.eup %3827 }
 0x286   :  { %v3830_v23 = vpop.eup %3829  ;;  %v2541_v46 = vadd.f32 %v3923_v27, %v2501_v31  ;;  %v2540_v10 = vadd.f32 %v3923_v27, %v2496_v1  ;;  %3672 = vmatprep.mubr.msk.f32.mxu0 %vm2589_vm15, %v3828_v50  ;;  %v3613_v8 = vpop.f32.mrb[22].mxu1  ;;  %v6238_v1 = vld [vmem:[%s6424_s8] ss:$0 sm:$0xff] }
 0x287   :  { %3673 = vmatmul.mubr.msk.f32.gmra.mrb[20].mxu0 %vm2589_vm15, %v3826_v9  ;;  %v2782_v11 = vpop.f32.mrb[23].mxu1  ;;  %3644 = vmatprep.mubr.msk.f32.mxu1 %vm2589_vm15, %v3830_v23  ;;  %v2788_v18 = vadd.f32 %v3613_v8, %v6105_v56 }
 0x288   :  { %3833 = vtanh.f32 %v2541_v46  ;;  %v2783_v52 = vadd.f32 %v6105_v56, %v2782_v11 }
 0x289   :  { %3835 = vtanh.f32 %v2540_v10 }
 0x28a   :  { %v3832_v53 = vpop.eup %3831  ;;  %3837 = vtanh.f32 %v2783_v52 }
 0x28b   :  { %3645 = vmatmul.mubr.msk.f32.gmra.mrb[44].mxu1 %vm2589_vm15, %v3832_v53  ;;  %3839 = vtanh.f32 %v2788_v18 }
 0x292   :  { %v3834_v38 = vpop.eup %3833 }
 0x293   :  { %v3836_v54 = vpop.eup %3835 }
 0x294   :  { %3647 = vmatprep.mubr.msk.f32.mxu1 %vm2589_vm15, %v3836_v54  ;;  %v3838_v13 = vpop.eup %3837 }
 0x295   :  { %3648 = vmatmul.mubr.msk.f32.gmra.mrb[46].mxu1 %vm2589_vm15, %v3834_v38  ;;  %v3840_v17 = vpop.eup %3839  ;;  %3675 = vmatprep.mubr.msk.f32.mxu0 %vm2589_vm15, %v3838_v13 }
 0x296   :  { %3676 = vmatmul.mubr.msk.f32.gmra.mrb[22].mxu0 %vm2589_vm15, %v3840_v17 }
 0x29a   :  { %v3616_v48 = vpop.f32.mrb[24].mxu1 }
 0x29b   :  { %v2798_v35 = vadd.f32 %v3616_v48, %v6105_v56  ;;  %v2792_v19 = vpop.f32.mrb[25].mxu1 }
 0x29c   :  { %v2793_v43 = vadd.f32 %v6105_v56, %v2792_v19 }
 0x29e   :  { %3841 = vtanh.f32 %v2793_v43 }
 0x29f   :  { %3843 = vtanh.f32 %v2798_v35 }
 0x2a8   :  { %v3842_v61 = vpop.eup %3841 }
 0x2a9   :  { %v3844_v6 = vpop.eup %3843  ;;  %3678 = vmatprep.mubr.msk.f32.mxu0 %vm2589_vm15, %v3842_v61 }
 0x2aa   :  { %3679 = vmatmul.mubr.msk.f32.gmra.mrb[24].mxu0 %vm2589_vm15, %v3844_v6 }
 0x2ae   :  { %v3619_v47 = vpop.f32.mrb[26].mxu1 }
 0x2af   :  { %v2808_v63 = vadd.f32 %v3619_v47, %v6105_v56  ;;  %v2802_v28 = vpop.f32.mrb[27].mxu1 }
 0x2b0   :  { %v2803_v4 = vadd.f32 %v6105_v56, %v2802_v28 }
 0x2b2   :  { %3845 = vtanh.f32 %v2803_v4 }
 0x2b3   :  { %3847 = vtanh.f32 %v2808_v63 }
 0x2bc   :  { %v3846_v14 = vpop.eup %3845 }
 0x2bd   :  { %v3848_v36 = vpop.eup %3847  ;;  %3681 = vmatprep.mubr.msk.f32.mxu0 %vm2589_vm15, %v3846_v14 }
 0x2be   :  { %3682 = vmatmul.mubr.msk.f32.gmra.mrb[26].mxu0 %vm2589_vm15, %v3848_v36 }
 0x2c2   :  { %v3622_v44 = vpop.f32.mrb[28].mxu1 }
 0x2c3   :  { %v2818_v24 = vadd.f32 %v3622_v44, %v6105_v56  ;;  %v2812_v21 = vpop.f32.mrb[29].mxu1 }
 0x2c4   :  { %v2813_v59 = vadd.f32 %v6105_v56, %v2812_v21 }
 0x2c6   :  { %3849 = vtanh.f32 %v2813_v59 }
 0x2c7   :  { %3851 = vtanh.f32 %v2818_v24 }
 0x2d0   :  { %v3850_v26 = vpop.eup %3849 }
 0x2d1   :  { %v3852_v55 = vpop.eup %3851  ;;  %3684 = vmatprep.mubr.msk.f32.mxu0 %vm2589_vm15, %v3850_v26 }
 0x2d2   :  { %3685 = vmatmul.mubr.msk.f32.gmra.mrb[28].mxu0 %vm2589_vm15, %v3852_v55 }
 0x2d6   :  { %v3625_v16 = vpop.f32.mrb[30].mxu1 }
 0x2d7   :  { %v2828_v12 = vadd.f32 %v3625_v16, %v6105_v56  ;;  %v2822_v42 = vpop.f32.mrb[31].mxu1 }
 0x2d8   :  { %v2823_v29 = vadd.f32 %v6105_v56, %v2822_v42 }
 0x2da   :  { %3853 = vtanh.f32 %v2823_v29 }
 0x2db   :  { %3855 = vtanh.f32 %v2828_v12 }
 0x2e4   :  { %v3854_v40 = vpop.eup %3853 }
 0x2e5   :  { %v3856_v30 = vpop.eup %3855  ;;  %3687 = vmatprep.mubr.msk.f32.mxu0 %vm2589_vm15, %v3854_v40 }
 0x2e6   :  { %3688 = vmatmul.mubr.msk.f32.gmra.mrb[30].mxu0 %vm2589_vm15, %v3856_v30 }
 0x2ea   :  { %v3628_v58 = vpop.f32.mrb[32].mxu1 }
 0x2eb   :  { %v2838_v45 = vadd.f32 %v3628_v58, %v6105_v56  ;;  %v2832_v60 = vpop.f32.mrb[33].mxu1 }
 0x2ec   :  { %v2833_v37 = vadd.f32 %v6105_v56, %v2832_v60 }
 0x2ee   :  { %3857 = vtanh.f32 %v2833_v37 }
 0x2ef   :  { %3859 = vtanh.f32 %v2838_v45 }
 0x2f8   :  { %v3858_v62 = vpop.eup %3857 }
 0x2f9   :  { %v3860_v20 = vpop.eup %3859  ;;  %3690 = vmatprep.mubr.msk.f32.mxu0 %vm2589_vm15, %v3858_v62 }
 0x2fa   :  { %3691 = vmatmul.mubr.msk.f32.gmra.mrb[32].mxu0 %vm2589_vm15, %v3860_v20 }
 0x2fe   :  { %v3631_v3 = vpop.f32.mrb[34].mxu1 }
 0x2ff   :  { %v2848_v57 = vadd.f32 %v3631_v3, %v6105_v56  ;;  %v2842_v15 = vpop.f32.mrb[35].mxu1 }
 0x300   :  { %v2843_v34 = vadd.f32 %v6105_v56, %v2842_v15 }
 0x302   :  { %3861 = vtanh.f32 %v2843_v34 }
 0x303   :  { %3863 = vtanh.f32 %v2848_v57 }
 0x30c   :  { %v3862_v7 = vpop.eup %3861 }
 0x30d   :  { %v3864_v25 = vpop.eup %3863  ;;  %3693 = vmatprep.mubr.msk.f32.mxu0 %vm2589_vm15, %v3862_v7 }
 0x30e   :  { %3694 = vmatmul.mubr.msk.f32.gmra.mrb[34].mxu0 %vm2589_vm15, %v3864_v25 }
 0x312   :  { %v3634_v2 = vpop.f32.mrb[36].mxu1 }
 0x313   :  { %v2858_v51 = vadd.f32 %v3634_v2, %v6105_v56  ;;  %v2852_v22 = vpop.f32.mrb[37].mxu1 }
 0x314   :  { %v2853_v39 = vadd.f32 %v6105_v56, %v2852_v22 }
 0x316   :  { %3865 = vtanh.f32 %v2853_v39 }
 0x317   :  { %3867 = vtanh.f32 %v2858_v51 }
 0x320   :  { %v3866_v0 = vpop.eup %3865 }
 0x321   :  { %v3868_v5 = vpop.eup %3867  ;;  %3696 = vmatprep.mubr.msk.f32.mxu0 %vm2589_vm15, %v3866_v0 }
 0x322   :  { %3697 = vmatmul.mubr.msk.f32.gmra.mrb[36].mxu0 %vm2589_vm15, %v3868_v5 }
 0x326   :  { %v3637_v49 = vpop.f32.mrb[38].mxu1 }
 0x327   :  { %v2868_v33 = vadd.f32 %v3637_v49, %v6105_v56  ;;  %v2862_v32 = vpop.f32.mrb[39].mxu1 }
 0x328   :  { %v2863_v41 = vadd.f32 %v6105_v56, %v2862_v32 }
 0x32a   :  { %3869 = vtanh.f32 %v2863_v41 }
 0x32b   :  { %3871 = vtanh.f32 %v2868_v33 }
 0x334   :  { %v3870_v9 = vpop.eup %3869 }
 0x335   :  { %v3872_v31 = vpop.eup %3871  ;;  %3699 = vmatprep.mubr.msk.f32.mxu0 %vm2589_vm15, %v3870_v9 }
 0x336   :  { %3700 = vmatmul.mubr.msk.f32.gmra.mrb[38].mxu0 %vm2589_vm15, %v3872_v31 }
 0x33a   :  { %v3668_v50 = vpop.f32.mrb[16].mxu0  ;;  %v3640_v23 = vpop.f32.mrb[40].mxu1 }
 0x33b   :  { %v3126_v27 = vadd.f32 %v3668_v50, %v6238_v1  ;;  %v2878_v46 = vadd.f32 %v3640_v23, %v6105_v56  ;;  %v3120_v10 = vpop.f32.mrb[17].mxu0  ;;  %v2872_v8 = vpop.f32.mrb[41].mxu1 }
 0x33c   :  { %v3121_v11 = vadd.f32 %v6238_v1, %v3120_v10  ;;  %v2873_v18 = vadd.f32 %v6105_v56, %v2872_v8 }
 0x33d   :  { %3280 = vst.msk [vmem:[%s6425_s9 + $0x8] sm:$0xff] %vm2182_vm6, %v3126_v27 }
 0x33e   :  { %3279 = vst.msk [vmem:[%s6425_s9] sm:$0xff] %vm2182_vm6, %v3121_v11  ;;  %3873 = vtanh.f32 %v2873_v18 }
 0x33f   :  { %3875 = vtanh.f32 %v2878_v46 }
 0x348   :  { %v3874_v52 = vpop.eup %3873 }
 0x349   :  { %v3876_v53 = vpop.eup %3875  ;;  %3702 = vmatprep.mubr.msk.f32.mxu0 %vm2589_vm15, %v3874_v52 }
 0x34a   :  { %v3671_v38 = vpop.f32.mrb[18].mxu0  ;;  %3703 = vmatmul.mubr.msk.f32.gmra.mrb[40].mxu0 %vm2589_vm15, %v3876_v53 }
 0x34b   :  { %v3136_v54 = vadd.f32 %v3671_v38, %v6238_v1  ;;  %v3130_v13 = vpop.f32.mrb[19].mxu0 }
 0x34c   :  { %v3131_v17 = vadd.f32 %v6238_v1, %v3130_v13 }
 0x34d   :  { %3282 = vst.msk [vmem:[%s6425_s9 + $0x18] sm:$0xff] %vm2182_vm6, %v3136_v54 }
 0x34e   :  { %3281 = vst.msk [vmem:[%s6425_s9 + $0x10] sm:$0xff] %vm2182_vm6, %v3131_v17  ;;  %v3643_v48 = vpop.f32.mrb[42].mxu1 }
 0x34f   :  { %v2888_v35 = vadd.f32 %v3643_v48, %v6105_v56  ;;  %v2882_v19 = vpop.f32.mrb[43].mxu1 }
 0x350   :  { %v2883_v43 = vadd.f32 %v6105_v56, %v2882_v19 }
 0x352   :  { %3877 = vtanh.f32 %v2883_v43 }
 0x353   :  { %3879 = vtanh.f32 %v2888_v35 }
 0x35a   :  { %v3674_v61 = vpop.f32.mrb[20].mxu0 }
 0x35b   :  { %v3146_v6 = vadd.f32 %v3674_v61, %v6238_v1  ;;  %v3140_v47 = vpop.f32.mrb[21].mxu0 }
 0x35c   :  { %v3878_v63 = vpop.eup %3877  ;;  %v3141_v28 = vadd.f32 %v6238_v1, %v3140_v47 }
 0x35d   :  { %v3880_v4 = vpop.eup %3879  ;;  %3284 = vst.msk [vmem:[%s6425_s9 + $0x28] sm:$0xff] %vm2182_vm6, %v3146_v6  ;;  %3705 = vmatprep.mubr.msk.f32.mxu0 %vm2589_vm15, %v3878_v63 }
 0x35e   :  { %3283 = vst.msk [vmem:[%s6425_s9 + $0x20] sm:$0xff] %vm2182_vm6, %v3141_v28  ;;  %v3646_v14 = vpop.f32.mrb[44].mxu1  ;;  %3706 = vmatmul.mubr.msk.f32.gmra.mrb[42].mxu0 %vm2589_vm15, %v3880_v4 }
 0x35f   :  { %v2898_v36 = vadd.f32 %v3646_v14, %v6105_v56  ;;  %v2892_v44 = vpop.f32.mrb[45].mxu1 }
 0x360   :  { %v2893_v24 = vadd.f32 %v6105_v56, %v2892_v44 }
 0x362   :  { %3881 = vtanh.f32 %v2893_v24 }
 0x363   :  { %3883 = vtanh.f32 %v2898_v36 }
 0x368   :  { %v3649_v21 = vpop.f32.mrb[46].mxu1 }
 0x369   :  { %v2908_v59 = vadd.f32 %v3649_v21, %v6105_v56  ;;  %v2902_v26 = vpop.f32.mrb[47].mxu1  ;;  %v3677_v16 = vpop.f32.mrb[22].mxu0 }
 0x36a   :  { %v2903_v55 = vadd.f32 %v6105_v56, %v2902_v26  ;;  %v3156_v12 = vadd.f32 %v3677_v16, %v6238_v1  ;;  %v3150_v42 = vpop.f32.mrb[23].mxu0 }
 0x36b   :  { %v3151_v40 = vadd.f32 %v6238_v1, %v3150_v42 }
 0x36c   :  { %v3882_v29 = vpop.eup %3881  ;;  %3885 = vtanh.f32 %v2903_v55  ;;  %3286 = vst.msk [vmem:[%s6425_s9 + $0x38] sm:$0xff] %vm2182_vm6, %v3156_v12 }
 0x36d   :  { %v3884_v30 = vpop.eup %3883  ;;  %3887 = vtanh.f32 %v2908_v59  ;;  %3708 = vmatprep.mubr.msk.f32.mxu0 %vm2589_vm15, %v3882_v29  ;;  %3285 = vst.msk [vmem:[%s6425_s9 + $0x30] sm:$0xff] %vm2182_vm6, %v3151_v40 }
 0x36e   :  { %3709 = vmatmul.mubr.msk.f32.gmra.mrb[44].mxu0 %vm2589_vm15, %v3884_v30 }
 0x376   :  { %v3886_v56 = vpop.eup %3885 }
 0x377   :  { %v3888_v58 = vpop.eup %3887  ;;  %3711 = vmatprep.mubr.msk.f32.mxu0 %vm2589_vm15, %v3886_v56 }
 0x378   :  { %3712 = vmatmul.mubr.msk.f32.gmra.mrb[46].mxu0 %vm2589_vm15, %v3888_v58 }
 0x37d   :  { %v3680_v45 = vpop.f32.mrb[24].mxu0 }
 0x37e   :  { %v3166_v60 = vadd.f32 %v3680_v45, %v6238_v1  ;;  %v3160_v37 = vpop.f32.mrb[25].mxu0 }
 0x37f   :  { %v3161_v62 = vadd.f32 %v6238_v1, %v3160_v37 }
 0x380   :  { %3288 = vst.msk [vmem:[%s6425_s9 + $0x48] sm:$0xff] %vm2182_vm6, %v3166_v60 }
 0x381   :  { %3287 = vst.msk [vmem:[%s6425_s9 + $0x40] sm:$0xff] %vm2182_vm6, %v3161_v62 }
 0x391   :  { %v3683_v20 = vpop.f32.mrb[26].mxu0 }
 0x392   :  { %v3176_v3 = vadd.f32 %v3683_v20, %v6238_v1  ;;  %v3170_v57 = vpop.f32.mrb[27].mxu0 }
 0x393   :  { %v3171_v15 = vadd.f32 %v6238_v1, %v3170_v57 }
 0x394   :  { %3290 = vst.msk [vmem:[%s6425_s9 + $0x58] sm:$0xff] %vm2182_vm6, %v3176_v3 }
 0x395   :  { %3289 = vst.msk [vmem:[%s6425_s9 + $0x50] sm:$0xff] %vm2182_vm6, %v3171_v15 }
 0x3a5   :  { %v3686_v34 = vpop.f32.mrb[28].mxu0 }
 0x3a6   :  { %v3186_v7 = vadd.f32 %v3686_v34, %v6238_v1  ;;  %v3180_v25 = vpop.f32.mrb[29].mxu0 }
 0x3a7   :  { %v3181_v2 = vadd.f32 %v6238_v1, %v3180_v25 }
 0x3a8   :  { %3292 = vst.msk [vmem:[%s6425_s9 + $0x68] sm:$0xff] %vm2182_vm6, %v3186_v7 }
 0x3a9   :  { %3291 = vst.msk [vmem:[%s6425_s9 + $0x60] sm:$0xff] %vm2182_vm6, %v3181_v2 }
 0x3b9   :  { %v3689_v51 = vpop.f32.mrb[30].mxu0 }
 0x3ba   :  { %v3196_v22 = vadd.f32 %v3689_v51, %v6238_v1  ;;  %v3190_v39 = vpop.f32.mrb[31].mxu0 }
 0x3bb   :  { %v3191_v0 = vadd.f32 %v6238_v1, %v3190_v39 }
 0x3bc   :  { %3294 = vst.msk [vmem:[%s6425_s9 + $0x78] sm:$0xff] %vm2182_vm6, %v3196_v22 }
 0x3bd   :  { %3293 = vst.msk [vmem:[%s6425_s9 + $0x70] sm:$0xff] %vm2182_vm6, %v3191_v0 }
 0x3cd   :  { %v3692_v5 = vpop.f32.mrb[32].mxu0 }
 0x3ce   :  { %v3206_v49 = vadd.f32 %v3692_v5, %v6238_v1  ;;  %v3200_v33 = vpop.f32.mrb[33].mxu0 }
 0x3cf   :  { %v3201_v32 = vadd.f32 %v6238_v1, %v3200_v33 }
 0x3d0   :  { %3296 = vst.msk [vmem:[%s6425_s9 + $0x88] sm:$0xff] %vm2182_vm6, %v3206_v49 }
 0x3d1   :  { %3295 = vst.msk [vmem:[%s6425_s9 + $0x80] sm:$0xff] %vm2182_vm6, %v3201_v32 }
 0x3e1   :  { %v3695_v41 = vpop.f32.mrb[34].mxu0 }
 0x3e2   :  { %v3216_v9 = vadd.f32 %v3695_v41, %v6238_v1  ;;  %v3210_v31 = vpop.f32.mrb[35].mxu0 }
 0x3e3   :  { %v3211_v50 = vadd.f32 %v6238_v1, %v3210_v31 }
 0x3e4   :  { %3298 = vst.msk [vmem:[%s6425_s9 + $0x98] sm:$0xff] %vm2182_vm6, %v3216_v9 }
 0x3e5   :  { %3297 = vst.msk [vmem:[%s6425_s9 + $0x90] sm:$0xff] %vm2182_vm6, %v3211_v50 }
 0x3f5   :  { %v3698_v23 = vpop.f32.mrb[36].mxu0 }
 0x3f6   :  { %v3226_v27 = vadd.f32 %v3698_v23, %v6238_v1  ;;  %v3220_v46 = vpop.f32.mrb[37].mxu0 }
 0x3f7   :  { %v3221_v10 = vadd.f32 %v6238_v1, %v3220_v46 }
 0x3f8   :  { %3300 = vst.msk [vmem:[%s6425_s9 + $0xa8] sm:$0xff] %vm2182_vm6, %v3226_v27 }
 0x3f9   :  { %3299 = vst.msk [vmem:[%s6425_s9 + $0xa0] sm:$0xff] %vm2182_vm6, %v3221_v10 }
 0x409   :  { %v3701_v8 = vpop.f32.mrb[38].mxu0 }
 0x40a   :  { %v3236_v11 = vadd.f32 %v3701_v8, %v6238_v1  ;;  %v3230_v18 = vpop.f32.mrb[39].mxu0 }
 0x40b   :  { %v3231_v52 = vadd.f32 %v6238_v1, %v3230_v18 }
 0x40c   :  { %3302 = vst.msk [vmem:[%s6425_s9 + $0xb8] sm:$0xff] %vm2182_vm6, %v3236_v11 }
 0x40d   :  { %3301 = vst.msk [vmem:[%s6425_s9 + $0xb0] sm:$0xff] %vm2182_vm6, %v3231_v52 }
 0x41d   :  { %v3704_v53 = vpop.f32.mrb[40].mxu0 }
 0x41e   :  { %v3246_v38 = vadd.f32 %v3704_v53, %v6238_v1  ;;  %v3240_v54 = vpop.f32.mrb[41].mxu0 }
 0x41f   :  { %v3241_v13 = vadd.f32 %v6238_v1, %v3240_v54 }
 0x420   :  { %3304 = vst.msk [vmem:[%s6425_s9 + $0xc8] sm:$0xff] %vm2182_vm6, %v3246_v38 }
 0x421   :  { %3303 = vst.msk [vmem:[%s6425_s9 + $0xc0] sm:$0xff] %vm2182_vm6, %v3241_v13 }
 0x431   :  { %v3707_v17 = vpop.f32.mrb[42].mxu0 }
 0x432   :  { %v3256_v48 = vadd.f32 %v3707_v17, %v6238_v1  ;;  %v3250_v35 = vpop.f32.mrb[43].mxu0 }
 0x433   :  { %v3251_v19 = vadd.f32 %v6238_v1, %v3250_v35 }
 0x434   :  { %3306 = vst.msk [vmem:[%s6425_s9 + $0xd8] sm:$0xff] %vm2182_vm6, %v3256_v48 }
 0x435   :  { %3305 = vst.msk [vmem:[%s6425_s9 + $0xd0] sm:$0xff] %vm2182_vm6, %v3251_v19 }
 0x441   :  { %v3710_v43 = vpop.f32.mrb[44].mxu0 }
 0x442   :  { %v3266_v61 = vadd.f32 %v3710_v43, %v6238_v1  ;;  %v3260_v6 = vpop.f32.mrb[45].mxu0 }
 0x443   :  { %v3261_v47 = vadd.f32 %v6238_v1, %v3260_v6 }
 0x444   :  { %3308 = vst.msk [vmem:[%s6425_s9 + $0xe8] sm:$0xff] %vm2182_vm6, %v3266_v61 }
 0x445   :  { %3307 = vst.msk [vmem:[%s6425_s9 + $0xe0] sm:$0xff] %vm2182_vm6, %v3261_v47 }
 0x44b   :  { %v3713_v63 = vpop.f32.mrb[46].mxu0 }
 0x44c   :  { %v3276_v28 = vadd.f32 %v3713_v63, %v6238_v1  ;;  %v3270_v4 = vpop.f32.mrb[47].mxu0 }
 0x44d   :  { %v3271_v14 = vadd.f32 %v6238_v1, %v3270_v4 }
 0x44e   :  { %3310 = vst.msk [vmem:[%s6425_s9 + $0xf8] sm:$0xff] %vm2182_vm6, %v3276_v28 }
 0x44f   :  { %3309 = vst.msk [vmem:[%s6425_s9 + $0xf0] sm:$0xff] %vm2182_vm6, %v3271_v14 }

</bundles_post_ra>
